<compile_context>
chip_gen: v5e
topology: v5e:2x2
jax: 0.10.0
libtpu: 0.0.40
codegen_flags: <defaults>
</compile_context>

<pallas_src>
import functools
import math

import jax
import jax.numpy as jnp
from jax import lax
from jax.experimental import pallas as pl
from jax.experimental.pallas import tpu as pltpu


# ------------------------------ fused encoder kernel ----------------------------- #

def _encoder_kernel(
    pe_ref, x_ref, m_ref,
    n1a_ref, n1b_ref,
    wq_ref, bq_ref, wkv_t_ref, bkv_t_ref, wo_ref, bo_ref,
    n2a_ref, n2b_ref,
    w1_ref, b1_ref, w2_ref, b2_ref,
    fna_ref, fnb_ref,
    o_ref,
    x_scr, attn_scr,
    *, n_heads, d_k, eps, pe_scale, n_layers,
):
    l = pl.program_id(1)                       # layer index (grid axis 1, "arbitrary")

    # Layer 0: apply positional encoding to the fresh batch row and park the
    # running activation in VMEM scratch (resident across all layer iterations).
    @pl.when(l == 0)
    def _():
        x_scr[...] = x_ref[0] * pe_scale + pe_ref[...]

    x = x_scr[...]                             # (S, D) f32
    S, D = x.shape
    inv_dm1 = 1.0 / (D - 1)

    def layer_norm(v, a, b):
        # Tutorial LayerNorm: alpha*(v-mean)/(v.std(unbiased)+eps)+bias (exact math).
        mean = jnp.mean(v, axis=-1, keepdims=True)
        diff = v - mean
        var = jnp.sum(diff * diff, axis=-1, keepdims=True) * inv_dm1
        return a * (diff / (jnp.sqrt(var) + eps)) + b

    # ---------------- attention sub-block (pre-norm, residual fused) --------------- #
    x2 = layer_norm(x, n1a_ref[0], n1b_ref[0])
    x2b = x2.astype(jnp.bfloat16)

    # Q row-major; K/V produced transposed (2D, S) so per-head K/V slices are
    # aligned sublane slices rather than narrow lane slices.
    q = jnp.dot(x2b, wq_ref[0], preferred_element_type=jnp.float32) + bq_ref[0]
    kvT = lax.dot_general(wkv_t_ref[0], x2b, (((1,), (1,)), ((), ())),
                          preferred_element_type=jnp.float32) + bkv_t_ref[0]

    key_masked = m_ref[0] == 0                 # (1, S) bool; broadcasts over query rows
    scale = 1.0 / math.sqrt(d_k)
    neg = jnp.float32(-1e9)

    for h in range(n_heads):                   # unrolled; all dots are plain 2-D NN/NT
        lo = h * d_k
        qh = q[:, lo:lo + d_k].astype(jnp.bfloat16)               # (S, dk)
        kTh = kvT[lo:lo + d_k, :].astype(jnp.bfloat16)            # (dk, S)
        vTh = kvT[D + lo:D + lo + d_k, :].astype(jnp.bfloat16)    # (dk, S)

        s = jnp.dot(qh, kTh, preferred_element_type=jnp.float32) * scale   # (S, S)
        s = jnp.where(key_masked, neg, s)                  # masked_fill(mask==0, -1e9)
        s = s - jnp.max(s, axis=-1, keepdims=True)         # stable softmax
        p = jnp.exp(s)
        p = p * pl.reciprocal(jnp.sum(p, axis=-1, keepdims=True), approx=True)

        # o_h = P @ V_h via an NT dot against the transposed V slice
        oh = lax.dot_general(p.astype(jnp.bfloat16), vTh, (((1,), (1,)), ((), ())),
                             preferred_element_type=jnp.float32)            # (S, dk)
        attn_scr[:, lo:lo + d_k] = oh           # place head output in its lane slot

    # ONE full-depth (S,D)@(D,D) output projection (instead of H K=d_k matmuls).
    attn = jnp.dot(attn_scr[...].astype(jnp.bfloat16), wo_ref[0],
                   preferred_element_type=jnp.float32) + bo_ref[0]
    x = x + attn

    # ------------------------ FFN sub-block (residual fused) ----------------------- #
    x2 = layer_norm(x, n2a_ref[0], n2b_ref[0])
    h1 = jnp.dot(x2.astype(jnp.bfloat16), w1_ref[0],
                 preferred_element_type=jnp.float32) + b1_ref[0]
    h1 = jnp.maximum(h1, 0.0)
    ffn = jnp.dot(h1.astype(jnp.bfloat16), w2_ref[0],
                  preferred_element_type=jnp.float32) + b2_ref[0]
    x = x + ffn

    x_scr[...] = x                              # carry activation to the next layer

    @pl.when(l == n_layers - 1)                 # final encoder LayerNorm, lane-dense store
    def _():
        o_ref[0] = layer_norm(x, fna_ref[...], fnb_ref[...])


# --------------------------------- kernel wrapper -------------------------------- #

def transformer_forward(src, src_mask, params, n_heads):
    """src: (B, S, D) f32; src_mask: (B, 1, S) (0 = masked key)."""
    B, S, D = src.shape
    L = params["wq"].shape[0]
    Dff = params["w1"].shape[-1]
    d_k = D // n_heads

    pe = make_positional_encoding(S, D)
    mask = src_mask.reshape(B, 1, S).astype(jnp.int32)

    kernel = functools.partial(
        _encoder_kernel, n_heads=n_heads, d_k=d_k, eps=1e-6,
        pe_scale=math.sqrt(D), n_layers=L)

    def layer_spec(*dims):                      # stacked per-layer weights: index by l
        nd = len(dims)
        return pl.BlockSpec((1, *dims), lambda b, l, _nd=nd: (l,) + (0,) * _nd)

    const2 = lambda b, l: (0, 0)                # resident across the whole grid
    batch3 = lambda b, l: (b, 0, 0)             # per-batch activation block

    in_specs = [
        pl.BlockSpec((S, D), const2),           # pe
        pl.BlockSpec((1, S, D), batch3),        # x (read only at l == 0)
        pl.BlockSpec((1, 1, S), batch3),        # mask
        layer_spec(1, D), layer_spec(1, D),     # norm1 alpha / bias
        layer_spec(D, D), layer_spec(1, D),     # wq (bf16), bq
        layer_spec(2 * D, D), layer_spec(2 * D, 1),  # wkv^T (bf16), bkv^T
        layer_spec(D, D), layer_spec(1, D),     # wo (bf16), bo
        layer_spec(1, D), layer_spec(1, D),     # norm2 alpha / bias
        layer_spec(D, Dff), layer_spec(1, Dff),  # w1 (bf16), b1
        layer_spec(Dff, D), layer_spec(1, D),   # w2 (bf16), b2
        pl.BlockSpec((1, D), const2),           # final norm alpha
        pl.BlockSpec((1, D), const2),           # final norm bias
    ]

    return pl.pallas_call(
        kernel,
        out_shape=jax.ShapeDtypeStruct((B, S, D), jnp.float32),
        grid=(B, L),                            # batch parallel, layers sequential
        in_specs=in_specs,
        out_specs=pl.BlockSpec((1, S, D), batch3),
        scratch_shapes=[
            pltpu.VMEM((S, D), jnp.float32),    # running activation across layers
            pltpu.VMEM((S, D), jnp.float32),    # concatenated per-head attention out
        ],
        compiler_params=pltpu.CompilerParams(
            dimension_semantics=("parallel", "arbitrary"),
            vmem_limit_bytes=64 * 1024 * 1024),
    )(pe, src, mask,
      params["n1a"], params["n1b"],
      params["wq"], params["bq"], params["wkv_t"], params["bkv_t"],
      params["wo"], params["bo"],
      params["n2a"], params["n2b"],
      params["w1"], params["b1"], params["w2"], params["b2"],
      params["fna"], params["fnb"])


# ----------------------------- model glue (plain JAX) ---------------------------- #

def make_positional_encoding(max_len, d_model):
    pos = jnp.arange(max_len, dtype=jnp.float32)[:, None]          # (L, 1)
    i = jnp.arange(0, d_model, 2, dtype=jnp.float32)[None, :]      # (1, D/2)
    pe_sin = jnp.sin(pos / jnp.power(10000.0, (2.0 * i) / d_model))
    pe_cos = jnp.cos(pos / jnp.power(10000.0, (2.0 * (i + 1.0)) / d_model))
    pe = jnp.zeros((max_len, d_model), jnp.float32)
    pe = pe.at[:, 0::2].set(pe_sin)
    pe = pe.at[:, 1::2].set(pe_cos)
    return pe


def init_params(key, d_model, n_heads, N, d_ff):
    def dense(k, din, dout):
        kw, kb = jax.random.split(k)
        w = jax.random.normal(kw, (din, dout), jnp.float32) * 0.05
        b = jax.random.normal(kb, (dout,), jnp.float32) * 0.01
        return w, b

    acc = {k: [] for k in ("n1a", "n1b", "wq", "bq", "wkv_t", "bkv_t", "wo", "bo",
                           "n2a", "n2b", "w1", "b1", "w2", "b2")}
    for _ in range(N):
        key, *ks = jax.random.split(key, 7)
        wq, bq = dense(ks[0], d_model, d_model)
        wk, bk = dense(ks[1], d_model, d_model)
        wv, bv = dense(ks[2], d_model, d_model)
        wo, bo = dense(ks[3], d_model, d_model)
        w1, b1 = dense(ks[4], d_model, d_ff)
        w2, b2 = dense(ks[5], d_ff, d_model)
        acc["wq"].append(wq.astype(jnp.bfloat16))
        acc["bq"].append(bq.reshape(1, d_model))
        # K/V weights stored pre-transposed: the kernel computes kvT = Wkv^T @ x2^T
        # with an NT dot so per-head K/V slices are aligned sublane slices.
        acc["wkv_t"].append(jnp.concatenate([wk.T, wv.T], axis=0).astype(jnp.bfloat16))
        acc["bkv_t"].append(jnp.concatenate([bk, bv]).reshape(2 * d_model, 1))
        acc["wo"].append(wo.astype(jnp.bfloat16))
        acc["bo"].append(bo.reshape(1, d_model))
        acc["w1"].append(w1.astype(jnp.bfloat16))
        acc["b1"].append(b1.reshape(1, d_ff))
        acc["w2"].append(w2.astype(jnp.bfloat16))
        acc["b2"].append(b2.reshape(1, d_model))
        acc["n1a"].append(jnp.ones((1, d_model), jnp.float32))
        acc["n1b"].append(jnp.zeros((1, d_model), jnp.float32))
        acc["n2a"].append(jnp.ones((1, d_model), jnp.float32))
        acc["n2b"].append(jnp.zeros((1, d_model), jnp.float32))

    params = {k: jnp.stack(v, axis=0) for k, v in acc.items()}
    params["fna"] = jnp.ones((1, d_model), jnp.float32)
    params["fnb"] = jnp.zeros((1, d_model), jnp.float32)
    return params


# --------------------------------------- main ------------------------------------ #

if __name__ == "__main__":
    # Small shapes consistent with the module: d_model a multiple of 128 so all
    # activation blocks / stores are lane-dense; S a multiple of 8; B>=2 so both
    # TensorCores on a v7x chip get a parallel grid step.
    B, S = 2, 16
    d_model, n_heads, N = 128, 8, 2
    d_ff = 256            # tutorial default is 2048; kept small for the synthetic run

    key = jax.random.PRNGKey(0)
    k_src, k_mask, k_params = jax.random.split(key, 3)

    # `src` feeds PositionalEncoder directly (no embedding in this Encoder),
    # so it is already a (B, S, d_model) float tensor.
    src = jax.random.normal(k_src, (B, S, d_model), jnp.float32)
    src_mask = (jax.random.uniform(k_mask, (B, 1, S)) > 0.2).astype(jnp.int32)

    params = init_params(k_params, d_model, n_heads, N, d_ff)

    out = transformer_forward(src, src_mask, params, n_heads)
    out = jax.block_until_ready(out)

    assert out.shape == (B, S, d_model) and out.dtype == jnp.float32
    assert bool(jnp.all(jnp.isfinite(out)))
    print("KERNEL_OK")
</pallas_src>

<mosaic_0001>
module attributes {stable_mosaic.version = 11 : i64} {
  func.func @_encoder_kernel(%arg0: i32, %arg1: i32, %arg2: memref<16x128xf32, #tpu.memory_space<vmem>>, %arg3: memref<1x16x128xf32, #tpu.memory_space<vmem>>, %arg4: memref<1x1x16xi32, #tpu.memory_space<vmem>>, %arg5: memref<1x1x128xf32, #tpu.memory_space<vmem>>, %arg6: memref<1x1x128xf32, #tpu.memory_space<vmem>>, %arg7: memref<1x128x128xbf16, #tpu.memory_space<vmem>>, %arg8: memref<1x1x128xf32, #tpu.memory_space<vmem>>, %arg9: memref<1x256x128xbf16, #tpu.memory_space<vmem>>, %arg10: memref<1x256x1xf32, #tpu.memory_space<vmem>>, %arg11: memref<1x128x128xbf16, #tpu.memory_space<vmem>>, %arg12: memref<1x1x128xf32, #tpu.memory_space<vmem>>, %arg13: memref<1x1x128xf32, #tpu.memory_space<vmem>>, %arg14: memref<1x1x128xf32, #tpu.memory_space<vmem>>, %arg15: memref<1x128x256xbf16, #tpu.memory_space<vmem>>, %arg16: memref<1x1x256xf32, #tpu.memory_space<vmem>>, %arg17: memref<1x256x128xbf16, #tpu.memory_space<vmem>>, %arg18: memref<1x1x128xf32, #tpu.memory_space<vmem>>, %arg19: memref<1x128xf32, #tpu.memory_space<vmem>>, %arg20: memref<1x128xf32, #tpu.memory_space<vmem>>, %arg21: memref<1x16x128xf32, #tpu.memory_space<vmem>>, %arg22: memref<16x128xf32, #tpu.memory_space<vmem>>, %arg23: memref<16x128xf32, #tpu.memory_space<vmem>>) attributes {dimension_semantics = [#tpu.dimension_semantics<parallel>, #tpu.dimension_semantics<arbitrary>], iteration_bounds = array<i64: 2, 2>, scalar_prefetch = 0 : i64, scratch_operands = 2 : i64, tpu.core_type = #tpu.core_type<tc>, window_params = [{pipeline_mode = #tpu.pipeline_mode<synchronous>, transform_indices = @transform_0, window_bounds = array<i64: 16, 128>}, {transform_indices = @transform_1, window_bounds = array<i64: 1, 16, 128>}, {transform_indices = @transform_2, window_bounds = array<i64: 1, 1, 16>}, {transform_indices = @transform_3, window_bounds = array<i64: 1, 1, 128>}, {transform_indices = @transform_4, window_bounds = array<i64: 1, 1, 128>}, {transform_indices = @transform_5, window_bounds = array<i64: 1, 128, 128>}, {transform_indices = @transform_6, window_bounds = array<i64: 1, 1, 128>}, {transform_indices = @transform_7, window_bounds = array<i64: 1, 256, 128>}, {transform_indices = @transform_8, window_bounds = array<i64: 1, 256, 1>}, {transform_indices = @transform_9, window_bounds = array<i64: 1, 128, 128>}, {transform_indices = @transform_10, window_bounds = array<i64: 1, 1, 128>}, {transform_indices = @transform_11, window_bounds = array<i64: 1, 1, 128>}, {transform_indices = @transform_12, window_bounds = array<i64: 1, 1, 128>}, {transform_indices = @transform_13, window_bounds = array<i64: 1, 128, 256>}, {transform_indices = @transform_14, window_bounds = array<i64: 1, 1, 256>}, {transform_indices = @transform_15, window_bounds = array<i64: 1, 256, 128>}, {transform_indices = @transform_16, window_bounds = array<i64: 1, 1, 128>}, {pipeline_mode = #tpu.pipeline_mode<synchronous>, transform_indices = @transform_17, window_bounds = array<i64: 1, 128>}, {pipeline_mode = #tpu.pipeline_mode<synchronous>, transform_indices = @transform_18, window_bounds = array<i64: 1, 128>}, {transform_indices = @transform_19, window_bounds = array<i64: 1, 16, 128>}]} {
    %c0_i32 = arith.constant 0 : i32
    %0 = arith.cmpi eq, %arg1, %c0_i32 : i32
    %1 = arith.extui %0 : i1 to i32
    %c0_i32_0 = arith.constant 0 : i32
    %2 = arith.cmpi ne, %1, %c0_i32_0 : i32
    scf.if %2 {
      %c0_125 = arith.constant 0 : index
      %c0_126 = arith.constant 0 : index
      %c0_127 = arith.constant 0 : index
      %312 = vector.load %arg3[%c0_125, %c0_126, %c0_127] : memref<1x16x128xf32, #tpu.memory_space<vmem>>, vector<1x16x128xf32>
      %313 = vector.shape_cast %312 : vector<1x16x128xf32> to vector<16x128xf32>
      %cst_128 = arith.constant 11.3137083 : f32
      %314 = vector.broadcast %cst_128 : f32 to vector<16x128xf32>
      %315 = arith.mulf %313, %314 : vector<16x128xf32>
      %c0_129 = arith.constant 0 : index
      %c0_130 = arith.constant 0 : index
      %316 = vector.load %arg2[%c0_129, %c0_130] : memref<16x128xf32, #tpu.memory_space<vmem>>, vector<16x128xf32>
      %317 = arith.addf %315, %316 : vector<16x128xf32>
      %c0_131 = arith.constant 0 : index
      %c0_132 = arith.constant 0 : index
      %318 = vector.load %arg22[%c0_131, %c0_132] : memref<16x128xf32, #tpu.memory_space<vmem>>, vector<16x128xf32>
      tpu.vector_store %arg22[%c0_131, %c0_132], %317 {strides = array<i32>} : memref<16x128xf32, #tpu.memory_space<vmem>>, vector<16x128xf32>,
    } else {
    }
    %c0 = arith.constant 0 : index
    %c0_1 = arith.constant 0 : index
    %3 = vector.load %arg22[%c0, %c0_1] : memref<16x128xf32, #tpu.memory_space<vmem>>, vector<16x128xf32>
    %c0_2 = arith.constant 0 : index
    %c0_3 = arith.constant 0 : index
    %c0_4 = arith.constant 0 : index
    %4 = vector.load %arg5[%c0_2, %c0_3, %c0_4] : memref<1x1x128xf32, #tpu.memory_space<vmem>>, vector<1x1x128xf32>
    %5 = vector.shape_cast %4 : vector<1x1x128xf32> to vector<1x128xf32>
    %c0_5 = arith.constant 0 : index
    %c0_6 = arith.constant 0 : index
    %c0_7 = arith.constant 0 : index
    %6 = vector.load %arg6[%c0_5, %c0_6, %c0_7] : memref<1x1x128xf32, #tpu.memory_space<vmem>>, vector<1x1x128xf32>
    %7 = vector.shape_cast %6 : vector<1x1x128xf32> to vector<1x128xf32>
    %cst = arith.constant dense<0.000000e+00> : vector<16xf32>
    %8 = vector.multi_reduction <add>, %3, %cst [1] : vector<16x128xf32> to vector<16xf32>
    %9 = vector.shape_cast %8 : vector<16xf32> to vector<16x1xf32>
    %cst_8 = arith.constant 1.280000e+02 : f32
    %10 = vector.broadcast %cst_8 : f32 to vector<16x1xf32>
    %11 = arith.divf %9, %10 : vector<16x1xf32>
    %12 = vector.broadcast %11 : vector<16x1xf32> to vector<16x128xf32>
    %13 = arith.subf %3, %12 : vector<16x128xf32>
    %14 = arith.mulf %13, %13 : vector<16x128xf32>
    %cst_9 = arith.constant dense<0.000000e+00> : vector<16xf32>
    %15 = vector.multi_reduction <add>, %14, %cst_9 [1] : vector<16x128xf32> to vector<16xf32>
    %16 = vector.shape_cast %15 : vector<16xf32> to vector<16x1xf32>
    %cst_10 = arith.constant 0.00787401571 : f32
    %17 = vector.broadcast %cst_10 : f32 to vector<16x1xf32>
    %18 = arith.mulf %16, %17 : vector<16x1xf32>
    %19 = math.sqrt %18 : vector<16x1xf32>
    %cst_11 = arith.constant 9.99999997E-7 : f32
    %20 = vector.broadcast %cst_11 : f32 to vector<16x1xf32>
    %21 = arith.addf %19, %20 : vector<16x1xf32>
    %22 = vector.broadcast %21 : vector<16x1xf32> to vector<16x128xf32>
    %23 = arith.divf %13, %22 : vector<16x128xf32>
    %24 = vector.broadcast %5 : vector<1x128xf32> to vector<16x128xf32>
    %25 = arith.mulf %24, %23 : vector<16x128xf32>
    %26 = vector.broadcast %7 : vector<1x128xf32> to vector<16x128xf32>
    %27 = arith.addf %25, %26 : vector<16x128xf32>
    %28 = arith.truncf %27 : vector<16x128xf32> to vector<16x128xbf16>
    %c0_12 = arith.constant 0 : index
    %c0_13 = arith.constant 0 : index
    %c0_14 = arith.constant 0 : index
    %29 = vector.load %arg7[%c0_12, %c0_13, %c0_14] : memref<1x128x128xbf16, #tpu.memory_space<vmem>>, vector<1x128x128xbf16>
    %30 = vector.shape_cast %29 : vector<1x128x128xbf16> to vector<128x128xbf16>
    %cst_15 = arith.constant dense<0.000000e+00> : vector<16x128xf32>
    %31 = tpu.matmul %28, %30, %cst_15 {dimension_numbers = #tpu.dot_dimension_numbers<[1], [0], [0], [1], [0, 0, 1, 1], [], []>} : vector<16x128xbf16>, vector<128x128xbf16>, vector<16x128xf32> -> vector<16x128xf32>
    %c0_16 = arith.constant 0 : index
    %c0_17 = arith.constant 0 : index
    %c0_18 = arith.constant 0 : index
    %32 = vector.load %arg8[%c0_16, %c0_17, %c0_18] : memref<1x1x128xf32, #tpu.memory_space<vmem>>, vector<1x1x128xf32>
    %33 = vector.shape_cast %32 : vector<1x1x128xf32> to vector<1x128xf32>
    %34 = vector.broadcast %33 : vector<1x128xf32> to vector<16x128xf32>
    %35 = arith.addf %31, %34 : vector<16x128xf32>
    %c0_19 = arith.constant 0 : index
    %c0_20 = arith.constant 0 : index
    %c0_21 = arith.constant 0 : index
    %36 = vector.load %arg9[%c0_19, %c0_20, %c0_21] : memref<1x256x128xbf16, #tpu.memory_space<vmem>>, vector<1x256x128xbf16>
    %37 = vector.shape_cast %36 : vector<1x256x128xbf16> to vector<256x128xbf16>
    %cst_22 = arith.constant dense<0.000000e+00> : vector<256x16xf32>
    %38 = tpu.matmul %37, %28, %cst_22 {dimension_numbers = #tpu.dot_dimension_numbers<[1], [1], [0], [0], [0, 0, 1, 0], [], []>} : vector<256x128xbf16>, vector<16x128xbf16>, vector<256x16xf32> -> vector<256x16xf32>
    %c0_23 = arith.constant 0 : index
    %c0_24 = arith.constant 0 : index
    %c0_25 = arith.constant 0 : index
    %39 = vector.load %arg10[%c0_23, %c0_24, %c0_25] : memref<1x256x1xf32, #tpu.memory_space<vmem>>, vector<1x256x1xf32>
    %40 = vector.shape_cast %39 : vector<1x256x1xf32> to vector<256x1xf32>
    %41 = vector.broadcast %40 : vector<256x1xf32> to vector<256x16xf32>
    %42 = arith.addf %38, %41 : vector<256x16xf32>
    %c0_26 = arith.constant 0 : index
    %c0_27 = arith.constant 0 : index
    %c0_28 = arith.constant 0 : index
    %43 = vector.load %arg4[%c0_26, %c0_27, %c0_28] : memref<1x1x16xi32, #tpu.memory_space<vmem>>, vector<1x1x16xi32>
    %44 = vector.shape_cast %43 : vector<1x1x16xi32> to vector<1x16xi32>
    %c0_i32_29 = arith.constant 0 : i32
    %45 = vector.broadcast %c0_i32_29 : i32 to vector<1x16xi32>
    %46 = arith.cmpi eq, %44, %45 : vector<1x16xi32>
    %47 = vector.extract_strided_slice %35 {offsets = [0, 0], sizes = [16, 16], strides = [1, 1]} : vector<16x128xf32> to vector<16x16xf32>
    %48 = arith.truncf %47 : vector<16x16xf32> to vector<16x16xbf16>
    %49 = vector.extract_strided_slice %42 {offsets = [0, 0], sizes = [16, 16], strides = [1, 1]} : vector<256x16xf32> to vector<16x16xf32>
    %50 = arith.truncf %49 : vector<16x16xf32> to vector<16x16xbf16>
    %51 = vector.extract_strided_slice %42 {offsets = [128, 0], sizes = [16, 16], strides = [1, 1]} : vector<256x16xf32> to vector<16x16xf32>
    %52 = arith.truncf %51 : vector<16x16xf32> to vector<16x16xbf16>
    %cst_30 = arith.constant dense<0.000000e+00> : vector<16x16xf32>
    %53 = tpu.matmul %48, %50, %cst_30 {dimension_numbers = #tpu.dot_dimension_numbers<[1], [0], [0], [1], [0, 0, 1, 1], [], []>} : vector<16x16xbf16>, vector<16x16xbf16>, vector<16x16xf32> -> vector<16x16xf32>
    %cst_31 = arith.constant 2.500000e-01 : f32
    %54 = vector.broadcast %cst_31 : f32 to vector<16x16xf32>
    %55 = arith.mulf %53, %54 : vector<16x16xf32>
    %cst_32 = arith.constant -1.000000e+09 : f32
    %56 = vector.shape_cast %46 : vector<1x16xi1> to vector<1x16xi1>
    %57 = vector.broadcast %56 : vector<1x16xi1> to vector<16x16xi1>
    %58 = vector.broadcast %cst_32 : f32 to vector<16x16xf32>
    %59 = arith.select %57, %58, %55 : vector<16x16xi1>, vector<16x16xf32>
    %cst_33 = arith.constant dense<0xFF800000> : vector<16xf32>
    %60 = vector.multi_reduction <maximumf>, %59, %cst_33 [1] : vector<16x16xf32> to vector<16xf32>
    %61 = vector.shape_cast %60 : vector<16xf32> to vector<16x1xf32>
    %62 = vector.broadcast %61 : vector<16x1xf32> to vector<16x16xf32>
    %63 = arith.subf %59, %62 : vector<16x16xf32>
    %64 = math.exp %63 : vector<16x16xf32>
    %cst_34 = arith.constant dense<0.000000e+00> : vector<16xf32>
    %65 = vector.multi_reduction <add>, %64, %cst_34 [1] : vector<16x16xf32> to vector<16xf32>
    %66 = vector.shape_cast %65 : vector<16xf32> to vector<16x1xf32>
    %67 = tpu.reciprocal %66 {approx = true} : vector<16x1xf32> -> vector<16x1xf32>
    %68 = vector.broadcast %67 : vector<16x1xf32> to vector<16x16xf32>
    %69 = arith.mulf %64, %68 : vector<16x16xf32>
    %70 = arith.truncf %69 : vector<16x16xf32> to vector<16x16xbf16>
    %cst_35 = arith.constant dense<0.000000e+00> : vector<16x16xf32>
    %71 = tpu.matmul %70, %52, %cst_35 {dimension_numbers = #tpu.dot_dimension_numbers<[1], [1], [0], [0], [0, 0, 1, 0], [], []>} : vector<16x16xbf16>, vector<16x16xbf16>, vector<16x16xf32> -> vector<16x16xf32>
    %c0_36 = arith.constant 0 : index
    %c0_37 = arith.constant 0 : index
    %72 = vector.load %arg23[%c0_36, %c0_37] : memref<16x128xf32, #tpu.memory_space<vmem>>, vector<16x16xf32>
    tpu.vector_store %arg23[%c0_36, %c0_37], %71 {strides = array<i32>} : memref<16x128xf32, #tpu.memory_space<vmem>>, vector<16x16xf32>,
    %73 = vector.extract_strided_slice %35 {offsets = [0, 16], sizes = [16, 16], strides = [1, 1]} : vector<16x128xf32> to vector<16x16xf32>
    %74 = arith.truncf %73 : vector<16x16xf32> to vector<16x16xbf16>
    %75 = vector.extract_strided_slice %42 {offsets = [16, 0], sizes = [16, 16], strides = [1, 1]} : vector<256x16xf32> to vector<16x16xf32>
    %76 = arith.truncf %75 : vector<16x16xf32> to vector<16x16xbf16>
    %77 = vector.extract_strided_slice %42 {offsets = [144, 0], sizes = [16, 16], strides = [1, 1]} : vector<256x16xf32> to vector<16x16xf32>
    %78 = arith.truncf %77 : vector<16x16xf32> to vector<16x16xbf16>
    %cst_38 = arith.constant dense<0.000000e+00> : vector<16x16xf32>
    %79 = tpu.matmul %74, %76, %cst_38 {dimension_numbers = #tpu.dot_dimension_numbers<[1], [0], [0], [1], [0, 0, 1, 1], [], []>} : vector<16x16xbf16>, vector<16x16xbf16>, vector<16x16xf32> -> vector<16x16xf32>
    %cst_39 = arith.constant 2.500000e-01 : f32
    %80 = vector.broadcast %cst_39 : f32 to vector<16x16xf32>
    %81 = arith.mulf %79, %80 : vector<16x16xf32>
    %cst_40 = arith.constant -1.000000e+09 : f32
    %82 = vector.shape_cast %46 : vector<1x16xi1> to vector<1x16xi1>
    %83 = vector.broadcast %82 : vector<1x16xi1> to vector<16x16xi1>
    %84 = vector.broadcast %cst_40 : f32 to vector<16x16xf32>
    %85 = arith.select %83, %84, %81 : vector<16x16xi1>, vector<16x16xf32>
    %cst_41 = arith.constant dense<0xFF800000> : vector<16xf32>
    %86 = vector.multi_reduction <maximumf>, %85, %cst_41 [1] : vector<16x16xf32> to vector<16xf32>
    %87 = vector.shape_cast %86 : vector<16xf32> to vector<16x1xf32>
    %88 = vector.broadcast %87 : vector<16x1xf32> to vector<16x16xf32>
    %89 = arith.subf %85, %88 : vector<16x16xf32>
    %90 = math.exp %89 : vector<16x16xf32>
    %cst_42 = arith.constant dense<0.000000e+00> : vector<16xf32>
    %91 = vector.multi_reduction <add>, %90, %cst_42 [1] : vector<16x16xf32> to vector<16xf32>
    %92 = vector.shape_cast %91 : vector<16xf32> to vector<16x1xf32>
    %93 = tpu.reciprocal %92 {approx = true} : vector<16x1xf32> -> vector<16x1xf32>
    %94 = vector.broadcast %93 : vector<16x1xf32> to vector<16x16xf32>
    %95 = arith.mulf %90, %94 : vector<16x16xf32>
    %96 = arith.truncf %95 : vector<16x16xf32> to vector<16x16xbf16>
    %cst_43 = arith.constant dense<0.000000e+00> : vector<16x16xf32>
    %97 = tpu.matmul %96, %78, %cst_43 {dimension_numbers = #tpu.dot_dimension_numbers<[1], [1], [0], [0], [0, 0, 1, 0], [], []>} : vector<16x16xbf16>, vector<16x16xbf16>, vector<16x16xf32> -> vector<16x16xf32>
    %c0_44 = arith.constant 0 : index
    %c16 = arith.constant 16 : index
    %98 = vector.load %arg23[%c0_44, %c16] : memref<16x128xf32, #tpu.memory_space<vmem>>, vector<16x16xf32>
    tpu.vector_store %arg23[%c0_44, %c16], %97 {strides = array<i32>} : memref<16x128xf32, #tpu.memory_space<vmem>>, vector<16x16xf32>,
    %99 = vector.extract_strided_slice %35 {offsets = [0, 32], sizes = [16, 16], strides = [1, 1]} : vector<16x128xf32> to vector<16x16xf32>
    %100 = arith.truncf %99 : vector<16x16xf32> to vector<16x16xbf16>
    %101 = vector.extract_strided_slice %42 {offsets = [32, 0], sizes = [16, 16], strides = [1, 1]} : vector<256x16xf32> to vector<16x16xf32>
    %102 = arith.truncf %101 : vector<16x16xf32> to vector<16x16xbf16>
    %103 = vector.extract_strided_slice %42 {offsets = [160, 0], sizes = [16, 16], strides = [1, 1]} : vector<256x16xf32> to vector<16x16xf32>
    %104 = arith.truncf %103 : vector<16x16xf32> to vector<16x16xbf16>
    %cst_45 = arith.constant dense<0.000000e+00> : vector<16x16xf32>
    %105 = tpu.matmul %100, %102, %cst_45 {dimension_numbers = #tpu.dot_dimension_numbers<[1], [0], [0], [1], [0, 0, 1, 1], [], []>} : vector<16x16xbf16>, vector<16x16xbf16>, vector<16x16xf32> -> vector<16x16xf32>
    %cst_46 = arith.constant 2.500000e-01 : f32
    %106 = vector.broadcast %cst_46 : f32 to vector<16x16xf32>
    %107 = arith.mulf %105, %106 : vector<16x16xf32>
    %cst_47 = arith.constant -1.000000e+09 : f32
    %108 = vector.shape_cast %46 : vector<1x16xi1> to vector<1x16xi1>
    %109 = vector.broadcast %108 : vector<1x16xi1> to vector<16x16xi1>
    %110 = vector.broadcast %cst_47 : f32 to vector<16x16xf32>
    %111 = arith.select %109, %110, %107 : vector<16x16xi1>, vector<16x16xf32>
    %cst_48 = arith.constant dense<0xFF800000> : vector<16xf32>
    %112 = vector.multi_reduction <maximumf>, %111, %cst_48 [1] : vector<16x16xf32> to vector<16xf32>
    %113 = vector.shape_cast %112 : vector<16xf32> to vector<16x1xf32>
    %114 = vector.broadcast %113 : vector<16x1xf32> to vector<16x16xf32>
    %115 = arith.subf %111, %114 : vector<16x16xf32>
    %116 = math.exp %115 : vector<16x16xf32>
    %cst_49 = arith.constant dense<0.000000e+00> : vector<16xf32>
    %117 = vector.multi_reduction <add>, %116, %cst_49 [1] : vector<16x16xf32> to vector<16xf32>
    %118 = vector.shape_cast %117 : vector<16xf32> to vector<16x1xf32>
    %119 = tpu.reciprocal %118 {approx = true} : vector<16x1xf32> -> vector<16x1xf32>
    %120 = vector.broadcast %119 : vector<16x1xf32> to vector<16x16xf32>
    %121 = arith.mulf %116, %120 : vector<16x16xf32>
    %122 = arith.truncf %121 : vector<16x16xf32> to vector<16x16xbf16>
    %cst_50 = arith.constant dense<0.000000e+00> : vector<16x16xf32>
    %123 = tpu.matmul %122, %104, %cst_50 {dimension_numbers = #tpu.dot_dimension_numbers<[1], [1], [0], [0], [0, 0, 1, 0], [], []>} : vector<16x16xbf16>, vector<16x16xbf16>, vector<16x16xf32> -> vector<16x16xf32>
    %c0_51 = arith.constant 0 : index
    %c32 = arith.constant 32 : index
    %124 = vector.load %arg23[%c0_51, %c32] : memref<16x128xf32, #tpu.memory_space<vmem>>, vector<16x16xf32>
    tpu.vector_store %arg23[%c0_51, %c32], %123 {strides = array<i32>} : memref<16x128xf32, #tpu.memory_space<vmem>>, vector<16x16xf32>,
    %125 = vector.extract_strided_slice %35 {offsets = [0, 48], sizes = [16, 16], strides = [1, 1]} : vector<16x128xf32> to vector<16x16xf32>
    %126 = arith.truncf %125 : vector<16x16xf32> to vector<16x16xbf16>
    %127 = vector.extract_strided_slice %42 {offsets = [48, 0], sizes = [16, 16], strides = [1, 1]} : vector<256x16xf32> to vector<16x16xf32>
    %128 = arith.truncf %127 : vector<16x16xf32> to vector<16x16xbf16>
    %129 = vector.extract_strided_slice %42 {offsets = [176, 0], sizes = [16, 16], strides = [1, 1]} : vector<256x16xf32> to vector<16x16xf32>
    %130 = arith.truncf %129 : vector<16x16xf32> to vector<16x16xbf16>
    %cst_52 = arith.constant dense<0.000000e+00> : vector<16x16xf32>
    %131 = tpu.matmul %126, %128, %cst_52 {dimension_numbers = #tpu.dot_dimension_numbers<[1], [0], [0], [1], [0, 0, 1, 1], [], []>} : vector<16x16xbf16>, vector<16x16xbf16>, vector<16x16xf32> -> vector<16x16xf32>
    %cst_53 = arith.constant 2.500000e-01 : f32
    %132 = vector.broadcast %cst_53 : f32 to vector<16x16xf32>
    %133 = arith.mulf %131, %132 : vector<16x16xf32>
    %cst_54 = arith.constant -1.000000e+09 : f32
    %134 = vector.shape_cast %46 : vector<1x16xi1> to vector<1x16xi1>
    %135 = vector.broadcast %134 : vector<1x16xi1> to vector<16x16xi1>
    %136 = vector.broadcast %cst_54 : f32 to vector<16x16xf32>
    %137 = arith.select %135, %136, %133 : vector<16x16xi1>, vector<16x16xf32>
    %cst_55 = arith.constant dense<0xFF800000> : vector<16xf32>
    %138 = vector.multi_reduction <maximumf>, %137, %cst_55 [1] : vector<16x16xf32> to vector<16xf32>
    %139 = vector.shape_cast %138 : vector<16xf32> to vector<16x1xf32>
    %140 = vector.broadcast %139 : vector<16x1xf32> to vector<16x16xf32>
    %141 = arith.subf %137, %140 : vector<16x16xf32>
    %142 = math.exp %141 : vector<16x16xf32>
    %cst_56 = arith.constant dense<0.000000e+00> : vector<16xf32>
    %143 = vector.multi_reduction <add>, %142, %cst_56 [1] : vector<16x16xf32> to vector<16xf32>
    %144 = vector.shape_cast %143 : vector<16xf32> to vector<16x1xf32>
    %145 = tpu.reciprocal %144 {approx = true} : vector<16x1xf32> -> vector<16x1xf32>
    %146 = vector.broadcast %145 : vector<16x1xf32> to vector<16x16xf32>
    %147 = arith.mulf %142, %146 : vector<16x16xf32>
    %148 = arith.truncf %147 : vector<16x16xf32> to vector<16x16xbf16>
    %cst_57 = arith.constant dense<0.000000e+00> : vector<16x16xf32>
    %149 = tpu.matmul %148, %130, %cst_57 {dimension_numbers = #tpu.dot_dimension_numbers<[1], [1], [0], [0], [0, 0, 1, 0], [], []>} : vector<16x16xbf16>, vector<16x16xbf16>, vector<16x16xf32> -> vector<16x16xf32>
    %c0_58 = arith.constant 0 : index
    %c48 = arith.constant 48 : index
    %150 = vector.load %arg23[%c0_58, %c48] : memref<16x128xf32, #tpu.memory_space<vmem>>, vector<16x16xf32>
    tpu.vector_store %arg23[%c0_58, %c48], %149 {strides = array<i32>} : memref<16x128xf32, #tpu.memory_space<vmem>>, vector<16x16xf32>,
    %151 = vector.extract_strided_slice %35 {offsets = [0, 64], sizes = [16, 16], strides = [1, 1]} : vector<16x128xf32> to vector<16x16xf32>
    %152 = arith.truncf %151 : vector<16x16xf32> to vector<16x16xbf16>
    %153 = vector.extract_strided_slice %42 {offsets = [64, 0], sizes = [16, 16], strides = [1, 1]} : vector<256x16xf32> to vector<16x16xf32>
    %154 = arith.truncf %153 : vector<16x16xf32> to vector<16x16xbf16>
    %155 = vector.extract_strided_slice %42 {offsets = [192, 0], sizes = [16, 16], strides = [1, 1]} : vector<256x16xf32> to vector<16x16xf32>
    %156 = arith.truncf %155 : vector<16x16xf32> to vector<16x16xbf16>
    %cst_59 = arith.constant dense<0.000000e+00> : vector<16x16xf32>
    %157 = tpu.matmul %152, %154, %cst_59 {dimension_numbers = #tpu.dot_dimension_numbers<[1], [0], [0], [1], [0, 0, 1, 1], [], []>} : vector<16x16xbf16>, vector<16x16xbf16>, vector<16x16xf32> -> vector<16x16xf32>
    %cst_60 = arith.constant 2.500000e-01 : f32
    %158 = vector.broadcast %cst_60 : f32 to vector<16x16xf32>
    %159 = arith.mulf %157, %158 : vector<16x16xf32>
    %cst_61 = arith.constant -1.000000e+09 : f32
    %160 = vector.shape_cast %46 : vector<1x16xi1> to vector<1x16xi1>
    %161 = vector.broadcast %160 : vector<1x16xi1> to vector<16x16xi1>
    %162 = vector.broadcast %cst_61 : f32 to vector<16x16xf32>
    %163 = arith.select %161, %162, %159 : vector<16x16xi1>, vector<16x16xf32>
    %cst_62 = arith.constant dense<0xFF800000> : vector<16xf32>
    %164 = vector.multi_reduction <maximumf>, %163, %cst_62 [1] : vector<16x16xf32> to vector<16xf32>
    %165 = vector.shape_cast %164 : vector<16xf32> to vector<16x1xf32>
    %166 = vector.broadcast %165 : vector<16x1xf32> to vector<16x16xf32>
    %167 = arith.subf %163, %166 : vector<16x16xf32>
    %168 = math.exp %167 : vector<16x16xf32>
    %cst_63 = arith.constant dense<0.000000e+00> : vector<16xf32>
    %169 = vector.multi_reduction <add>, %168, %cst_63 [1] : vector<16x16xf32> to vector<16xf32>
    %170 = vector.shape_cast %169 : vector<16xf32> to vector<16x1xf32>
    %171 = tpu.reciprocal %170 {approx = true} : vector<16x1xf32> -> vector<16x1xf32>
    %172 = vector.broadcast %171 : vector<16x1xf32> to vector<16x16xf32>
    %173 = arith.mulf %168, %172 : vector<16x16xf32>
    %174 = arith.truncf %173 : vector<16x16xf32> to vector<16x16xbf16>
    %cst_64 = arith.constant dense<0.000000e+00> : vector<16x16xf32>
    %175 = tpu.matmul %174, %156, %cst_64 {dimension_numbers = #tpu.dot_dimension_numbers<[1], [1], [0], [0], [0, 0, 1, 0], [], []>} : vector<16x16xbf16>, vector<16x16xbf16>, vector<16x16xf32> -> vector<16x16xf32>
    %c0_65 = arith.constant 0 : index
    %c64 = arith.constant 64 : index
    %176 = vector.load %arg23[%c0_65, %c64] : memref<16x128xf32, #tpu.memory_space<vmem>>, vector<16x16xf32>
    tpu.vector_store %arg23[%c0_65, %c64], %175 {strides = array<i32>} : memref<16x128xf32, #tpu.memory_space<vmem>>, vector<16x16xf32>,
    %177 = vector.extract_strided_slice %35 {offsets = [0, 80], sizes = [16, 16], strides = [1, 1]} : vector<16x128xf32> to vector<16x16xf32>
    %178 = arith.truncf %177 : vector<16x16xf32> to vector<16x16xbf16>
    %179 = vector.extract_strided_slice %42 {offsets = [80, 0], sizes = [16, 16], strides = [1, 1]} : vector<256x16xf32> to vector<16x16xf32>
    %180 = arith.truncf %179 : vector<16x16xf32> to vector<16x16xbf16>
    %181 = vector.extract_strided_slice %42 {offsets = [208, 0], sizes = [16, 16], strides = [1, 1]} : vector<256x16xf32> to vector<16x16xf32>
    %182 = arith.truncf %181 : vector<16x16xf32> to vector<16x16xbf16>
    %cst_66 = arith.constant dense<0.000000e+00> : vector<16x16xf32>
    %183 = tpu.matmul %178, %180, %cst_66 {dimension_numbers = #tpu.dot_dimension_numbers<[1], [0], [0], [1], [0, 0, 1, 1], [], []>} : vector<16x16xbf16>, vector<16x16xbf16>, vector<16x16xf32> -> vector<16x16xf32>
    %cst_67 = arith.constant 2.500000e-01 : f32
    %184 = vector.broadcast %cst_67 : f32 to vector<16x16xf32>
    %185 = arith.mulf %183, %184 : vector<16x16xf32>
    %cst_68 = arith.constant -1.000000e+09 : f32
    %186 = vector.shape_cast %46 : vector<1x16xi1> to vector<1x16xi1>
    %187 = vector.broadcast %186 : vector<1x16xi1> to vector<16x16xi1>
    %188 = vector.broadcast %cst_68 : f32 to vector<16x16xf32>
    %189 = arith.select %187, %188, %185 : vector<16x16xi1>, vector<16x16xf32>
    %cst_69 = arith.constant dense<0xFF800000> : vector<16xf32>
    %190 = vector.multi_reduction <maximumf>, %189, %cst_69 [1] : vector<16x16xf32> to vector<16xf32>
    %191 = vector.shape_cast %190 : vector<16xf32> to vector<16x1xf32>
    %192 = vector.broadcast %191 : vector<16x1xf32> to vector<16x16xf32>
    %193 = arith.subf %189, %192 : vector<16x16xf32>
    %194 = math.exp %193 : vector<16x16xf32>
    %cst_70 = arith.constant dense<0.000000e+00> : vector<16xf32>
    %195 = vector.multi_reduction <add>, %194, %cst_70 [1] : vector<16x16xf32> to vector<16xf32>
    %196 = vector.shape_cast %195 : vector<16xf32> to vector<16x1xf32>
    %197 = tpu.reciprocal %196 {approx = true} : vector<16x1xf32> -> vector<16x1xf32>
    %198 = vector.broadcast %197 : vector<16x1xf32> to vector<16x16xf32>
    %199 = arith.mulf %194, %198 : vector<16x16xf32>
    %200 = arith.truncf %199 : vector<16x16xf32> to vector<16x16xbf16>
    %cst_71 = arith.constant dense<0.000000e+00> : vector<16x16xf32>
    %201 = tpu.matmul %200, %182, %cst_71 {dimension_numbers = #tpu.dot_dimension_numbers<[1], [1], [0], [0], [0, 0, 1, 0], [], []>} : vector<16x16xbf16>, vector<16x16xbf16>, vector<16x16xf32> -> vector<16x16xf32>
    %c0_72 = arith.constant 0 : index
    %c80 = arith.constant 80 : index
    %202 = vector.load %arg23[%c0_72, %c80] : memref<16x128xf32, #tpu.memory_space<vmem>>, vector<16x16xf32>
    tpu.vector_store %arg23[%c0_72, %c80], %201 {strides = array<i32>} : memref<16x128xf32, #tpu.memory_space<vmem>>, vector<16x16xf32>,
    %203 = vector.extract_strided_slice %35 {offsets = [0, 96], sizes = [16, 16], strides = [1, 1]} : vector<16x128xf32> to vector<16x16xf32>
    %204 = arith.truncf %203 : vector<16x16xf32> to vector<16x16xbf16>
    %205 = vector.extract_strided_slice %42 {offsets = [96, 0], sizes = [16, 16], strides = [1, 1]} : vector<256x16xf32> to vector<16x16xf32>
    %206 = arith.truncf %205 : vector<16x16xf32> to vector<16x16xbf16>
    %207 = vector.extract_strided_slice %42 {offsets = [224, 0], sizes = [16, 16], strides = [1, 1]} : vector<256x16xf32> to vector<16x16xf32>
    %208 = arith.truncf %207 : vector<16x16xf32> to vector<16x16xbf16>
    %cst_73 = arith.constant dense<0.000000e+00> : vector<16x16xf32>
    %209 = tpu.matmul %204, %206, %cst_73 {dimension_numbers = #tpu.dot_dimension_numbers<[1], [0], [0], [1], [0, 0, 1, 1], [], []>} : vector<16x16xbf16>, vector<16x16xbf16>, vector<16x16xf32> -> vector<16x16xf32>
    %cst_74 = arith.constant 2.500000e-01 : f32
    %210 = vector.broadcast %cst_74 : f32 to vector<16x16xf32>
    %211 = arith.mulf %209, %210 : vector<16x16xf32>
    %cst_75 = arith.constant -1.000000e+09 : f32
    %212 = vector.shape_cast %46 : vector<1x16xi1> to vector<1x16xi1>
    %213 = vector.broadcast %212 : vector<1x16xi1> to vector<16x16xi1>
    %214 = vector.broadcast %cst_75 : f32 to vector<16x16xf32>
    %215 = arith.select %213, %214, %211 : vector<16x16xi1>, vector<16x16xf32>
    %cst_76 = arith.constant dense<0xFF800000> : vector<16xf32>
    %216 = vector.multi_reduction <maximumf>, %215, %cst_76 [1] : vector<16x16xf32> to vector<16xf32>
    %217 = vector.shape_cast %216 : vector<16xf32> to vector<16x1xf32>
    %218 = vector.broadcast %217 : vector<16x1xf32> to vector<16x16xf32>
    %219 = arith.subf %215, %218 : vector<16x16xf32>
    %220 = math.exp %219 : vector<16x16xf32>
    %cst_77 = arith.constant dense<0.000000e+00> : vector<16xf32>
    %221 = vector.multi_reduction <add>, %220, %cst_77 [1] : vector<16x16xf32> to vector<16xf32>
    %222 = vector.shape_cast %221 : vector<16xf32> to vector<16x1xf32>
    %223 = tpu.reciprocal %222 {approx = true} : vector<16x1xf32> -> vector<16x1xf32>
    %224 = vector.broadcast %223 : vector<16x1xf32> to vector<16x16xf32>
    %225 = arith.mulf %220, %224 : vector<16x16xf32>
    %226 = arith.truncf %225 : vector<16x16xf32> to vector<16x16xbf16>
    %cst_78 = arith.constant dense<0.000000e+00> : vector<16x16xf32>
    %227 = tpu.matmul %226, %208, %cst_78 {dimension_numbers = #tpu.dot_dimension_numbers<[1], [1], [0], [0], [0, 0, 1, 0], [], []>} : vector<16x16xbf16>, vector<16x16xbf16>, vector<16x16xf32> -> vector<16x16xf32>
    %c0_79 = arith.constant 0 : index
    %c96 = arith.constant 96 : index
    %228 = vector.load %arg23[%c0_79, %c96] : memref<16x128xf32, #tpu.memory_space<vmem>>, vector<16x16xf32>
    tpu.vector_store %arg23[%c0_79, %c96], %227 {strides = array<i32>} : memref<16x128xf32, #tpu.memory_space<vmem>>, vector<16x16xf32>,
    %229 = vector.extract_strided_slice %35 {offsets = [0, 112], sizes = [16, 16], strides = [1, 1]} : vector<16x128xf32> to vector<16x16xf32>
    %230 = arith.truncf %229 : vector<16x16xf32> to vector<16x16xbf16>
    %231 = vector.extract_strided_slice %42 {offsets = [112, 0], sizes = [16, 16], strides = [1, 1]} : vector<256x16xf32> to vector<16x16xf32>
    %232 = arith.truncf %231 : vector<16x16xf32> to vector<16x16xbf16>
    %233 = vector.extract_strided_slice %42 {offsets = [240, 0], sizes = [16, 16], strides = [1, 1]} : vector<256x16xf32> to vector<16x16xf32>
    %234 = arith.truncf %233 : vector<16x16xf32> to vector<16x16xbf16>
    %cst_80 = arith.constant dense<0.000000e+00> : vector<16x16xf32>
    %235 = tpu.matmul %230, %232, %cst_80 {dimension_numbers = #tpu.dot_dimension_numbers<[1], [0], [0], [1], [0, 0, 1, 1], [], []>} : vector<16x16xbf16>, vector<16x16xbf16>, vector<16x16xf32> -> vector<16x16xf32>
    %cst_81 = arith.constant 2.500000e-01 : f32
    %236 = vector.broadcast %cst_81 : f32 to vector<16x16xf32>
    %237 = arith.mulf %235, %236 : vector<16x16xf32>
    %cst_82 = arith.constant -1.000000e+09 : f32
    %238 = vector.shape_cast %46 : vector<1x16xi1> to vector<1x16xi1>
    %239 = vector.broadcast %238 : vector<1x16xi1> to vector<16x16xi1>
    %240 = vector.broadcast %cst_82 : f32 to vector<16x16xf32>
    %241 = arith.select %239, %240, %237 : vector<16x16xi1>, vector<16x16xf32>
    %cst_83 = arith.constant dense<0xFF800000> : vector<16xf32>
    %242 = vector.multi_reduction <maximumf>, %241, %cst_83 [1] : vector<16x16xf32> to vector<16xf32>
    %243 = vector.shape_cast %242 : vector<16xf32> to vector<16x1xf32>
    %244 = vector.broadcast %243 : vector<16x1xf32> to vector<16x16xf32>
    %245 = arith.subf %241, %244 : vector<16x16xf32>
    %246 = math.exp %245 : vector<16x16xf32>
    %cst_84 = arith.constant dense<0.000000e+00> : vector<16xf32>
    %247 = vector.multi_reduction <add>, %246, %cst_84 [1] : vector<16x16xf32> to vector<16xf32>
    %248 = vector.shape_cast %247 : vector<16xf32> to vector<16x1xf32>
    %249 = tpu.reciprocal %248 {approx = true} : vector<16x1xf32> -> vector<16x1xf32>
    %250 = vector.broadcast %249 : vector<16x1xf32> to vector<16x16xf32>
    %251 = arith.mulf %246, %250 : vector<16x16xf32>
    %252 = arith.truncf %251 : vector<16x16xf32> to vector<16x16xbf16>
    %cst_85 = arith.constant dense<0.000000e+00> : vector<16x16xf32>
    %253 = tpu.matmul %252, %234, %cst_85 {dimension_numbers = #tpu.dot_dimension_numbers<[1], [1], [0], [0], [0, 0, 1, 0], [], []>} : vector<16x16xbf16>, vector<16x16xbf16>, vector<16x16xf32> -> vector<16x16xf32>
    %c0_86 = arith.constant 0 : index
    %c112 = arith.constant 112 : index
    %254 = vector.load %arg23[%c0_86, %c112] : memref<16x128xf32, #tpu.memory_space<vmem>>, vector<16x16xf32>
    tpu.vector_store %arg23[%c0_86, %c112], %253 {strides = array<i32>} : memref<16x128xf32, #tpu.memory_space<vmem>>, vector<16x16xf32>,
    %c0_87 = arith.constant 0 : index
    %c0_88 = arith.constant 0 : index
    %255 = vector.load %arg23[%c0_87, %c0_88] : memref<16x128xf32, #tpu.memory_space<vmem>>, vector<16x128xf32>
    %256 = arith.truncf %255 : vector<16x128xf32> to vector<16x128xbf16>
    %c0_89 = arith.constant 0 : index
    %c0_90 = arith.constant 0 : index
    %c0_91 = arith.constant 0 : index
    %257 = vector.load %arg11[%c0_89, %c0_90, %c0_91] : memref<1x128x128xbf16, #tpu.memory_space<vmem>>, vector<1x128x128xbf16>
    %258 = vector.shape_cast %257 : vector<1x128x128xbf16> to vector<128x128xbf16>
    %cst_92 = arith.constant dense<0.000000e+00> : vector<16x128xf32>
    %259 = tpu.matmul %256, %258, %cst_92 {dimension_numbers = #tpu.dot_dimension_numbers<[1], [0], [0], [1], [0, 0, 1, 1], [], []>} : vector<16x128xbf16>, vector<128x128xbf16>, vector<16x128xf32> -> vector<16x128xf32>
    %c0_93 = arith.constant 0 : index
    %c0_94 = arith.constant 0 : index
    %c0_95 = arith.constant 0 : index
    %260 = vector.load %arg12[%c0_93, %c0_94, %c0_95] : memref<1x1x128xf32, #tpu.memory_space<vmem>>, vector<1x1x128xf32>
    %261 = vector.shape_cast %260 : vector<1x1x128xf32> to vector<1x128xf32>
    %262 = vector.broadcast %261 : vector<1x128xf32> to vector<16x128xf32>
    %263 = arith.addf %259, %262 : vector<16x128xf32>
    %264 = arith.addf %3, %263 : vector<16x128xf32>
    %c0_96 = arith.constant 0 : index
    %c0_97 = arith.constant 0 : index
    %c0_98 = arith.constant 0 : index
    %265 = vector.load %arg13[%c0_96, %c0_97, %c0_98] : memref<1x1x128xf32, #tpu.memory_space<vmem>>, vector<1x1x128xf32>
    %266 = vector.shape_cast %265 : vector<1x1x128xf32> to vector<1x128xf32>
    %c0_99 = arith.constant 0 : index
    %c0_100 = arith.constant 0 : index
    %c0_101 = arith.constant 0 : index
    %267 = vector.load %arg14[%c0_99, %c0_100, %c0_101] : memref<1x1x128xf32, #tpu.memory_space<vmem>>, vector<1x1x128xf32>
    %268 = vector.shape_cast %267 : vector<1x1x128xf32> to vector<1x128xf32>
    %cst_102 = arith.constant dense<0.000000e+00> : vector<16xf32>
    %269 = vector.multi_reduction <add>, %264, %cst_102 [1] : vector<16x128xf32> to vector<16xf32>
    %270 = vector.shape_cast %269 : vector<16xf32> to vector<16x1xf32>
    %cst_103 = arith.constant 1.280000e+02 : f32
    %271 = vector.broadcast %cst_103 : f32 to vector<16x1xf32>
    %272 = arith.divf %270, %271 : vector<16x1xf32>
    %273 = vector.broadcast %272 : vector<16x1xf32> to vector<16x128xf32>
    %274 = arith.subf %264, %273 : vector<16x128xf32>
    %275 = arith.mulf %274, %274 : vector<16x128xf32>
    %cst_104 = arith.constant dense<0.000000e+00> : vector<16xf32>
    %276 = vector.multi_reduction <add>, %275, %cst_104 [1] : vector<16x128xf32> to vector<16xf32>
    %277 = vector.shape_cast %276 : vector<16xf32> to vector<16x1xf32>
    %cst_105 = arith.constant 0.00787401571 : f32
    %278 = vector.broadcast %cst_105 : f32 to vector<16x1xf32>
    %279 = arith.mulf %277, %278 : vector<16x1xf32>
    %280 = math.sqrt %279 : vector<16x1xf32>
    %cst_106 = arith.constant 9.99999997E-7 : f32
    %281 = vector.broadcast %cst_106 : f32 to vector<16x1xf32>
    %282 = arith.addf %280, %281 : vector<16x1xf32>
    %283 = vector.broadcast %282 : vector<16x1xf32> to vector<16x128xf32>
    %284 = arith.divf %274, %283 : vector<16x128xf32>
    %285 = vector.broadcast %266 : vector<1x128xf32> to vector<16x128xf32>
    %286 = arith.mulf %285, %284 : vector<16x128xf32>
    %287 = vector.broadcast %268 : vector<1x128xf32> to vector<16x128xf32>
    %288 = arith.addf %286, %287 : vector<16x128xf32>
    %289 = arith.truncf %288 : vector<16x128xf32> to vector<16x128xbf16>
    %c0_107 = arith.constant 0 : index
    %c0_108 = arith.constant 0 : index
    %c0_109 = arith.constant 0 : index
    %290 = vector.load %arg15[%c0_107, %c0_108, %c0_109] : memref<1x128x256xbf16, #tpu.memory_space<vmem>>, vector<1x128x256xbf16>
    %291 = vector.shape_cast %290 : vector<1x128x256xbf16> to vector<128x256xbf16>
    %cst_110 = arith.constant dense<0.000000e+00> : vector<16x256xf32>
    %292 = tpu.matmul %289, %291, %cst_110 {dimension_numbers = #tpu.dot_dimension_numbers<[1], [0], [0], [1], [0, 0, 1, 1], [], []>} : vector<16x128xbf16>, vector<128x256xbf16>, vector<16x256xf32> -> vector<16x256xf32>
    %c0_111 = arith.constant 0 : index
    %c0_112 = arith.constant 0 : index
    %c0_113 = arith.constant 0 : index
    %293 = vector.load %arg16[%c0_111, %c0_112, %c0_113] : memref<1x1x256xf32, #tpu.memory_space<vmem>>, vector<1x1x256xf32>
    %294 = vector.shape_cast %293 : vector<1x1x256xf32> to vector<1x256xf32>
    %295 = vector.broadcast %294 : vector<1x256xf32> to vector<16x256xf32>
    %296 = arith.addf %292, %295 : vector<16x256xf32>
    %cst_114 = arith.constant 0.000000e+00 : f32
    %297 = vector.broadcast %cst_114 : f32 to vector<16x256xf32>
    %298 = arith.maximumf %296, %297 : vector<16x256xf32>
    %299 = arith.truncf %298 : vector<16x256xf32> to vector<16x256xbf16>
    %c0_115 = arith.constant 0 : index
    %c0_116 = arith.constant 0 : index
    %c0_117 = arith.constant 0 : index
    %300 = vector.load %arg17[%c0_115, %c0_116, %c0_117] : memref<1x256x128xbf16, #tpu.memory_space<vmem>>, vector<1x256x128xbf16>
    %301 = vector.shape_cast %300 : vector<1x256x128xbf16> to vector<256x128xbf16>
    %cst_118 = arith.constant dense<0.000000e+00> : vector<16x128xf32>
    %302 = tpu.matmul %299, %301, %cst_118 {dimension_numbers = #tpu.dot_dimension_numbers<[1], [0], [0], [1], [0, 0, 1, 1], [], []>} : vector<16x256xbf16>, vector<256x128xbf16>, vector<16x128xf32> -> vector<16x128xf32>
    %c0_119 = arith.constant 0 : index
    %c0_120 = arith.constant 0 : index
    %c0_121 = arith.constant 0 : index
    %303 = vector.load %arg18[%c0_119, %c0_120, %c0_121] : memref<1x1x128xf32, #tpu.memory_space<vmem>>, vector<1x1x128xf32>
    %304 = vector.shape_cast %303 : vector<1x1x128xf32> to vector<1x128xf32>
    %305 = vector.broadcast %304 : vector<1x128xf32> to vector<16x128xf32>
    %306 = arith.addf %302, %305 : vector<16x128xf32>
    %307 = arith.addf %264, %306 : vector<16x128xf32>
    %c0_122 = arith.constant 0 : index
    %c0_123 = arith.constant 0 : index
    %308 = vector.load %arg22[%c0_122, %c0_123] : memref<16x128xf32, #tpu.memory_space<vmem>>, vector<16x128xf32>
    tpu.vector_store %arg22[%c0_122, %c0_123], %307 {strides = array<i32>} : memref<16x128xf32, #tpu.memory_space<vmem>>, vector<16x128xf32>,
    %c1_i32 = arith.constant 1 : i32
    %309 = arith.cmpi eq, %arg1, %c1_i32 : i32
    %310 = arith.extui %309 : i1 to i32
    %c0_i32_124 = arith.constant 0 : i32
    %311 = arith.cmpi ne, %310, %c0_i32_124 : i32
    scf.if %311 {
      %c0_125 = arith.constant 0 : index
      %c0_126 = arith.constant 0 : index
      %312 = vector.load %arg19[%c0_125, %c0_126] : memref<1x128xf32, #tpu.memory_space<vmem>>, vector<1x128xf32>
      %c0_127 = arith.constant 0 : index
      %c0_128 = arith.constant 0 : index
      %313 = vector.load %arg20[%c0_127, %c0_128] : memref<1x128xf32, #tpu.memory_space<vmem>>, vector<1x128xf32>
      %cst_129 = arith.constant dense<0.000000e+00> : vector<16xf32>
      %314 = vector.multi_reduction <add>, %307, %cst_129 [1] : vector<16x128xf32> to vector<16xf32>
      %315 = vector.shape_cast %314 : vector<16xf32> to vector<16x1xf32>
      %cst_130 = arith.constant 1.280000e+02 : f32
      %316 = vector.broadcast %cst_130 : f32 to vector<16x1xf32>
      %317 = arith.divf %315, %316 : vector<16x1xf32>
      %318 = vector.broadcast %317 : vector<16x1xf32> to vector<16x128xf32>
      %319 = arith.subf %307, %318 : vector<16x128xf32>
      %320 = arith.mulf %319, %319 : vector<16x128xf32>
      %cst_131 = arith.constant dense<0.000000e+00> : vector<16xf32>
      %321 = vector.multi_reduction <add>, %320, %cst_131 [1] : vector<16x128xf32> to vector<16xf32>
      %322 = vector.shape_cast %321 : vector<16xf32> to vector<16x1xf32>
      %cst_132 = arith.constant 0.00787401571 : f32
      %323 = vector.broadcast %cst_132 : f32 to vector<16x1xf32>
      %324 = arith.mulf %322, %323 : vector<16x1xf32>
      %325 = math.sqrt %324 : vector<16x1xf32>
      %cst_133 = arith.constant 9.99999997E-7 : f32
      %326 = vector.broadcast %cst_133 : f32 to vector<16x1xf32>
      %327 = arith.addf %325, %326 : vector<16x1xf32>
      %328 = vector.broadcast %327 : vector<16x1xf32> to vector<16x128xf32>
      %329 = arith.divf %319, %328 : vector<16x128xf32>
      %330 = vector.broadcast %312 : vector<1x128xf32> to vector<16x128xf32>
      %331 = arith.mulf %330, %329 : vector<16x128xf32>
      %332 = vector.broadcast %313 : vector<1x128xf32> to vector<16x128xf32>
      %333 = arith.addf %331, %332 : vector<16x128xf32>
      %c0_134 = arith.constant 0 : index
      %c0_135 = arith.constant 0 : index
      %c0_136 = arith.constant 0 : index
      %334 = vector.load %arg21[%c0_134, %c0_135, %c0_136] : memref<1x16x128xf32, #tpu.memory_space<vmem>>, vector<1x16x128xf32>
      %335 = vector.shape_cast %334 : vector<1x16x128xf32> to vector<16x128xf32>
      %336 = vector.shape_cast %333 : vector<16x128xf32> to vector<1x16x128xf32>
      tpu.vector_store %arg21[%c0_134, %c0_135, %c0_136], %336 {strides = array<i32>} : memref<1x16x128xf32, #tpu.memory_space<vmem>>, vector<1x16x128xf32>,
    } else {
    }
    return
  }
  func.func @transform_0(%arg0: i32, %arg1: i32) -> (i32, i32) {
    %c0_i32 = arith.constant 0 : i32
    %c0_i32_0 = arith.constant 0 : i32
    %c0_i32_1 = arith.constant 0 : i32
    return %c0_i32, %c0_i32_0 : i32, i32
  }
  func.func @transform_1(%arg0: i32, %arg1: i32) -> (i32, i32, i32) {
    %c0_i32 = arith.constant 0 : i32
    %c0_i32_0 = arith.constant 0 : i32
    %c0_i32_1 = arith.constant 0 : i32
    return %arg0, %c0_i32, %c0_i32_0 : i32, i32, i32
  }
  func.func @transform_2(%arg0: i32, %arg1: i32) -> (i32, i32, i32) {
    %c0_i32 = arith.constant 0 : i32
    %c0_i32_0 = arith.constant 0 : i32
    %c0_i32_1 = arith.constant 0 : i32
    return %arg0, %c0_i32, %c0_i32_0 : i32, i32, i32
  }
  func.func @transform_3(%arg0: i32, %arg1: i32) -> (i32, i32, i32) {
    %c0_i32 = arith.constant 0 : i32
    %c0_i32_0 = arith.constant 0 : i32
    %c0_i32_1 = arith.constant 0 : i32
    return %arg1, %c0_i32, %c0_i32_0 : i32, i32, i32
  }
  func.func @transform_4(%arg0: i32, %arg1: i32) -> (i32, i32, i32) {
    %c0_i32 = arith.constant 0 : i32
    %c0_i32_0 = arith.constant 0 : i32
    %c0_i32_1 = arith.constant 0 : i32
    return %arg1, %c0_i32, %c0_i32_0 : i32, i32, i32
  }
  func.func @transform_5(%arg0: i32, %arg1: i32) -> (i32, i32, i32) {
    %c0_i32 = arith.constant 0 : i32
    %c0_i32_0 = arith.constant 0 : i32
    %c0_i32_1 = arith.constant 0 : i32
    return %arg1, %c0_i32, %c0_i32_0 : i32, i32, i32
  }
  func.func @transform_6(%arg0: i32, %arg1: i32) -> (i32, i32, i32) {
    %c0_i32 = arith.constant 0 : i32
    %c0_i32_0 = arith.constant 0 : i32
    %c0_i32_1 = arith.constant 0 : i32
    return %arg1, %c0_i32, %c0_i32_0 : i32, i32, i32
  }
  func.func @transform_7(%arg0: i32, %arg1: i32) -> (i32, i32, i32) {
    %c0_i32 = arith.constant 0 : i32
    %c0_i32_0 = arith.constant 0 : i32
    %c0_i32_1 = arith.constant 0 : i32
    return %arg1, %c0_i32, %c0_i32_0 : i32, i32, i32
  }
  func.func @transform_8(%arg0: i32, %arg1: i32) -> (i32, i32, i32) {
    %c0_i32 = arith.constant 0 : i32
    %c0_i32_0 = arith.constant 0 : i32
    %c0_i32_1 = arith.constant 0 : i32
    return %arg1, %c0_i32, %c0_i32_0 : i32, i32, i32
  }
  func.func @transform_9(%arg0: i32, %arg1: i32) -> (i32, i32, i32) {
    %c0_i32 = arith.constant 0 : i32
    %c0_i32_0 = arith.constant 0 : i32
    %c0_i32_1 = arith.constant 0 : i32
    return %arg1, %c0_i32, %c0_i32_0 : i32, i32, i32
  }
  func.func @transform_10(%arg0: i32, %arg1: i32) -> (i32, i32, i32) {
    %c0_i32 = arith.constant 0 : i32
    %c0_i32_0 = arith.constant 0 : i32
    %c0_i32_1 = arith.constant 0 : i32
    return %arg1, %c0_i32, %c0_i32_0 : i32, i32, i32
  }
  func.func @transform_11(%arg0: i32, %arg1: i32) -> (i32, i32, i32) {
    %c0_i32 = arith.constant 0 : i32
    %c0_i32_0 = arith.constant 0 : i32
    %c0_i32_1 = arith.constant 0 : i32
    return %arg1, %c0_i32, %c0_i32_0 : i32, i32, i32
  }
  func.func @transform_12(%arg0: i32, %arg1: i32) -> (i32, i32, i32) {
    %c0_i32 = arith.constant 0 : i32
    %c0_i32_0 = arith.constant 0 : i32
    %c0_i32_1 = arith.constant 0 : i32
    return %arg1, %c0_i32, %c0_i32_0 : i32, i32, i32
  }
  func.func @transform_13(%arg0: i32, %arg1: i32) -> (i32, i32, i32) {
    %c0_i32 = arith.constant 0 : i32
    %c0_i32_0 = arith.constant 0 : i32
    %c0_i32_1 = arith.constant 0 : i32
    return %arg1, %c0_i32, %c0_i32_0 : i32, i32, i32
  }
  func.func @transform_14(%arg0: i32, %arg1: i32) -> (i32, i32, i32) {
    %c0_i32 = arith.constant 0 : i32
    %c0_i32_0 = arith.constant 0 : i32
    %c0_i32_1 = arith.constant 0 : i32
    return %arg1, %c0_i32, %c0_i32_0 : i32, i32, i32
  }
  func.func @transform_15(%arg0: i32, %arg1: i32) -> (i32, i32, i32) {
    %c0_i32 = arith.constant 0 : i32
    %c0_i32_0 = arith.constant 0 : i32
    %c0_i32_1 = arith.constant 0 : i32
    return %arg1, %c0_i32, %c0_i32_0 : i32, i32, i32
  }
  func.func @transform_16(%arg0: i32, %arg1: i32) -> (i32, i32, i32) {
    %c0_i32 = arith.constant 0 : i32
    %c0_i32_0 = arith.constant 0 : i32
    %c0_i32_1 = arith.constant 0 : i32
    return %arg1, %c0_i32, %c0_i32_0 : i32, i32, i32
  }
  func.func @transform_17(%arg0: i32, %arg1: i32) -> (i32, i32) {
    %c0_i32 = arith.constant 0 : i32
    %c0_i32_0 = arith.constant 0 : i32
    %c0_i32_1 = arith.constant 0 : i32
    return %c0_i32, %c0_i32_0 : i32, i32
  }
  func.func @transform_18(%arg0: i32, %arg1: i32) -> (i32, i32) {
    %c0_i32 = arith.constant 0 : i32
    %c0_i32_0 = arith.constant 0 : i32
    %c0_i32_1 = arith.constant 0 : i32
    return %c0_i32, %c0_i32_0 : i32, i32
  }
  func.func @transform_19(%arg0: i32, %arg1: i32) -> (i32, i32, i32) {
    %c0_i32 = arith.constant 0 : i32
    %c0_i32_0 = arith.constant 0 : i32
    %c0_i32_1 = arith.constant 0 : i32
    return %arg0, %c0_i32, %c0_i32_0 : i32, i32, i32
  }
}

</mosaic_0001>

<bundles_post_ra>
// kernel: tpu_custom_call.1
= control target key start
LH: loop header
LB: loop body
LE: loop exit
PB: predicated region body
PF: predicated region fallthrough
CT: control target
= control target key end

     0   :  { %s5262_s0 = inlined_call_operand.hbm [shape: f32[16,128], index: 0, kind: input, shape index: {}]   ;;  %s5263_s1 = inlined_call_operand.hbm [shape: f32[2,16,128], index: 1, kind: input, shape index: {}]   ;;  %s5264_s2 = inlined_call_operand.hbm [shape: s32[2,1,16], index: 2, kind: input, shape index: {}]   ;;  %s5265_s3 = inlined_call_operand.hbm [shape: f32[2,1,128], index: 3, kind: input, shape index: {}]   ;;  %s5266_s4 = inlined_call_operand.hbm [shape: f32[2,1,128], index: 4, kind: input, shape index: {}]   ;;  %s5267_s5 = inlined_call_operand.hbm [shape: bf16[2,128,128], index: 5, kind: input, shape index: {}]   ;;  %s5268_s6 = inlined_call_operand.vmem [shape: f32[2,1,128], index: 6, kind: input, shape index: {}]   ;;  %s5269_s7 = inlined_call_operand.vmem [shape: bf16[2,256,128], index: 7, kind: input, shape index: {}]   ;;  %s5270_s8 = inlined_call_operand.vmem [shape: f32[2,256,1], index: 8, kind: input, shape index: {}]   ;;  %s5271_s9 = inlined_call_operand.hbm [shape: bf16[2,128,128], index: 9, kind: input, shape index: {}]   ;;  %s5272_s10 = inlined_call_operand.hbm [shape: f32[2,1,128], index: 10, kind: input, shape index: {}]   ;;  %s5273_s11 = inlined_call_operand.hbm [shape: f32[2,1,128], index: 11, kind: input, shape index: {}]   ;;  %s5274_s12 = inlined_call_operand.vmem [shape: f32[2,1,128], index: 12, kind: input, shape index: {}]   ;;  %s5275_s13 = inlined_call_operand.vmem [shape: bf16[2,128,256], index: 13, kind: input, shape index: {}]   ;;  %s5276_s14 = inlined_call_operand.vmem [shape: f32[2,1,256], index: 14, kind: input, shape index: {}]   ;;  %s5277_s15 = inlined_call_operand.hbm [shape: bf16[2,256,128], index: 15, kind: input, shape index: {}]   ;;  %s5278_s16 = inlined_call_operand.vmem [shape: f32[2,1,128], index: 16, kind: input, shape index: {}]   ;;  %s5279_s17 = inlined_call_operand.vmem [shape: f32[1,128], index: 17, kind: input, shape index: {}]   ;;  %s5280_s18 = inlined_call_operand.vmem [shape: f32[1,128], index: 18, kind: input, shape index: {}]   ;;  %s5281_s19 = inlined_call_operand.hbm [shape: f32[2,16,128], index: 19, kind: output, shape index: {}]  }
   0x1   :  { %5309 = sst [smem:[#allocation44_spill]] %s5262_s0 }
   0x2   :  { %5310 = sst [smem:[#allocation45_spill]] %s5263_s1 }
   0x3   :  { %5311 = sst [smem:[#allocation46_spill]] %s5264_s2 }
   0x4   :  { %5312 = sst [smem:[#allocation47_spill]] %s5265_s3 }
   0x5   :  { %5313 = sst [smem:[#allocation48_spill]] %s5266_s4 }
   0x6   :  { %5314 = sst [smem:[#allocation49_spill]] %s5267_s5 }
   0x7   :  { %5315 = sst [smem:[#allocation50_spill]] %s5268_s6 }
   0x8   :  { %5316 = sst [smem:[#allocation51_spill]] %s5269_s7 }
   0x9   :  { %5317 = sst [smem:[#allocation52_spill]] %s5270_s8 }
   0xa   :  { %5318 = sst [smem:[#allocation53_spill]] %s5271_s9 }
   0xb   :  { %5319 = sst [smem:[#allocation54_spill]] %s5272_s10 }
   0xc   :  { %5320 = sst [smem:[#allocation55_spill]] %s5273_s11 }
   0xd   :  { %5321 = sst [smem:[#allocation56_spill]] %s5274_s12 }
   0xe   :  { %5322 = sst [smem:[#allocation57_spill]] %s5275_s13 }
   0xf   :  { %5323 = sst [smem:[#allocation58_spill]] %s5276_s14 }
  0x10   :  { %5324 = sst [smem:[#allocation59_spill]] %s5277_s15 }
  0x11   :  { %5325 = sst [smem:[#allocation60_spill]] %s5278_s16 }
  0x12   :  { %5326 = sst [smem:[#allocation61_spill]] %s5279_s17 }
  0x13   :  { %5327 = sst [smem:[#allocation62_spill]] %s5280_s18 }
  0x14   :  { %5328 = sst [smem:[#allocation63_spill]] %s5281_s19 }
  0x15   :  { %24 = vsyncpa [#allocation5], 0 }
  0x16   :  { %25 = vsyncpa [#allocation8], 0 }
  0x17   :  { %27 = vsyncpa [#allocation8 + $0x1], 0 }
  0x18   :  { %28 = vsyncpa [#allocation11], 0 }
  0x19   :  { %30 = vsyncpa [#allocation11 + $0x1], 0 }
  0x1a   :  { %31 = vsyncpa [#allocation14], 0 }
  0x1b   :  { %33 = vsyncpa [#allocation14 + $0x1], 0 }
  0x1c   :  { %34 = vsyncpa [#allocation17], 0 }
  0x1d   :  { %36 = vsyncpa [#allocation17 + $0x1], 0 }
  0x1e   :  { %37 = vsyncpa [#allocation20], 0 }
  0x1f   :  { %39 = vsyncpa [#allocation20 + $0x1], 0 }
  0x20   :  { %40 = vsyncpa [#allocation6], 0 }
  0x21   :  { %42 = vsyncpa [#allocation6 + $0x1], 0  ;;  %s4406_s0 = smov 0   ;;  %s4408_s30 = smov 0  }
  0x22   :  { %s4410_s20 = smov 0   ;;  %s4412_s21 = smov 0  }
  0x23   :  { %s4414_s1 = smov 0   ;;  %s4416_s22 = smov 0  }
  0x24   :  { %s4418_s2 = smov 0   ;;  %s4420_s23 = smov 0  }
  0x25   :  { %s4422_s24 = smov 0   ;;  %s4424_s25 = smov 0  }
  0x26   :  { %s4426_s3 = smov 0  }
  0x27 LB: > { %5329 = sst [smem:[#allocation29_spill]] %s4256_s20  ;;  %s3191_s26 = sadd.s32 4294967294, %s4288_s3   ;;  %s4288_s3 = sphi %s4426_s3, %s48_s3   ;;  %s4284_s25 = sphi %s4424_s25, %s5408_s25   ;;  %s4280_s24 = sphi %s4422_s24, %s5407_s24   ;;  %s4276_s23 = sphi %s4420_s23, %s5406_s23   ;;  %s4272_s2 = sphi %s4418_s2, %s5405_s2   ;;  %s4268_s22 = sphi %s4416_s22, %s5404_s22   ;;  %s4264_s1 = sphi %s4414_s1, %s5403_s1   ;;  %s4260_s21 = sphi %s4412_s21, %s5402_s21   ;;  %s4256_s20 = sphi %s4410_s20, %s5401_s20   ;;  %s4252_s30 = sphi %s4408_s30, %s5410_s30   ;;  %s4248_s0 = sphi %s4406_s0, %s5409_s0  }
  0x28   : > { %5330 = sst [smem:[#allocation30_spill]] %s4260_s21  ;;  %s57_s27 = sadd.s32 1, %s4280_s24 }
  0x29   : > { %5331 = sst [smem:[#allocation31_spill]] %s4264_s1  ;;  %p58_p0 = scmp.ge.s32.totalorder %s57_s27, 2 }
  0x2a   : > { %5332 = sst [smem:[#allocation32_spill]] %s4268_s22  ;;  %s60_s28 = sadd.s32 1, %s4284_s25 }
  0x2b   : > { %5333 = sst [smem:[#allocation33_spill]] %s4272_s2  ;;  %s88_s29 = sadd.s32 1, %s4268_s22 }
  0x2c   : > { %5334 = sst [smem:[#allocation34_spill]] %s4276_s23  ;;  %p95_p1 = scmp.ne.s32.totalorder %s4268_s22, %s4264_s1 }
  0x2d   : > { %5335 = sst [smem:[#allocation35_spill]] %s4280_s24  ;;  %s5412_s27 = smov (%p58_p0, %s57_s27), 0 }
  0x2e   : > { %5336 = sst [smem:[#allocation36_spill]] %s4284_s25  ;;  %s5414_s28 = smov (!%p58_p0, %s60_s28), %s4284_s25 }
  0x2f   : > { %5337 = sst [smem:[#allocation37_spill]] %s4288_s3  ;;  %p96_p2 = scmp.eq.s32.totalorder %s4288_s3, 0 }
  0x30   : > { %5338 = sst [smem:[#allocation38_spill]] %s5412_s27  ;;  %p101_p3 = scmp.ne.s32.totalorder %s4264_s1, %s4260_s21 }
  0x31   : > { %p62_p4 = scmp.ge.s32.totalorder %s5414_s28, 2  ;;  %p563_p5 = scmp.eq.s32.totalorder %s3191_s26, 3 }
  0x32   : > { %p4478_p6 = por %p96_p2, %p95_p1  ;;  %p3635_p9 = scmp.lt.s32.totalorder %s4288_s3, 4 }
  0x33   : > { %s5416_s28 = smov (%p62_p4, %s5414_s28), 0  ;;  %p4487_p7 = por %p563_p5, %p101_p3 }
  0x34   : > { %5340 = sst [smem:[#allocation39_spill]] %s5416_s28  ;;  %s85_s18 = ssub.s32 %s4284_s25, %s5416_s28 }
  0x35   : > { %s5341_s23 = scalar_select %p4487_p7, 1, 0 }
  0x36   : > { %p86_p8 = scmp.eq.s32.totalorder %s85_s18, 0  ;;  %s4495_s26 = sand.u32 1, %s4288_s3  }
  0x37   : > { %5342 = sst [smem:[#allocation40_spill]] %s5341_s23  ;;  %s5285_s17 = sand.u32 1, %s4268_s22  }
  0x38   : > { %s4499_s16 = scalar_select %p86_p8, %s4268_s22, %s88_s29  }
  0x39   : > { %s3195_s14 = sshll.u32 %s5285_s17, 4  ;;  %s3500_s13 = sshll.u32 %s4284_s25, 4 }
  0x3a   : > { %5343 = sst [smem:[#allocation41_spill]] %s4499_s16  ;;  %s607_s8 = scalar_lea.vmem [#allocation7], %s3195_s14 }
  0x3b   : > { %s5344_s28 = sld [smem:[#allocation45_spill]]  ;;  %s615_s7 = sshll.u32 %s607_s8, 4  ;;  %s616_s7 = int_to_ptr.vmem [resolvable:$true] %s615_s7 }
  0x3c   : > { %p4511_p10 = pnand %p3635_p9, %p4478_p6  ;;  %s5287_s17 = scalar_lea.sflag [#allocation8], %s4495_s26 }
  0x3d   : > { %s5288_s16 = smov 128   ;;  %s5289_s12 = smov 8  }
  0x3e   : > { %s137_s8 = ssub.s32 %s4280_s24, %s5412_s27  ;;  %p147_p12 = scmp.ne.s32.totalorder %s4256_s20, %s4252_s30 }
  0x3f   : > { %p138_p11 = scmp.eq.s32.totalorder %s137_s8, 0  ;;  %s4534_s19 = sand.u32 1, %s4256_s20  }
  0x40   : > { %p149_p13 = por %p147_p12, %p96_p2  ;;  %s5292_s23 = scalar_lea.sflag [#allocation11], %s4495_s26 }
  0x41   : > { %s612_s18 = scalar_lea.hbm %s5344_s28, %s3500_s13  ;;  %s140_s13 = sadd.s32 1, %s4256_s20 }
  0x42   : > { %s613_s6 = sshll.u32 %s612_s18, 4  ;;  %s5347_s18 = sld [smem:[#allocation47_spill]]  ;;  %s614_s6 = int_to_ptr.hbm [resolvable:$true] %s613_s6 }
  0x43   : > { %3605 = dma.hbm_to_vmem [thread:$0]  (!%p4511_p10), %s614_s6, 256, %s616_s7, %s5287_s17, %s5288_s16, %s5288_s16, %s5289_s12  }
  0x44   : > { %s4529_s14 = scalar_select %p138_p11, %s4256_s20, %s140_s13  }
  0x45   : > { %s645_s7 = scalar_lea.vmem [#allocation10], %s4534_s19  ;;  %p4543_p0 = pnand %p3635_p9, %p149_p13 }
  0x46   : > { %5346 = sst [smem:[#allocation42_spill]] %s4529_s14  ;;  %s652_s17 = sshll.u32 %s645_s7, 4  ;;  %s653_s17 = int_to_ptr.vmem [resolvable:$true] %s652_s17 }
  0x47   : > { %s3198_s13 = sshll.u32 %s4534_s19, 6  ;;  %s3501_s16 = sshll.u32 %s4280_s24, 6 }
  0x48   : > { %s648_s2 = scalar_lea.hbm %s5347_s18, %s4280_s24  ;;  %s5349_s5 = sld [smem:[#allocation49_spill]] }
  0x49   : > { %s650_s6 = sshll.u32 %s648_s2, 4  ;;  %s680_s7 = scalar_lea.vmem [#allocation13], %s3198_s13  ;;  %s651_s6 = int_to_ptr.hbm [resolvable:$true] %s650_s6 }
  0x4a   : > { %3611 = dma.hbm_to_vmem [thread:$0]  (!%p4543_p0), %s651_s6, 16, %s653_s17, %s5292_s23  }
  0x4b   : > { %s688_s12 = sshll.u32 %s680_s7, 4  ;;  %s5294_s14 = scalar_lea.sflag [#allocation14], %s4495_s26  ;;  %s689_s12 = int_to_ptr.vmem [resolvable:$true] %s688_s12 }
  0x4c   : > { %s5295_s20 = smov 64   ;;  %s5297_s15 = smov 4  }
  0x4d   : > { %s5350_s9 = sld [smem:[#allocation53_spill]]  ;;  %s724_s28 = scalar_lea.vmem [#allocation15], %s3198_s13 }
  0x4e   : > { %s685_s18 = scalar_lea.hbm %s5349_s5, %s3501_s16  ;;  %s5351_s10 = sld [smem:[#allocation54_spill]] }
  0x4f   : > { %s686_s27 = sshll.u32 %s685_s18, 4  ;;  %s732_s18 = sshll.u32 %s724_s28, 4  ;;  %s687_s27 = int_to_ptr.hbm [resolvable:$true] %s686_s27  ;;  %s4568_s18 = int_to_ptr.vmem [resolvable:$true] %s732_s18 }
  0x50   : > { %3617 = dma.hbm_to_vmem [thread:$0]  (!%p4543_p0), %s687_s27, 1024, %s689_s12, %s5294_s14, %s5295_s20, %s5295_s20, %s5297_s15  }
  0x51   : > { %s745_s17 = scalar_lea.vmem [#allocation16], %s4534_s19  ;;  %s5293_s13 = scalar_lea.sflag [#allocation17], %s4495_s26 }
  0x52   : > { %s4583_s6 = sadd.s32 4294967295, %s4288_s3   ;;  %p153_p2 = scmp.ne.s32.totalorder %s4252_s30, %s4248_s0 }
  0x53   : > { %s729_s2 = scalar_lea.hbm %s5350_s9, %s3501_s16  ;;  %s752_s16 = sshll.u32 %s745_s17, 4  ;;  %s753_s16 = int_to_ptr.vmem [resolvable:$true] %s752_s16 }
  0x54   : > { %s730_s7 = sshll.u32 %s729_s2, 4  ;;  %s748_s27 = scalar_lea.hbm %s5351_s10, %s4280_s24  ;;  %s4570_s7 = int_to_ptr.hbm [resolvable:$true] %s730_s7 }
  0x55   : > { %s750_s12 = sshll.u32 %s748_s27, 4  ;;  %p102_p4 = scmp.eq.s32.totalorder %s4583_s6, 0  ;;  %s751_s12 = int_to_ptr.hbm [resolvable:$true] %s750_s12 }
  0x56   : > { %3623 = dma.hbm_to_vmem [thread:$0]  (!%p4543_p0), %s751_s12, 16, %s753_s16, %s5293_s13  }
  0x57   : > { %p557_p5 = scmp.eq.s32.totalorder %s4583_s6, 3  ;;  %p3192_p6 = scmp.ge.s32.totalorder %s4288_s3, 1 }
  0x58   : > { %p570_p8 = scmp.lt.s32.totalorder %s4288_s3, 5  ;;  %p4596_p9 = por %p102_p4, %p101_p3 }
  0x59   : > { %p4602_p11 = por %p153_p2, %p102_p4  ;;  %p4609_p12 = por %p557_p5, %p95_p1 }
  0x5a   : > { %p4613_p13 = pnand %p3192_p6, %p570_p8  ;;  %s5357_s12 = sld [smem:[#allocation44_spill]] }
  0x5b   : > { %s5354_s0 = scalar_select %p4609_p12, 1, 0 }
  0x5c   : > { %p3598_p3 = pneg %p4613_p13  ;;  %s4294_s16 = smov [#allocation4]  }
  0x5d   : > { %5355 = sst [smem:[#allocation43_spill]] %s5354_s0  ;;  %s583_s13 = sshll.u32 %s4294_s16, 4  ;;  %s584_s13 = int_to_ptr.vmem [resolvable:$true] %s583_s13 }
  0x5e   : > { %p3599_p1 = pnand %p3598_p3, %p102_p4  ;;  %s5358_s15 = sld [smem:[#allocation46_spill]] }
  0x5f   : > { %s5360_s9 = smov 128   ;;  %s5361_s16 = sand.u32 1, %s4268_s22  }
  0x60   : > { %s581_s17 = sshll.u32 %s5357_s12, 4  ;;  %s5359_s12 = smov 8   ;;  %s582_s17 = int_to_ptr.hbm [resolvable:$true] %s581_s17 }
  0x61   : > { %3601 = dma.hbm_to_vmem [thread:$0]  (!%p3599_p1), %s582_s17, 256, %s584_s13, [#allocation5], %s5360_s9, %s5360_s9, %s5359_s12  }
  0x62   : > { %s628_s10 = scalar_lea.vmem [#allocation9], %s5361_s16  ;;  %s5362_s3 = scalar_lea.sflag [#allocation8], %s4495_s26 }
  0x63   : > { %s635_s21 = sshll.u32 %s628_s10, 4  ;;  %s5363_s4 = sld [smem:[#allocation48_spill]]  ;;  %s636_s21 = int_to_ptr.vmem [resolvable:$true] %s635_s21 }
  0x64   : > { %s631_s28 = scalar_lea.hbm %s5358_s15, %s4284_s25  ;;  %s5364_s9 = scalar_lea.sflag [#allocation11], %s4495_s26 }
  0x65   : > { %s633_s27 = sshll.u32 %s631_s28, 4  ;;  %s662_s28 = scalar_lea.vmem [#allocation12], %s4534_s19  ;;  %s634_s27 = int_to_ptr.hbm [resolvable:$true] %s633_s27 }
  0x66   : > { %3608 = dma.hbm_to_vmem [thread:$0]  (!%p4511_p10), %s634_s27, 16, %s636_s21, %s5362_s3  }
  0x67   : > { %s669_s25 = sshll.u32 %s662_s28, 4  ;;  %s5365_s10 = smov 4   ;;  %s670_s25 = int_to_ptr.vmem [resolvable:$true] %s669_s25 }
  0x68   : > { %s5366_s29 = smov 64   ;;  %s5367_s13 = scalar_lea.sflag [#allocation14], %s4495_s26 }
  0x69   : > { %s665_s15 = scalar_lea.hbm %s5363_s4, %s4280_s24  ;;  %s5368_s11 = sld [smem:[#allocation55_spill]] }
  0x6a   : > { %s667_s0 = sshll.u32 %s665_s15, 4  ;;  %s762_s27 = scalar_lea.vmem [#allocation18], %s4534_s19  ;;  %s668_s0 = int_to_ptr.hbm [resolvable:$true] %s667_s0 }
  0x6b   : > { %3614 = dma.hbm_to_vmem [thread:$0]  (!%p4543_p0), %s668_s0, 16, %s670_s25, %s5364_s9  }
  0x6c   : > { %3620 = dma.hbm_to_vmem [thread:$0]  (!%p4543_p0), %s4570_s7, 1024, %s4568_s18, %s5367_s13, %s5366_s29, %s5366_s29, %s5365_s10  }
  0x6d   : > { %s769_s12 = sshll.u32 %s762_s27, 4  ;;  %s5369_s20 = scalar_lea.sflag [#allocation17], %s4495_s26  ;;  %s770_s12 = int_to_ptr.vmem [resolvable:$true] %s769_s12 }
  0x6e   : > { %s3204_s25 = sshll.u32 %s4534_s19, 7  ;;  %s3503_s0 = sshll.u32 %s4280_s24, 7 }
  0x6f   : > { %s765_s17 = scalar_lea.hbm %s5368_s11, %s4280_s24  ;;  %s5370_s28 = sld [smem:[#allocation59_spill]] }
  0x70   : > { %s767_s16 = sshll.u32 %s765_s17, 4  ;;  %s801_s9 = scalar_lea.vmem [#allocation19], %s3204_s25  ;;  %s768_s16 = int_to_ptr.hbm [resolvable:$true] %s767_s16 }
  0x71   : > { %3626 = dma.hbm_to_vmem [thread:$0]  (!%p4543_p0), %s768_s16, 16, %s770_s12, %s5369_s20  }
  0x72   : > { %s809_s13 = sshll.u32 %s801_s9, 4  ;;  %s798_s21 = scalar_lea.sflag [#allocation20], %s4534_s19  ;;  %s810_s13 = int_to_ptr.vmem [resolvable:$true] %s809_s13 }
  0x73   : > { %827 = sbr.rel (%p4613_p13) target bundleno = 3342 (0xd0e), region = 96 }
  0x75   : > { %s806_s18 = scalar_lea.hbm %s5370_s28, %s3503_s0 }
  0x76   : > { %s807_s7 = sshll.u32 %s806_s18, 4  ;;  %s808_s7 = int_to_ptr.hbm [resolvable:$true] %s807_s7 }
  0x77   : > { %3629 = dma.hbm_to_vmem [thread:$0]  (!%p4543_p0), %s808_s7, 2048, %s810_s13, %s798_s21, %s5366_s29, %s5366_s29, %s5365_s10  }
  0x78   : > { %4219 = dma.done.wait (%p102_p4), [#allocation5], 256  }
  0x79   : > { %4221 = vsyncadd (%p102_p4), [#allocation5], 4294967040  ;;  %s834_s26 = sand.u32 1, %s4583_s6   ;;  %s4683_s3 = sand.u32 1, %s4264_s1  }
  0x7a   : > { %s5305_s19 = sshll.u32 %s4683_s3, 4  ;;  %s835_s8 = scalar_lea.sflag [#allocation8], %s834_s26 }
  0x7b   : > { %s4688_s10 = scalar_lea.vmem [#allocation7], %s5305_s19 }
  0x7c   : > { %4223 = dma.done.wait (%p4596_p9), %s835_s8, 272  }
  0x7d   : > { %4225 = vsyncadd (%p4596_p9), %s835_s8, 4294967024  ;;  %s4695_s2 = sand.u32 1, %s4252_s30   ;;  %s854_s29 = scalar_lea.sflag [#allocation11], %s834_s26 }
  0x7e   : > { %4227 = dma.done.wait (%p4602_p11), %s854_s29, 32  }
  0x7f   : > { %4229 = vsyncadd (%p4602_p11), %s854_s29, 4294967264  ;;  %s3210_s27 = sshll.u32 %s4695_s2, 6  ;;  %s872_s12 = scalar_lea.sflag [#allocation14], %s834_s26 }
  0x80   : > { %s4705_s16 = scalar_lea.vmem [#allocation13], %s3210_s27 }
  0x81   : > { %4231 = dma.done.wait (%p4602_p11), %s872_s12, 2048  }
  0x82   : > { %4233 = vsyncadd (%p4602_p11), %s872_s12, 4294965248  ;;  %s4711_s20 = scalar_lea.vmem [#allocation15], %s3210_s27  ;;  %s892_s25 = scalar_lea.sflag [#allocation17], %s834_s26 }
  0x83   : > { %4235 = dma.done.wait (%p4602_p11), %s892_s25, 32  }
  0x84   : > { %4237 = vsyncadd (%p4602_p11), %s892_s25, 4294967264  ;;  %s3212_s14 = sshll.u32 %s4695_s2, 7  ;;  %s910_s28 = scalar_lea.sflag [#allocation20], %s4695_s2 }
  0x85   : > { %s4721_s18 = scalar_lea.vmem [#allocation19], %s3212_s14 }
  0x86   : > { %4239 = dma.done.wait (%p4602_p11), %s910_s28, 2048  }
  0x87   : > { %4241 = vsyncadd (%p4602_p11), %s910_s28, 4294965248  ;;  %s5371_s7 = sld [smem:[#allocation33_spill]] }
  0x88   : > { %s5373_s12 = sld [smem:[#allocation51_spill]] }
  0x89   : > { %s5374_s0 = sld [smem:[#allocation52_spill]] }
  0x8a   : > { %s5375_s21 = sld [smem:[#allocation56_spill]] }
  0x8b   : > { %s5376_s11 = sld [smem:[#allocation57_spill]] }
  0x8c   : > { %s5377_s23 = sld [smem:[#allocation58_spill]] }
  0x8d   : > { %p1032_p10 = scmp.lt.s32.totalorder %s5371_s7, 1  ;;  %s5378_s15 = sld [smem:[#allocation60_spill]] }
  0x8e   : > { %p3221_p0 = scmp.ne.s32.totalorder %s5371_s7, 0 }
  0x8f   : > { %s4729_s9 = scalar_select %p1032_p10, %s5371_s7, 1 }
  0x91   : > { %s3504_s29 = sshll.u32 %s4729_s9, 7  ;;  %s3505_s14 = sshll.u32 %s4729_s9, 8 }
  0x92   : > { %s4739_s25 = scalar_lea.vmem %s5373_s12, %s3504_s29  ;;  %s4745_s6 = scalar_lea.vmem %s5374_s0, %s3505_s14 }
  0x93   : > { %s1047_s17 = scalar_lea.vmem %s5375_s21, %s4729_s9  ;;  %s4754_s26 = scalar_lea.vmem %s5376_s11, %s3504_s29 }
  0x94   : > { %s3220_s8 = sshll.u32 %s4729_s9, 1  ;;  %s1059_s0 = scalar_lea.vmem %s5378_s15, %s4729_s9 }
  0x95   : > { %s4760_s12 = scalar_lea.vmem %s5377_s23, %s3220_s8  ;;  %s5379_s14 = sshll.u32 %s4683_s3, 4 }
  0x96   : > { %s4768_s28 = scalar_lea.vmem [#allocation21], %s5379_s14  ;;  %1064 = sbr.rel (%p3221_p0) target bundleno = 162 (0xa2), region = 140 }
  0x9b   : > { %v1065_v0 = vld [vmem:[%s4688_s10] sm:$0xff]  ;;  %v1066_v2 = vld [vmem:[%s4688_s10 + $0x8] sm:$0xff] }
  0x9c   : > { %v1069_v1 = vld [vmem:[#allocation4] sm:$0xff]  ;;  %v1067_v3 = vmul.f32 11.313708, %v1065_v0  ;;  %v1068_v4 = vmul.f32 11.313708, %v1066_v2  ;;  %v1070_v5 = vld [vmem:[#allocation4 + $0x8] sm:$0xff] }
  0x9e   : > { %v1071_v6 = vadd.f32 %v1069_v1, %v1067_v3  ;;  %v1072_v7 = vadd.f32 %v1070_v5, %v1068_v4 }
  0xa0   : > { %1073 = vst [vmem:[#allocation2] sm:$0xff] %v1071_v6 }
  0xa1   : > { %1074 = vst [vmem:[#allocation2 + $0x8] sm:$0xff] %v1072_v7 }
  0xa2 PF: > { %v4295_v10 = vmov 128.0   ;;  %v3514_v25 = vld [vmem:[%s4705_s16 + $0x38] sm:$0xff]  ;;  %v3513_v26 = vld [vmem:[%s4705_s16 + $0x30] sm:$0xff]  ;;  %v3512_v29 = vld [vmem:[%s4705_s16 + $0x28] sm:$0xff]  ;;  %s5380_s4 = scalar_lea.vmem [#allocation10], %s4695_s2  ;;  %s5381_s11 = scalar_lea.vmem [#allocation12], %s4695_s2 }
  0xa3   : > { %3752 = vrcp.f32 %v4295_v10  ;;  %1237 = vmatpush.bf16.msra.mxu0 %v3514_v25  ;;  %v3511_v30 = vld [vmem:[%s4705_s16 + $0x20] sm:$0xff]  ;;  %v3510_v32 = vld [vmem:[%s4705_s16 + $0x18] sm:$0xff]  ;;  %v3509_v37 = vld [vmem:[%s4705_s16 + $0x10] sm:$0xff]  ;;  %s5382_s24 = sld [smem:[#allocation50_spill]]  ;;  %s4297_s10 = smov 80   ;;  %vm1665_vm13 = vcmask 130048  }
  0xa4   : > { %v3508_v40 = vld [vmem:[%s4705_s16 + $0x8] sm:$0xff]  ;;  %v3507_v46 = vld [vmem:[%s4705_s16] sm:$0xff]  ;;  %s4298_s5 = smov 112   ;;  %s4299_s16 = smov 96  }
  0xa5   : > { %s5384_s7 = scalar_lea.vmem [#allocation9], %s4683_s3  ;;  %s4300_s8 = smov 64  }
  0xa6   : > { %s4301_s29 = smov 48   ;;  %s4302_s13 = smov 32  }
  0xa7   : > { %v1075_v8 = vld [vmem:[#allocation2] sm:$0xff]  ;;  %1238 = vmatpush.bf16.msra.mxu0 %v3513_v26  ;;  %s5391_s23 = sld [smem:[#allocation33_spill]] }
  0xa8   : > { %1079 = vadd.xlane.f32.xlu0 %v1075_v8  ;;  %v1076_v9 = vld [vmem:[#allocation2 + $0x8] sm:$0xff]  ;;  %v1283_v26 = vld [vmem:[%s4745_s6] sm:$0xff] }
  0xa9   : > { %v3753_v11 = vpop.eup %3752  ;;  %s5383_s19 = scalar_lea.vmem %s5382_s24, %s4729_s9 }
  0xaa   : > { %v1084_v12 = vmul.f32 128.0, %v3753_v11  ;;  %vm1088_vm0 = vweird.f32 %v3753_v11 }
  0xab   : > { %1239 = vmatpush.bf16.msra.mxu0 %v3512_v29  ;;  %v3515_v29 = vld [vmem:[%s4739_s25] sm:$0xff] }
  0xac   : > { %v1085_v13 = vsub.f32 1.0, %v1084_v12 }
  0xad   : > { %p3494_p2 = scmp.ne.s32.totalorder %s5391_s23, 1 }
  0xae   : > { %v1086_v14 = vmul.f32 %v3753_v11, %v1085_v13  ;;  %v3745_v13 = vld [vmem:[%s5380_s4] ss:$0 sm:$0xff]  ;;  %s5392_s15 = sld [smem:[#allocation61_spill]] (!%p3494_p2) }
  0xaf   : > { %1240 = vmatpush.bf16.msra.mxu0 %v3511_v30  ;;  %v1285_v30 = vld [vmem:[%s4745_s6 + $0x10] sm:$0xff]  ;;  %s5393_s4 = sld [smem:[#allocation62_spill]] (!%p3494_p2) }
  0xb0   : > { %1081 = vadd.xlane.f32.xlu0 %v1076_v9  ;;  %v1087_v15 = vadd.f32 %v3753_v11, %v1086_v14 }
  0xb2   : > { %v4773_v16 = vsel %vm1088_vm0, %v3753_v11, %v1087_v15  ;;  %vm1812_vm0 = vcmask 261248  }
  0xb3   : > { %1241 = vmatpush.bf16.msra.mxu0 %v3510_v32  ;;  %v3519_v32 = vld [vmem:[%s4739_s25 + $0x20] sm:$0xff] }
  0xb7   : > { %1242 = vmatpush.bf16.msra.mxu0 %v3509_v37  ;;  %v1290_v37 = vld [vmem:[%s4745_s6 + $0x38] sm:$0xff] }
  0xbb   : > { %1243 = vmatpush.bf16.msra.mxu0 %v3508_v40  ;;  %v3522_v40 = vld [vmem:[%s4739_s25 + $0x38] sm:$0xff] }
  0xbf   : > { %1244 = vmatpush.bf16.msra.mxu0 %v3507_v46 }
 0x11b   : > { %v1080_v17 = vpop.xlane.xlu0 %1079 }
 0x11c   : > { %v1090_v18 = vmul.f32 %v4773_v16, %v1080_v17 }
 0x11e   : > { %v4776_v19 = vsub.f32 %v1075_v8, %v1090_v18 }
 0x120   : > { %v1094_v20 = vmul.f32 %v4776_v19, %v4776_v19 }
 0x122   : > { %1096 = vadd.xlane.f32.xlu1 %v1094_v20 }
 0x123   : > { %v1082_v21 = vpop.xlane.xlu0 %1081 }
 0x124   : > { %v1091_v22 = vmul.f32 %v4773_v16, %v1082_v21  ;;  %v3746_v21 = vld [vmem:[%s5381_s11] ss:$0 sm:$0xff] }
 0x126   : > { %v4781_v23 = vsub.f32 %v1076_v9, %v1091_v22 }
 0x128   : > { %v1095_v24 = vmul.f32 %v4781_v23, %v4781_v23 }
 0x12a   : > { %1098 = vadd.xlane.f32.xlu1 %v1095_v24 }
 0x195   : > { %v1097_v27 = vpop.xlane.xlu1 %1096 }
 0x196   : > { %v1100_v28 = vmul.f32 0.007874016, %v1097_v27  ;;  %v4296_v27 = vmov 0  }
 0x197   : > { %3742 = vset.pattern.permute.xlu2 %v4296_v27  ;;  %3744 = vset.pattern.permute.xlu1 %v4296_v27 }
 0x198   : > { %3754 = vrsqrt.f32 %v1100_v28  ;;  %vm1109_vm1 = vcmp.eq.f32.partialorder %v1100_v28, inf  ;;  %v1112_v47 = vand.u32 2147483648, %v1100_v28  ;;  %vm1111_vm2 = vcmp.eq.f32.partialorder %v1100_v28, 0.0  ;;  %1317 = vperm.xlu2 %3742, %v1283_v26   ;;  %3743 = vset.pattern.permute.xlu0 %v4296_v27 }
 0x199   : > { %1327 = vperm.xlu0 %3743, %v1285_v30  }
 0x19d   : > { %v1099_v31 = vpop.xlane.xlu1 %1098 }
 0x19e   : > { %v3755_v33 = vpop.eup %3754  ;;  %v1101_v34 = vmul.f32 0.007874016, %v1099_v31  ;;  %v1286_v31 = vld [vmem:[%s4745_s6 + $0x18] sm:$0xff] }
 0x19f   : > { %v1103_v35 = vmul.f32 %v3755_v33, %v1100_v28  ;;  %1332 = vperm.xlu1 %3744, %v1286_v31  }
 0x1a0   : > { %3756 = vrsqrt.f32 %v1101_v34  ;;  %vm1121_vm3 = vcmp.eq.f32.partialorder %v1101_v34, inf  ;;  %v1124_v55 = vand.u32 2147483648, %v1101_v34  ;;  %vm1123_vm4 = vcmp.eq.f32.partialorder %v1101_v34, 0.0 }
 0x1a1   : > { %v1104_v36 = vmul.f32 %v3755_v33, %v1103_v35  ;;  %v3520_v35 = vld [vmem:[%s4739_s25 + $0x28] sm:$0xff] }
 0x1a3   : > { %v1105_v38 = vmul.f32 0.5, %v1104_v36  ;;  %v1288_v36 = vld [vmem:[%s4745_s6 + $0x28] sm:$0xff] }
 0x1a5   : > { %v1106_v39 = vsub.f32 1.5, %v1105_v38  ;;  %v3517_v38 = vld [vmem:[%s4739_s25 + $0x10] sm:$0xff] }
 0x1a6   : > { %v3757_v41 = vpop.eup %3756 }
 0x1a7   : > { %v1107_v42 = vmul.f32 %v3755_v33, %v1106_v39  ;;  %v1115_v43 = vmul.f32 %v3757_v41, %v1101_v34  ;;  %v1287_v33 = vld [vmem:[%s4745_s6 + $0x20] sm:$0xff]  ;;  %1352 = vperm.xlu1 %3744, %v1290_v37   ;;  %v3521_v39 = vld [vmem:[%s4739_s25 + $0x30] sm:$0xff] }
 0x1a9   : > { %v1108_v44 = vmul.f32 %v1107_v42, %v1100_v28  ;;  %v1116_v45 = vmul.f32 %v3757_v41, %v1115_v43  ;;  %v3524_v42 = vld [vmem:[%s4739_s25 + $0x48] sm:$0xff]  ;;  %v3530_v43 = vld [vmem:[%s4739_s25 + $0x78] sm:$0xff] }
 0x1ab   : > { %v1110_v48 = vsel %vm1109_vm1, %v1100_v28, %v1108_v44  ;;  %v1117_v49 = vmul.f32 0.5, %v1116_v45  ;;  %v1284_v28 = vld [vmem:[%s4745_s6 + $0x8] sm:$0xff]  ;;  %v3747_v45 = vld [vmem:[%s5383_s19] ss:$0 sm:$0xff]  ;;  %vm1891_vm1 = vcmask 392448  }
 0x1ac   : > { %v1113_v50 = vsel %vm1111_vm2, %v1112_v47, %v1110_v48  ;;  %1322 = vperm.xlu2 %3742, %v1284_v28   ;;  %vm1970_vm2 = vcmask 523648  }
 0x1ad   : > { %v1126_v51 = vadd.f32 1e-06, %v1113_v50  ;;  %v1118_v52 = vsub.f32 1.5, %v1117_v49 }
 0x1af   : > { %3758 = vrcp.f32 %v1126_v51  ;;  %v1119_v53 = vmul.f32 %v3757_v41, %v1118_v52  ;;  %v1139_v63 = vand.u32 2147483648, %v1126_v51  ;;  %vm1133_vm6 = vweird.f32 %v1126_v51  ;;  %v3523_v41 = vld [vmem:[%s4739_s25 + $0x40] sm:$0xff] }
 0x1b0   : > { %v1137_v1 = vand.u32 2147483647, %v1126_v51  ;;  %v1299_v52 = vld [vmem:[%s4745_s6 + $0x80] sm:$0xff] }
 0x1b1   : > { %v1120_v54 = vmul.f32 %v1119_v53, %v1101_v34  ;;  %v1140_v5 = vor.u32 1.1754944e-38, %v1139_v63  ;;  %v1289_v53 = vld [vmem:[%s4745_s6 + $0x30] sm:$0xff]  ;;  %v1300_v63 = vld [vmem:[%s4745_s6 + $0x88] sm:$0xff] }
 0x1b2   : > { %vm1138_vm8 = vcmp.eq.f32.partialorder %v1137_v1, 8.507059e+37 }
 0x1b3   : > { %v1122_v56 = vsel %vm1121_vm3, %v1101_v34, %v1120_v54  ;;  %v3516_v34 = vld [vmem:[%s4739_s25 + $0x8] sm:$0xff]  ;;  %vm2049_vm3 = vcmask 654848  }
 0x1b4   : > { %v1125_v57 = vsel %vm1123_vm4, %v1124_v55, %v1122_v56  ;;  %1337 = vperm.xlu2 %3742, %v1287_v33   ;;  %vm2128_vm4 = vcmask 786048  }
 0x1b5   : > { %v3759_v58 = vpop.eup %3758  ;;  %v1127_v59 = vadd.f32 1e-06, %v1125_v57 }
 0x1b6   : > { %v1129_v60 = vmul.f32 %v3759_v58, %v1126_v51  ;;  %vm1134_vm5 = vweird.f32 %v3759_v58 }
 0x1b7   : > { %3760 = vrcp.f32 %v1127_v59  ;;  %vm1135_vm7 = vmor %vm1133_vm6, %vm1134_vm5  ;;  %v1154_v8 = vand.u32 2147483648, %v1127_v59  ;;  %v1152_v10 = vand.u32 2147483647, %v1127_v59  ;;  %vm1148_vm10 = vweird.f32 %v1127_v59 }
 0x1b8   : > { %v1130_v61 = vsub.f32 1.0, %v1129_v60  ;;  %vm2207_vm5 = vcmask 917248   ;;  %vm2286_vm6 = vcmask 1048448  }
 0x1b9   : > { %v1155_v14 = vor.u32 1.1754944e-38, %v1154_v8  ;;  %vm1153_vm12 = vcmp.eq.f32.partialorder %v1152_v10, 8.507059e+37 }
 0x1ba   : > { %v1131_v62 = vmul.f32 %v3759_v58, %v1130_v61 }
 0x1bc   : > { %v1132_v0 = vadd.f32 %v3759_v58, %v1131_v62  ;;  %1342 = vperm.xlu2 %3742, %v1288_v36  }
 0x1bd   : > { %v3761_v2 = vpop.eup %3760 }
 0x1be   : > { %v1136_v3 = vsel %vm1135_vm7, %v3759_v58, %v1132_v0  ;;  %v1144_v4 = vmul.f32 %v3761_v2, %v1127_v59  ;;  %vm1149_vm9 = vweird.f32 %v3761_v2  ;;  %v1302_v59 = vld [vmem:[%s4745_s6 + $0x98] sm:$0xff] }
 0x1bf   : > { %v1141_v7 = vsel %vm1138_vm8, %v1140_v5, %v1136_v3  ;;  %vm1150_vm11 = vmor %vm1148_vm10, %vm1149_vm9 }
 0x1c0   : > { %v1145_v6 = vsub.f32 1.0, %v1144_v4  ;;  %v1142_v11 = vmul.f32 %v1141_v7, %v4776_v19 }
 0x1c2   : > { %v1146_v9 = vmul.f32 %v3761_v2, %v1145_v6  ;;  %v1161_v20 = vmul.f32 %v3745_v13, %v1142_v11 }
 0x1c4   : > { %v1147_v12 = vadd.f32 %v3761_v2, %v1146_v9  ;;  %v1166_v24 = vadd.f32 %v3746_v21, %v1161_v20 }
 0x1c6   : > { %v1151_v15 = vsel %vm1150_vm11, %v3761_v2, %v1147_v12 }
 0x1c7   : > { %v1156_v17 = vsel %vm1153_vm12, %v1155_v14, %v1151_v15 }
 0x1c8   : > { %v1157_v18 = vmul.f32 %v1156_v17, %v4781_v23  ;;  %v3518_v23 = vld [vmem:[%s4739_s25 + $0x18] sm:$0xff] }
 0x1ca   : > { %v1162_v22 = vmul.f32 %v3745_v13, %v1157_v18 }
 0x1cc   : > { %v1167_v19 = vadd.f32 %v3746_v21, %v1162_v22 }
 0x1ce   : > { %v1168_v25 = vpack.c.bf16 %v1167_v19, %v1166_v24 }
 0x1d0   : > { %1245 = vmatmul.bf16.vlgmr.msra.gmra.mxu0 %v1168_v25  ;;  %3572 = vmatpush.bf16.xpose.msra.mxu1 %v1168_v25 }
 0x1d1   : > { %1578 = vmatpush.bf16.xpose.msrb.mxu0 %v1168_v25  ;;  %3573 = vmatpush.bf16.xpose.msra.mxu2 %v1168_v25 }
 0x1d7   : > { %1594 = vmatmul.bf16.vlgmr.msra.gmra.mxu1 %v3518_v23 }
 0x1d8   : > { %1654 = vmatmul.bf16.vlgmr.msra.gmra.mxu2 %v3530_v43 }
 0x1e0   : > { %1579 = vmatmul.bf16.vlgmr.msrb.gmra.mxu0 %v3515_v29 }
 0x1e7   : > { %1599 = vmatmul.bf16.gmra.mxu1 %v3519_v32 }
 0x1f0   : > { %1584 = vmatmul.bf16.gmra.mxu0 %v3516_v34 }
 0x1f2   : > { %v1318_v50 = vpop.permute.xlu2 %1317 }
 0x1f7   : > { %1604 = vmatmul.bf16.gmra.mxu1 %v3520_v35 }
 0x200   : > { %1589 = vmatmul.bf16.gmra.mxu0 %v3517_v38 }
 0x206   : > { %v1323_v54 = vpop.permute.xlu2 %1322 }
 0x207   : > { %1609 = vmatmul.bf16.gmra.mxu1 %v3521_v39 }
 0x20b   : > { %v1328_v0 = vpop.permute.xlu0 %1327 }
 0x20e   : > { %v1338_v7 = vpop.permute.xlu2 %1337 }
 0x211   : > { %v1333_v1 = vpop.permute.xlu1 %1332 }
 0x216   : > { %v1343_v10 = vpop.permute.xlu2 %1342 }
 0x217   : > { %1614 = vmatmul.bf16.gmra.mxu1 %v3522_v40  ;;  %v1660_v40 = vld [vmem:[%s5384_s7] sm:$0x1] }
 0x218   : > { %vm1661_vm14 = vcmp.eq.s32.totalorder %v1660_v40, 0 }
 0x219   : > { %v1353_v24 = vpop.permute.xlu1 %1352 }
 0x227   : > { %1619 = vmatmul.bf16.gmra.mxu1 %v3523_v41 }
 0x237   : > { %1624 = vmatmul.bf16.gmra.mxu1 %v3524_v42  ;;  %v1685_v42 = vsel %vm1661_vm14, 1, %v4296_v27 }
 0x238   : > { %v1686_v43 = vperm.slane %v1685_v42, 0 }
 0x23a   : > { %vm4866_vm15 = vcmp.eq.s32.totalorder %v1686_v43, 1 }
 0x24d   : > { %v1246_v44 = vpop.f32.mrf.mxu0 }
 0x24e   : > { %v1247_v47 = vadd.f32 %v3747_v45, %v1246_v44 }
 0x254   : > { %v1595_v56 = vpop.f32.mrf.mxu1 }
 0x255   : > { %v1248_v46 = vpop.f32.mrf.mxu0 }
 0x256   : > { %v1249_v48 = vadd.f32 %v3747_v45, %v1248_v46 }
 0x258   : > { %v4825_v49 = vpack.c.bf16 %v1249_v48, %v1247_v47 }
 0x25a   : > { %1896 = vrot.lane.b32.xlu1 %v4825_v49, %s4297_s10  ;;  %1738 = vrot.lane.b32.xlu2 %v4825_v49, %s4298_s5 }
 0x25b   : > { %v4859_v39 = vpop.f32.mrf.mxu2 }
 0x25c   : > { %v1597_v62 = vpop.f32.mrf.mxu1 }
 0x25d   : > { %v1580_v51 = vpop.f32.mrf.mxu0  ;;  %v1598_v19 = vadd.f32 %v1597_v62, %v1353_v24 }
 0x25e   : > { %v1581_v55 = vadd.f32 %v1580_v51, %v1318_v50 }
 0x262   : > { %1397 = vperm.xlu1 %3744, %v1299_v52   ;;  %1347 = vperm.xlu2 %3742, %v1289_v53  }
 0x263   : > { %v4863_v41 = vpop.f32.mrf.mxu2 }
 0x264   : > { %v4839_v5 = vpop.f32.mrf.mxu1 }
 0x265   : > { %v1582_v57 = vpop.f32.mrf.mxu0 }
 0x266   : > { %v1583_v58 = vadd.f32 %v1582_v57, %v1323_v54 }
 0x268   : > { %v1663_v60 = vpack.c.bf16 %v1583_v58, %v1581_v55 }
 0x26a   : > { %1676 = vmatpush.bf16.msrb.mxu2 %v1663_v60  ;;  %1412 = vperm.xlu1 %3744, %v1302_v59  }
 0x26b   : > { %1817 = vrot.lane.b32.xlu2 %v4825_v49, %s4299_s16 }
 0x26c   : > { %v4841_v9 = vpop.f32.mrf.mxu1 }
 0x26d   : > { %3318 = vmatmul.msk.bf16.vlgmr.msrb.gmra.mxu2 %vm1665_vm13, %v4825_v49  ;;  %v1585_v61 = vpop.f32.mrf.mxu0 }
 0x26e   : > { %v1586_v2 = vadd.f32 %v1585_v61, %v1328_v0 }
 0x273   : > { %1402 = vperm.xlu2 %3742, %v1300_v63  }
 0x274   : > { %v4843_v15 = vpop.f32.mrf.mxu1 }
 0x275   : > { %v1587_v3 = vpop.f32.mrf.mxu0 }
 0x276   : > { %v1588_v4 = vadd.f32 %v1587_v3, %v1333_v1 }
 0x278   : > { %v1735_v6 = vpack.c.bf16 %v1588_v4, %v1586_v2 }
 0x27a   : > { %1750 = vmatpush.bf16.msra.mxu2 %v1735_v6 }
 0x27c   : > { %v4845_v17 = vpop.f32.mrf.mxu1 }
 0x27d   : > { %v1590_v8 = vpop.f32.mrf.mxu0 }
 0x27e   : > { %v1591_v11 = vadd.f32 %v1590_v8, %v1338_v7 }
 0x284   : > { %v4847_v18 = vpop.f32.mrf.mxu1 }
 0x285   : > { %v1592_v12 = vpop.f32.mrf.mxu0 }
 0x286   : > { %v1593_v13 = vadd.f32 %v1592_v12, %v1343_v10 }
 0x288   : > { %v1815_v14 = vpack.c.bf16 %v1593_v13, %v1591_v11 }
 0x28a   : > { %1829 = vmatpush.bf16.msrb.mxu2 %v1815_v14  ;;  %v3525_v14 = vld [vmem:[%s4739_s25 + $0x50] sm:$0xff] }
 0x28b   : > { %1629 = vmatmul.bf16.gmra.mxu1 %v3525_v14  ;;  %v1292_v14 = vld [vmem:[%s4745_s6 + $0x48] sm:$0xff] }
 0x28c   : > { %v4849_v20 = vpop.f32.mrf.mxu1 }
 0x294   : > { %v4851_v21 = vpop.f32.mrf.mxu1 }
 0x29c   : > { %v4854_v23 = vpop.f32.mrf.mxu1 }
 0x2a4   : > { %v1620_v30 = vpop.f32.mrf.mxu1 }
 0x2ac   : > { %v1622_v32 = vpop.f32.mrf.mxu1 }
 0x2b4   : > { %v1739_v22 = vpop.permute.xlu2 %1738 }
 0x2b5   : > { %3320 = vmatmul.msk.bf16.vlgmr.msra.gmra.mxu2 %vm1665_vm13, %v1739_v22 }
 0x2bc   : > { %v1348_v25 = vpop.permute.xlu2 %1347 }
 0x2bd   : > { %v1596_v26 = vadd.f32 %v1595_v56, %v1348_v25 }
 0x2bf   : > { %v1894_v28 = vpack.c.bf16 %v1598_v19, %v1596_v26 }
 0x2c1   : > { %1908 = vmatpush.bf16.msra.mxu0 %v1894_v28 }
 0x2c5   : > { %v1818_v29 = vpop.permute.xlu2 %1817 }
 0x2c6   : > { %3322 = vmatmul.msk.bf16.vlgmr.msrb.gmra.mxu2 %vm1665_vm13, %v1818_v29 }
 0x2cc   : > { %v1897_v31 = vpop.permute.xlu1 %1896 }
 0x2cd   : > { %3324 = vmatmul.msk.bf16.vlgmr.msra.gmra.mxu0 %vm1665_vm13, %v1897_v31  ;;  %v1403_v33 = vpop.permute.xlu2 %1402 }
 0x2ce   : > { %v1623_v35 = vadd.f32 %v1622_v32, %v1403_v33 }
 0x2d4   : > { %v1398_v34 = vpop.permute.xlu1 %1397 }
 0x2d5   : > { %v1621_v36 = vadd.f32 %v1620_v30, %v1398_v34  ;;  %v3526_v34 = vld [vmem:[%s4739_s25 + $0x58] sm:$0xff] }
 0x2d6   : > { %1634 = vmatmul.bf16.gmra.mxu1 %v3526_v34  ;;  %v1307_v34 = vld [vmem:[%s4745_s6 + $0xc0] sm:$0xff] }
 0x2d7   : > { %v1664_v37 = vpack.c.bf16 %v1623_v35, %v1621_v36 }
 0x2d9   : > { %v1717_v38 = vsel %vm1665_vm13, %v1664_v37, 0 }
 0x2da   : > { %1726 = vmatpush.bf16.xpose.msra.mxu3 %v1717_v38 }
 0x2dc   : > { %v4907_v35 = vpop.permute.xlu1 %1412 }
 0x2f0   : > { %v1678_v45 = vpop.f32.mrf.mxu2 }
 0x2f1   : > { %v1683_v46 = vmul.f32 0.25, %v1678_v45 }
 0x2f3   : > { %v1688_v47 = vsel %vm4866_vm15, -1e+09, %v1683_v46 }
 0x2f4   : > { %v1690_v48 = vsel %vm1665_vm13, %v1688_v47, -inf }
 0x2f5   : > { %1691 = vmax.xlane.f32.xlu0 %v1690_v48 }
 0x2f8   : > { %v1680_v50 = vpop.f32.mrf.mxu2 }
 0x2f9   : > { %v1684_v51 = vmul.f32 0.25, %v1680_v50 }
 0x2fb   : > { %v1689_v52 = vsel %vm4866_vm15, -1e+09, %v1684_v51 }
 0x2fc   : > { %v1693_v27 = vsel %vm1665_vm13, %v1689_v52, -inf }
 0x2fd   : > { %1694 = vmax.xlane.f32.xlu2 %v1693_v27 }
 0x338   : > { %v1752_v53 = vpop.f32.mrf.mxu2 }
 0x339   : > { %v1757_v54 = vmul.f32 0.25, %v1752_v53 }
 0x33b   : > { %v1759_v55 = vsel %vm4866_vm15, -1e+09, %v1757_v54 }
 0x33c   : > { %v1761_v56 = vsel %vm1665_vm13, %v1759_v55, -inf }
 0x33d   : > { %1762 = vmax.xlane.f32.xlu1 %v1761_v56  ;;  %v1291_v56 = vld [vmem:[%s4745_s6 + $0x40] sm:$0xff] }
 0x340   : > { %v1754_v57 = vpop.f32.mrf.mxu2 }
 0x341   : > { %v1758_v63 = vmul.f32 0.25, %v1754_v57 }
 0x343   : > { %v1760_v4 = vsel %vm4866_vm15, -1e+09, %v1758_v63  ;;  %v1294_v63 = vld [vmem:[%s4745_s6 + $0x58] sm:$0xff] }
 0x344   : > { %v1764_v11 = vsel %vm1665_vm13, %v1760_v4, -inf }
 0x349   : > { %v1831_v58 = vpop.f32.mrf.mxu2 }
 0x34a   : > { %v1910_v59 = vpop.f32.mrf.mxu0  ;;  %v1836_v12 = vmul.f32 0.25, %v1831_v58  ;;  %v1293_v58 = vld [vmem:[%s4745_s6 + $0x50] sm:$0xff] }
 0x34b   : > { %v1915_v60 = vmul.f32 0.25, %v1910_v59  ;;  %v3527_v59 = vld [vmem:[%s4739_s25 + $0x60] sm:$0xff] }
 0x34c   : > { %v4899_v13 = vsel %vm4866_vm15, -1e+09, %v1836_v12  ;;  %1639 = vmatmul.bf16.gmra.mxu1 %v3527_v59 }
 0x34d   : > { %v4881_v61 = vsel %vm4866_vm15, -1e+09, %v1915_v60  ;;  %v1840_v22 = vsel %vm1665_vm13, %v4899_v13, -inf }
 0x34e   : > { %v1919_v62 = vsel %vm1665_vm13, %v4881_v61, -inf }
 0x34f   : > { %1920 = vmax.xlane.f32.xlu2 %v1919_v62  ;;  %v1301_v62 = vld [vmem:[%s4745_s6 + $0x90] sm:$0xff] }
 0x351   : > { %v1833_v0 = vpop.f32.mrf.mxu2 }
 0x352   : > { %v1837_v1 = vmul.f32 0.25, %v1833_v0  ;;  %v1912_v2 = vpop.f32.mrf.mxu0  ;;  %v1305_v0 = vld [vmem:[%s4745_s6 + $0xb0] sm:$0xff] }
 0x353   : > { %v1916_v3 = vmul.f32 0.25, %v1912_v2  ;;  %v1303_v2 = vld [vmem:[%s4745_s6 + $0xa0] sm:$0xff] }
 0x354   : > { %v4889_v6 = vsel %vm4866_vm15, -1e+09, %v1837_v1 }
 0x355   : > { %v1843_v7 = vsel %vm1665_vm13, %v4889_v6, -inf  ;;  %v1918_v8 = vsel %vm4866_vm15, -1e+09, %v1916_v3 }
 0x356   : > { %1844 = vmax.xlane.f32.xlu1 %v1843_v7  ;;  %v1922_v10 = vsel %vm1665_vm13, %v1918_v8, -inf }
 0x357   : > { %1923 = vmax.xlane.f32.xlu0 %v1922_v10  ;;  %1765 = vmax.xlane.f32.xlu2 %v1764_v11  ;;  %v1304_v10 = vld [vmem:[%s4745_s6 + $0xa8] sm:$0xff] }
 0x35f   : > { %1841 = vmax.xlane.f32.xlu0 %v1840_v22 }
 0x368   : > { %v1692_v24 = vpop.xlane.xlu0 %1691 }
 0x369   : > { %v1696_v19 = vsub.f32 %v1688_v47, %v1692_v24 }
 0x36b   : > { %v1698_v25 = vmul.f32 1.442695, %v1696_v19 }
 0x36d   : > { %3762 = vpow2.f32 %v1698_v25 }
 0x370   : > { %v1695_v26 = vpop.xlane.xlu2 %1694 }
 0x371   : > { %v1697_v28 = vsub.f32 %v1689_v52, %v1695_v26  ;;  %v1306_v52 = vld [vmem:[%s4745_s6 + $0xb8] sm:$0xff] }
 0x373   : > { %v3763_v29 = vpop.eup %3762  ;;  %v1700_v30 = vmul.f32 1.442695, %v1697_v28 }
 0x374   : > { %v1702_v31 = vsel %vm1665_vm13, %v3763_v29, 0.0 }
 0x375   : > { %3764 = vpow2.f32 %v1700_v30  ;;  %1703 = vadd.xlane.f32.xlu0 %v1702_v31 }
 0x37b   : > { %v3765_v32 = vpop.eup %3764 }
 0x37c   : > { %v1705_v33 = vsel %vm1665_vm13, %v3765_v32, 0.0 }
 0x37d   : > { %1706 = vadd.xlane.f32.xlu0 %v1705_v33  ;;  %v1625_v33 = vpop.f32.mrf.mxu1 }
 0x3b0   : > { %v1763_v36 = vpop.xlane.xlu1 %1762 }
 0x3b1   : > { %v1767_v37 = vsub.f32 %v1759_v55, %v1763_v36  ;;  %v1308_v36 = vld [vmem:[%s4745_s6 + $0xc8] sm:$0xff] }
 0x3b3   : > { %v1769_v38 = vmul.f32 1.442695, %v1767_v37 }
 0x3b5   : > { %3766 = vpow2.f32 %v1769_v38  ;;  %v1627_v38 = vpop.f32.mrf.mxu1 }
 0x3bb   : > { %v4909_v40 = vpop.eup %3766 }
 0x3bc   : > { %v1773_v42 = vsel %vm1665_vm13, %v4909_v40, 0.0 }
 0x3bd   : > { %1774 = vadd.xlane.f32.xlu2 %v1773_v42 }
 0x3c2   : > { %v1921_v43 = vpop.xlane.xlu2 %1920 }
 0x3c3   : > { %v1925_v24 = vsub.f32 %v4881_v61, %v1921_v43 }
 0x3c5   : > { %v1927_v25 = vmul.f32 1.442695, %v1925_v24 }
 0x3c9   : > { %v1845_v12 = vpop.xlane.xlu1 %1844 }
 0x3ca   : > { %v1766_v45 = vpop.xlane.xlu2 %1765  ;;  %v1924_v46 = vpop.xlane.xlu0 %1923  ;;  %v1847_v22 = vsub.f32 %v4889_v6, %v1845_v12 }
 0x3cb   : > { %v1768_v47 = vsub.f32 %v1760_v4, %v1766_v45  ;;  %v1926_v48 = vsub.f32 %v1918_v8, %v1924_v46 }
 0x3cc   : > { %v1850_v19 = vmul.f32 1.442695, %v1847_v22 }
 0x3cd   : > { %v1771_v50 = vmul.f32 1.442695, %v1768_v47  ;;  %v1929_v51 = vmul.f32 1.442695, %v1926_v48 }
 0x3cf   : > { %3768 = vpow2.f32 %v1771_v50 }
 0x3d0   : > { %3770 = vpow2.f32 %v1929_v51 }
 0x3d2   : > { %v1842_v57 = vpop.xlane.xlu0 %1841 }
 0x3d3   : > { %v1846_v61 = vsub.f32 %v4899_v13, %v1842_v57  ;;  %v1630_v13 = vpop.f32.mrf.mxu1 }
 0x3d5   : > { %v4914_v27 = vpop.eup %3768  ;;  %1432 = vperm.xlu2 %3742, %v1306_v52   ;;  %v1848_v30 = vmul.f32 1.442695, %v1846_v61  ;;  %v1628_v52 = vadd.f32 %v1627_v38, %v4907_v35 }
 0x3d6   : > { %v4916_v53 = vpop.eup %3770  ;;  %v1776_v54 = vsel %vm1665_vm13, %v4914_v27, 0.0 }
 0x3d7   : > { %1777 = vadd.xlane.f32.xlu1 %v1776_v54  ;;  %v1934_v55 = vsel %vm1665_vm13, %v4916_v53, 0.0 }
 0x3d8   : > { %1935 = vadd.xlane.f32.xlu0 %v1934_v55 }
 0x3db   : > { %v1632_v43 = vpop.f32.mrf.mxu1 }
 0x3dd   : > { %1357 = vperm.xlu2 %3742, %v1291_v56  }
 0x3e3   : > { %v1635_v46 = vpop.f32.mrf.mxu1 }
 0x3e5   : > { %1367 = vperm.xlu2 %3742, %v1293_v58  }
 0x3e8   : > { %v1704_v60 = vpop.xlane.xlu0 %1703 }
 0x3e9   : > { %3772 = vrcp.f32 %v1704_v60 }
 0x3eb   : > { %v1637_v55 = vpop.f32.mrf.mxu1 }
 0x3ec   : > { %1407 = vperm.xlu0 %3743, %v1301_v62  }
 0x3ed   : > { %1372 = vperm.xlu2 %3742, %v1294_v63  }
 0x3ef   : > { %v3773_v3 = vpop.eup %3772 }
 0x3f0   : > { %1427 = vperm.xlu1 %3744, %v1305_v0   ;;  %v1707_v1 = vpop.xlane.xlu0 %1706  ;;  %v1710_v7 = vmul.f32 %v3773_v3, %v3763_v29 }
 0x3f1   : > { %3774 = vrcp.f32 %v1707_v1 }
 0x3f2   : > { %3776 = vpow2.f32 %v1850_v19 }
 0x3f3   : > { %3778 = vpow2.f32 %v1927_v25 }
 0x3f4   : > { %1417 = vperm.xlu0 %3743, %v1303_v2   ;;  %3780 = vpow2.f32 %v1848_v30 }
 0x3f7   : > { %v3775_v4 = vpop.eup %3774 }
 0x3f8   : > { %v1711_v8 = vmul.f32 %v3775_v4, %v3765_v32  ;;  %v4934_v26 = vpop.eup %3776 }
 0x3f9   : > { %v1855_v28 = vsel %vm1665_vm13, %v4934_v26, 0.0  ;;  %v4938_v29 = vpop.eup %3778 }
 0x3fa   : > { %v1712_v11 = vpack.c.bf16 %v1711_v8, %v1710_v7  ;;  %v1931_v6 = vsel %vm1665_vm13, %v4938_v29, 0.0  ;;  %v4943_v31 = vpop.eup %3780 }
 0x3fb   : > { %v1852_v32 = vsel %vm1665_vm13, %v4943_v31, 0.0 }
 0x3fc   : > { %1422 = vperm.xlu0 %3743, %v1304_v10   ;;  %3319 = vmatmul.msk.bf16.vlgmr.msra.gmra.mxu3 %vm1665_vm13, %v1712_v11 }
 0x404   : > { %1362 = vperm.xlu0 %3743, %v1292_v14  }
 0x416   : > { %1856 = vadd.xlane.f32.xlu2 %v1855_v28 }
 0x41a   : > { %1932 = vadd.xlane.f32.xlu1 %v1931_v6 }
 0x42e   : > { %1853 = vadd.xlane.f32.xlu0 %v1852_v32  ;;  %1975 = vrot.lane.b32.xlu2 %v4825_v49, %s4300_s8 }
 0x430   : > { %v1775_v37 = vpop.xlane.xlu2 %1774 }
 0x433   : > { %1437 = vperm.xlu1 %3744, %v1307_v34  }
 0x436   : > { %1442 = vperm.xlu2 %3742, %v1308_v36  }
 0x438   : > { %v1433_v42 = vpop.permute.xlu2 %1432 }
 0x439   : > { %v1638_v60 = vadd.f32 %v1637_v55, %v1433_v42 }
 0x440   : > { %v1358_v45 = vpop.permute.xlu2 %1357 }
 0x441   : > { %v1601_v24 = vadd.f32 %v4839_v5, %v1358_v45 }
 0x442   : > { %2054 = vrot.lane.b32.xlu0 %v4825_v49, %s4301_s29 }
 0x448   : > { %v1368_v47 = vpop.permute.xlu2 %1367 }
 0x449   : > { %v1606_v2 = vadd.f32 %v4843_v15, %v1368_v47 }
 0x44a   : > { %v1778_v50 = vpop.xlane.xlu1 %1777 }
 0x44b   : > { %v1936_v48 = vpop.xlane.xlu0 %1935  ;;  %3782 = vrcp.f32 %v1778_v50 }
 0x44c   : > { %3784 = vrcp.f32 %v1775_v37 }
 0x44d   : > { %3786 = vrcp.f32 %v1936_v48 }
 0x450   : > { %v1373_v56 = vpop.permute.xlu2 %1372 }
 0x451   : > { %v3783_v58 = vpop.eup %3782  ;;  %v1608_v62 = vadd.f32 %v4845_v17, %v1373_v56 }
 0x452   : > { %v3785_v1 = vpop.eup %3784  ;;  %v1782_v3 = vmul.f32 %v3783_v58, %v4914_v27 }
 0x453   : > { %v1781_v7 = vmul.f32 %v3785_v1, %v4909_v40  ;;  %v2052_v8 = vpack.c.bf16 %v1608_v62, %v1606_v2  ;;  %v3787_v30 = vpop.eup %3786 }
 0x455   : > { %v1783_v11 = vpack.c.bf16 %v1782_v3, %v1781_v7 }
 0x45e   : > { %v1408_v51 = vpop.permute.xlu0 %1407 }
 0x45f   : > { %v1626_v54 = vadd.f32 %v1625_v33, %v1408_v51  ;;  %v1940_v33 = vmul.f32 %v3787_v30, %v4916_v53 }
 0x461   : > { %v1736_v57 = vpack.c.bf16 %v1628_v52, %v1626_v54  ;;  %v3528_v54 = vld [vmem:[%s4739_s25 + $0x68] sm:$0xff] }
 0x462   : > { %v1428_v59 = vpop.permute.xlu1 %1427  ;;  %1644 = vmatmul.bf16.gmra.mxu1 %v3528_v54  ;;  %v1296_v54 = vld [vmem:[%s4745_s6 + $0x68] sm:$0xff] }
 0x463   : > { %v1636_v63 = vadd.f32 %v1635_v46, %v1428_v59  ;;  %v1788_v0 = vsel %vm1665_vm13, %v1736_v57, 0 }
 0x464   : > { %1797 = vmatpush.bf16.xpose.msrb.mxu3 %v1788_v0 }
 0x465   : > { %v1895_v4 = vpack.c.bf16 %v1638_v60, %v1636_v63 }
 0x466   : > { %v1418_v35 = vpop.permute.xlu0 %1417 }
 0x467   : > { %v1946_v10 = vsel %vm1665_vm13, %v1895_v4, 0  ;;  %v1631_v12 = vadd.f32 %v1630_v13, %v1418_v35 }
 0x468   : > { %1955 = vmatpush.bf16.xpose.msra.mxu2 %v1946_v10 }
 0x46b   : > { %3321 = vmatmul.msk.bf16.vlgmr.msrb.gmra.mxu3 %vm1665_vm13, %v1783_v11 }
 0x46e   : > { %v1423_v17 = vpop.permute.xlu0 %1422 }
 0x46f   : > { %v1633_v14 = vadd.f32 %v1632_v43, %v1423_v17 }
 0x470   : > { %2066 = vmatpush.bf16.msrb.mxu2 %v2052_v8 }
 0x471   : > { %v1816_v22 = vpack.c.bf16 %v1633_v14, %v1631_v12  ;;  %v1310_v14 = vld [vmem:[%s4745_s6 + $0xd8] sm:$0xff] }
 0x473   : > { %v1867_v15 = vsel %vm1665_vm13, %v1816_v22, 0  ;;  %v1295_v22 = vld [vmem:[%s4745_s6 + $0x60] sm:$0xff] }
 0x474   : > { %1876 = vmatpush.bf16.xpose.msra.mxu3 %v1867_v15  ;;  %v1309_v15 = vld [vmem:[%s4745_s6 + $0xd0] sm:$0xff] }
 0x476   : > { %v1363_v27 = vpop.permute.xlu0 %1362 }
 0x477   : > { %v1603_v40 = vadd.f32 %v4841_v9, %v1363_v27  ;;  %v1640_v9 = vpop.f32.mrf.mxu1  ;;  %v1298_v27 = vld [vmem:[%s4745_s6 + $0x78] sm:$0xff] }
 0x479   : > { %v1973_v19 = vpack.c.bf16 %v1603_v40, %v1601_v24  ;;  %v3529_v24 = vld [vmem:[%s4739_s25 + $0x70] sm:$0xff]  ;;  %s4303_s25 = smov 16  }
 0x47a   : > { %1649 = vmatmul.bf16.gmra.mxu1 %v3529_v24 }
 0x47c   : > { %1987 = vmatpush.bf16.msrb.mxu3 %v1973_v19 }
 0x47f   : > { %v1728_v25 = vpop.f32.mrf.mxu3  ;;  %v1642_v38 = vpop.f32.mrf.mxu1 }
 0x480   : > { %1733 = vst.msk [vmem:[#allocation3] sm:$0xff] %vm1665_vm13, %v1728_v25 }
 0x487   : > { %v1730_v28 = vpop.f32.mrf.mxu3 }
 0x488   : > { %1734 = vst.msk [vmem:[#allocation3 + $0x8] sm:$0xff] %vm1665_vm13, %v1730_v28 }
 0x489   : > { %v1857_v61 = vpop.xlane.xlu2 %1856 }
 0x48d   : > { %v1933_v6 = vpop.xlane.xlu1 %1932 }
 0x48e   : > { %3788 = vrcp.f32 %v1933_v6 }
 0x48f   : > { %3790 = vrcp.f32 %v1857_v61 }
 0x491   : > { %v1976_v36 = vpop.permute.xlu2 %1975 }
 0x494   : > { %v3789_v32 = vpop.eup %3788 }
 0x495   : > { %v1939_v5 = vmul.f32 %v3789_v32, %v4938_v29  ;;  %v3791_v43 = vpop.eup %3790 }
 0x496   : > { %v1861_v53 = vmul.f32 %v3791_v43, %v4934_v26 }
 0x497   : > { %v1941_v34 = vpack.c.bf16 %v1940_v33, %v1939_v5 }
 0x499   : > { %3325 = vmatmul.msk.bf16.vlgmr.msra.gmra.mxu2 %vm1665_vm13, %v1941_v34  ;;  %v1443_v13 = vpop.permute.xlu2 %1442 }
 0x49a   : > { %v1643_v45 = vadd.f32 %v1642_v38, %v1443_v13 }
 0x4a1   : > { %v1854_v37 = vpop.xlane.xlu0 %1853 }
 0x4a2   : > { %3792 = vrcp.f32 %v1854_v37 }
 0x4a5   : > { %v1438_v42 = vpop.permute.xlu1 %1437 }
 0x4a6   : > { %v1641_v46 = vadd.f32 %v1640_v9, %v1438_v42 }
 0x4a8   : > { %v3793_v47 = vpop.eup %3792  ;;  %v1974_v48 = vpack.c.bf16 %v1643_v45, %v1641_v46 }
 0x4a9   : > { %v1860_v29 = vmul.f32 %v3793_v47, %v4943_v31 }
 0x4aa   : > { %v2025_v50 = vsel %vm1665_vm13, %v1974_v48, 0 }
 0x4ab   : > { %v1862_v51 = vpack.c.bf16 %v1861_v53, %v1860_v29  ;;  %2034 = vmatpush.bf16.xpose.msrb.mxu0 %v2025_v50 }
 0x4ad   : > { %3323 = vmatmul.msk.bf16.vlgmr.msra.gmra.mxu3 %vm1665_vm13, %v1862_v51 }
 0x4b4   : > { %v2055_v52 = vpop.permute.xlu0 %2054 }
 0x4b5   : > { %3328 = vmatmul.msk.bf16.vlgmr.msrb.gmra.mxu2 %vm1665_vm13, %v2055_v52 }
 0x4bd   : > { %3326 = vmatmul.msk.bf16.vlgmr.msrb.gmra.mxu3 %vm1665_vm13, %v1976_v36 }
 0x4df   : > { %v1645_v45 = vpop.f32.mrf.mxu1 }
 0x4e7   : > { %v1647_v48 = vpop.f32.mrf.mxu1 }
 0x4ee   : > { %v4976_v55 = vpop.f32.mrf.mxu3 }
 0x4f6   : > { %v4980_v26 = vpop.f32.mrf.mxu3 }
 0x51c   : > { %v4978_v56 = vpop.f32.mrf.mxu2 }
 0x524   : > { %v4982_v31 = vpop.f32.mrf.mxu2 }
 0x530   : > { %v4984_v57 = vpop.f32.mrf.mxu3 }
 0x538   : > { %v4986_v58 = vpop.f32.mrf.mxu3  ;;  %v2068_v59 = vpop.f32.mrf.mxu2 }
 0x539   : > { %v2073_v60 = vmul.f32 0.25, %v2068_v59 }
 0x53b   : > { %v2075_v62 = vsel %vm4866_vm15, -1e+09, %v2073_v60  ;;  %v1297_v60 = vld [vmem:[%s4745_s6 + $0x70] sm:$0xff] }
 0x53c   : > { %v2077_v63 = vsel %vm1665_vm13, %v2075_v62, -inf }
 0x53d   : > { %2078 = vmax.xlane.f32.xlu1 %v2077_v63 }
 0x540   : > { %v1989_v0 = vpop.f32.mrf.mxu3  ;;  %v2070_v1 = vpop.f32.mrf.mxu2 }
 0x541   : > { %v1994_v2 = vmul.f32 0.25, %v1989_v0  ;;  %v2074_v3 = vmul.f32 0.25, %v2070_v1 }
 0x543   : > { %v1996_v4 = vsel %vm4866_vm15, -1e+09, %v1994_v2  ;;  %v2076_v35 = vsel %vm4866_vm15, -1e+09, %v2074_v3 }
 0x544   : > { %v1998_v7 = vsel %vm1665_vm13, %v1996_v4, -inf  ;;  %v2080_v8 = vsel %vm1665_vm13, %v2076_v35, -inf }
 0x545   : > { %1999 = vmax.xlane.f32.xlu2 %v1998_v7  ;;  %2081 = vmax.xlane.f32.xlu1 %v2080_v8 }
 0x548   : > { %v1991_v10 = vpop.f32.mrf.mxu3 }
 0x549   : > { %v1995_v11 = vmul.f32 0.25, %v1991_v10 }
 0x54b   : > { %v1997_v17 = vsel %vm4866_vm15, -1e+09, %v1995_v11 }
 0x54c   : > { %v2001_v12 = vsel %vm1665_vm13, %v1997_v17, -inf }
 0x54d   : > { %2002 = vmax.xlane.f32.xlu0 %v2001_v12 }
 0x55d   : > { %1452 = vperm.xlu2 %3742, %v1310_v14  }
 0x55e   : > { %1377 = vperm.xlu1 %3744, %v1295_v22  }
 0x561   : > { %1447 = vperm.xlu0 %3743, %v1309_v15  }
 0x566   : > { %1392 = vperm.xlu1 %3744, %v1298_v27  }
 0x56e   : > { %2133 = vrot.lane.b32.xlu1 %v4825_v49, %s4302_s13 }
 0x5b0   : > { %v2079_v40 = vpop.xlane.xlu1 %2078 }
 0x5b1   : > { %v2083_v19 = vsub.f32 %v2075_v62, %v2079_v40  ;;  %v1311_v62 = vld [vmem:[%s4745_s6 + $0xe0] sm:$0xff] }
 0x5b3   : > { %v2085_v25 = vmul.f32 1.442695, %v2083_v19 }
 0x5b5   : > { %3794 = vpow2.f32 %v2085_v25 }
 0x5b8   : > { %v2000_v28 = vpop.xlane.xlu2 %1999  ;;  %v2082_v6 = vpop.xlane.xlu1 %2081 }
 0x5b9   : > { %v2004_v61 = vsub.f32 %v1996_v4, %v2000_v28  ;;  %v2084_v30 = vsub.f32 %v2076_v35, %v2082_v6 }
 0x5bb   : > { %v3795_v32 = vpop.eup %3794  ;;  %v2006_v33 = vmul.f32 1.442695, %v2004_v61  ;;  %v2087_v5 = vmul.f32 1.442695, %v2084_v30 }
 0x5bc   : > { %v2089_v34 = vsel %vm1665_vm13, %v3795_v32, 0.0 }
 0x5bd   : > { %3796 = vpow2.f32 %v2006_v33  ;;  %2090 = vadd.xlane.f32.xlu0 %v2089_v34 }
 0x5be   : > { %3798 = vpow2.f32 %v2087_v5 }
 0x5c0   : > { %v2003_v9 = vpop.xlane.xlu0 %2002  ;;  %v1453_v53 = vpop.permute.xlu2 %1452 }
 0x5c1   : > { %v2005_v36 = vsub.f32 %v1997_v17, %v2003_v9  ;;  %v1648_v50 = vadd.f32 %v1647_v48, %v1453_v53 }
 0x5c3   : > { %v3797_v37 = vpop.eup %3796  ;;  %v2008_v38 = vmul.f32 1.442695, %v2005_v36 }
 0x5c4   : > { %v3799_v13 = vpop.eup %3798  ;;  %v2010_v42 = vsel %vm1665_vm13, %v3797_v37, 0.0 }
 0x5c5   : > { %3800 = vpow2.f32 %v2008_v38  ;;  %2011 = vadd.xlane.f32.xlu0 %v2010_v42  ;;  %v2092_v43 = vsel %vm1665_vm13, %v3799_v13, 0.0 }
 0x5c6   : > { %2093 = vadd.xlane.f32.xlu2 %v2092_v43 }
 0x5cb   : > { %v3801_v46 = vpop.eup %3800 }
 0x5cc   : > { %v2013_v47 = vsel %vm1665_vm13, %v3801_v46, 0.0 }
 0x5cd   : > { %2014 = vadd.xlane.f32.xlu1 %v2013_v47 }
 0x5d0   : > { %v1378_v63 = vpop.permute.xlu1 %1377 }
 0x5d1   : > { %v1611_v28 = vadd.f32 %v4847_v18, %v1378_v63 }
 0x5d3   : > { %v1448_v29 = vpop.permute.xlu0 %1447 }
 0x5d4   : > { %v1646_v51 = vadd.f32 %v1645_v45, %v1448_v29  ;;  %v1312_v29 = vld [vmem:[%s4745_s6 + $0xe8] sm:$0xff] }
 0x5d6   : > { %v2053_v52 = vpack.c.bf16 %v1648_v50, %v1646_v51  ;;  %v1314_v50 = vld [vmem:[%s4745_s6 + $0xf8] sm:$0xff] }
 0x5d8   : > { %v2104_v59 = vsel %vm1665_vm13, %v2053_v52, 0  ;;  %v1393_v0 = vpop.permute.xlu1 %1392 }
 0x5d9   : > { %1382 = vperm.xlu0 %3743, %v1296_v54   ;;  %2113 = vmatpush.bf16.xpose.msra.mxu3 %v2104_v59  ;;  %v1618_v12 = vadd.f32 %v4854_v23, %v1393_v0 }
 0x5de   : > { %1387 = vperm.xlu2 %3742, %v1297_v60  }
 0x5e0   : > { %v2134_v2 = vpop.permute.xlu1 %2133 }
 0x5e6   : > { %1457 = vperm.xlu2 %3742, %v1311_v62   ;;  %2212 = vrot.lane.b32.xlu1 %v4825_v49, %s4303_s25 }
 0x630   : > { %v2091_v1 = vpop.xlane.xlu0 %2090 }
 0x631   : > { %3802 = vrcp.f32 %v2091_v1 }
 0x637   : > { %v3803_v35 = vpop.eup %3802 }
 0x638   : > { %v2012_v4 = vpop.xlane.xlu0 %2011  ;;  %v2097_v10 = vmul.f32 %v3803_v35, %v3795_v32 }
 0x639   : > { %v2094_v3 = vpop.xlane.xlu2 %2093 }
 0x63a   : > { %3804 = vrcp.f32 %v2094_v3 }
 0x63b   : > { %3806 = vrcp.f32 %v2012_v4 }
 0x640   : > { %v3805_v7 = vpop.eup %3804  ;;  %v2015_v8 = vpop.xlane.xlu1 %2014 }
 0x641   : > { %v2098_v11 = vmul.f32 %v3805_v7, %v3799_v13  ;;  %v1388_v17 = vpop.permute.xlu2 %1387  ;;  %3808 = vrcp.f32 %v2015_v8  ;;  %v3807_v15 = vpop.eup %3806 }
 0x642   : > { %v1616_v49 = vadd.f32 %v4851_v21, %v1388_v17  ;;  %v2018_v24 = vmul.f32 %v3807_v15, %v3797_v37 }
 0x643   : > { %v2099_v14 = vpack.c.bf16 %v2098_v11, %v2097_v10  ;;  %v1650_v11 = vpop.f32.mrf.mxu1 }
 0x644   : > { %v2210_v22 = vpack.c.bf16 %v1618_v12, %v1616_v49 }
 0x645   : > { %3329 = vmatmul.msk.bf16.vlgmr.msra.gmra.mxu3 %vm1665_vm13, %v2099_v14 }
 0x646   : > { %2224 = vmatpush.bf16.msrb.mxu3 %v2210_v22 }
 0x647   : > { %v3809_v27 = vpop.eup %3808 }
 0x648   : > { %v2019_v40 = vmul.f32 %v3809_v27, %v3801_v46 }
 0x649   : > { %v1458_v51 = vpop.permute.xlu2 %1457 }
 0x64a   : > { %v2020_v19 = vpack.c.bf16 %v2019_v40, %v2018_v24  ;;  %v1651_v27 = vadd.f32 %v1650_v11, %v1458_v51  ;;  %v3538_v51 = vld [vmem:[%s4711_s20 + $0x38] sm:$0xff] }
 0x64b   : > { %v1383_v25 = vpop.permute.xlu0 %1382  ;;  %v1652_v22 = vpop.f32.mrf.mxu1 }
 0x64c   : > { %v1613_v6 = vadd.f32 %v4849_v20, %v1383_v25  ;;  %3327 = vmatmul.msk.bf16.vlgmr.msrb.gmra.mxu0 %vm1665_vm13, %v2020_v19  ;;  %v1313_v25 = vld [vmem:[%s4745_s6 + $0xf0] sm:$0xff]  ;;  %s5387_s6 = scalar_lea.vmem [#allocation16], %s4695_s2 }
 0x64e   : > { %v2131_v23 = vpack.c.bf16 %v1613_v6, %v1611_v28 }
 0x650   : > { %2145 = vmatpush.bf16.msra.mxu0 %v2131_v23 }
 0x658   : > { %v2213_v21 = vpop.permute.xlu1 %2212 }
 0x659   : > { %3332 = vmatmul.msk.bf16.vlgmr.msrb.gmra.mxu3 %vm1665_vm13, %v2213_v21 }
 0x65c   : > { %3330 = vmatmul.msk.bf16.vlgmr.msra.gmra.mxu0 %vm1665_vm13, %v2134_v2 }
 0x6c8   : > { %v5027_v30 = vpop.f32.mrf.mxu3 }
 0x6c9   : > { %v5025_v61 = vpop.f32.mrf.mxu0 }
 0x6d0   : > { %v5031_v33 = vpop.f32.mrf.mxu3 }
 0x6d1   : > { %v5029_v32 = vpop.f32.mrf.mxu0 }
 0x6d9   : > { %v2147_v18 = vpop.f32.mrf.mxu0 }
 0x6da   : > { %v2152_v5 = vmul.f32 0.25, %v2147_v18 }
 0x6dc   : > { %v2226_v20 = vpop.f32.mrf.mxu3  ;;  %v2154_v34 = vsel %vm4866_vm15, -1e+09, %v2152_v5 }
 0x6dd   : > { %v2231_v9 = vmul.f32 0.25, %v2226_v20  ;;  %v2156_v36 = vsel %vm1665_vm13, %v2154_v34, -inf }
 0x6de   : > { %2157 = vmax.xlane.f32.xlu0 %v2156_v36 }
 0x6df   : > { %v2233_v37 = vsel %vm4866_vm15, -1e+09, %v2231_v9 }
 0x6e0   : > { %v2235_v38 = vsel %vm1665_vm13, %v2233_v37, -inf }
 0x6e1   : > { %2236 = vmax.xlane.f32.xlu1 %v2235_v38  ;;  %v2149_v13 = vpop.f32.mrf.mxu0 }
 0x6e2   : > { %v2153_v42 = vmul.f32 0.25, %v2149_v13 }
 0x6e4   : > { %v2228_v43 = vpop.f32.mrf.mxu3  ;;  %v2155_v45 = vsel %vm4866_vm15, -1e+09, %v2153_v42 }
 0x6e5   : > { %v2232_v46 = vmul.f32 0.25, %v2228_v43  ;;  %v2159_v47 = vsel %vm1665_vm13, %v2155_v45, -inf }
 0x6e6   : > { %2160 = vmax.xlane.f32.xlu2 %v2159_v47 }
 0x6e7   : > { %v2234_v48 = vsel %vm4866_vm15, -1e+09, %v2232_v46 }
 0x6e8   : > { %v2238_v53 = vsel %vm1665_vm13, %v2234_v48, -inf }
 0x6e9   : > { %2239 = vmax.xlane.f32.xlu0 %v2238_v53 }
 0x6fa   : > { %1462 = vperm.xlu1 %3744, %v1312_v29  }
 0x6fe   : > { %1472 = vperm.xlu2 %3742, %v1314_v50  }
 0x751   : > { %v2158_v52 = vpop.xlane.xlu0 %2157 }
 0x752   : > { %v2162_v54 = vsub.f32 %v2154_v34, %v2158_v52  ;;  %v3537_v52 = vld [vmem:[%s4711_s20 + $0x30] sm:$0xff] }
 0x754   : > { %v2164_v59 = vmul.f32 1.442695, %v2162_v54  ;;  %v2237_v60 = vpop.xlane.xlu1 %2236  ;;  %v3536_v54 = vld [vmem:[%s4711_s20 + $0x28] sm:$0xff] }
 0x755   : > { %v2241_v62 = vsub.f32 %v2233_v37, %v2237_v60  ;;  %v3534_v60 = vld [vmem:[%s4711_s20 + $0x18] sm:$0xff] }
 0x756   : > { %3810 = vpow2.f32 %v2164_v59  ;;  %v3535_v59 = vld [vmem:[%s4711_s20 + $0x20] sm:$0xff] }
 0x757   : > { %v2243_v63 = vmul.f32 1.442695, %v2241_v62 }
 0x759   : > { %3812 = vpow2.f32 %v2243_v63  ;;  %v2161_v0 = vpop.xlane.xlu2 %2160  ;;  %v3533_v63 = vld [vmem:[%s4711_s20 + $0x10] sm:$0xff] }
 0x75a   : > { %v2163_v1 = vsub.f32 %v2155_v45, %v2161_v0  ;;  %v3532_v0 = vld [vmem:[%s4711_s20 + $0x8] sm:$0xff] }
 0x75c   : > { %v3811_v44 = vpop.eup %3810  ;;  %v2166_v2 = vmul.f32 1.442695, %v2163_v1  ;;  %v2240_v3 = vpop.xlane.xlu0 %2239  ;;  %v3531_v1 = vld [vmem:[%s4711_s20] sm:$0xff]  ;;  %s5388_s20 = scalar_lea.vmem [#allocation18], %s4695_s2 }
 0x75d   : > { %v2242_v4 = vsub.f32 %v2234_v48, %v2240_v3  ;;  %v2168_v35 = vsel %vm1665_vm13, %v3811_v44, 0.0 }
 0x75e   : > { %3814 = vpow2.f32 %v2166_v2  ;;  %2169 = vadd.xlane.f32.xlu0 %v2168_v35 }
 0x75f   : > { %v3813_v7 = vpop.eup %3812  ;;  %v2245_v8 = vmul.f32 1.442695, %v2242_v4 }
 0x760   : > { %v2247_v10 = vsel %vm1665_vm13, %v3813_v7, 0.0 }
 0x761   : > { %3816 = vpow2.f32 %v2245_v8  ;;  %2248 = vadd.xlane.f32.xlu1 %v2247_v10  ;;  %v1473_v28 = vpop.permute.xlu2 %1472  ;;  %v3748_v8 = vld [vmem:[%s5387_s6] ss:$0 sm:$0xff] }
 0x764   : > { %v3815_v17 = vpop.eup %3814 }
 0x765   : > { %v2171_v12 = vsel %vm1665_vm13, %v3815_v17, 0.0 }
 0x766   : > { %2172 = vadd.xlane.f32.xlu0 %v2171_v12 }
 0x767   : > { %v3817_v49 = vpop.eup %3816 }
 0x768   : > { %v2250_v14 = vsel %vm1665_vm13, %v3817_v49, 0.0 }
 0x769   : > { %2251 = vadd.xlane.f32.xlu2 %v2250_v14 }
 0x76c   : > { %v1463_v15 = vpop.permute.xlu1 %1462 }
 0x76d   : > { %v1653_v24 = vadd.f32 %v1652_v22, %v1463_v15  ;;  %v3835_v22 = vld [vmem:[#allocation2 + $0x8] sm:$0xff] }
 0x76f   : > { %v2132_v40 = vpack.c.bf16 %v1653_v24, %v1651_v27 }
 0x771   : > { %v2183_v19 = vsel %vm1665_vm13, %v2132_v40, 0 }
 0x772   : > { %2192 = vmatpush.bf16.xpose.msra.mxu2 %v2183_v19 }
 0x77a   : > { %1964 = vrot.lane.b32.xlu1 %v4978_v56, %s4301_s29  ;;  %1467 = vperm.xlu0 %3743, %v1313_v25  }
 0x77b   : > { %2360 = vmatpush.bf16.msrb.mxu2 %v3538_v51 }
 0x77f   : > { %2361 = vmatpush.bf16.msrb.mxu2 %v3537_v52 }
 0x781   : > { %2043 = vrot.lane.b32.xlu2 %v5025_v61, %s4300_s8 }
 0x782   : > { %2124 = vrot.lane.b32.xlu1 %v5031_v33, %s4297_s10  ;;  %1806 = vrot.lane.b32.xlu0 %v4976_v55, %s4303_s25 }
 0x783   : > { %2362 = vmatpush.bf16.msrb.mxu2 %v3536_v54 }
 0x787   : > { %2363 = vmatpush.bf16.msrb.mxu2 %v3535_v59 }
 0x78a   : > { %1808 = vrot.lane.b32.xlu0 %v4980_v26, %s4303_s25 }
 0x78b   : > { %2364 = vmatpush.bf16.msrb.mxu2 %v3534_v60 }
 0x78f   : > { %2365 = vmatpush.bf16.msrb.mxu2 %v3533_v63  ;;  %v3544_v63 = vld [vmem:[%s4754_s26 + $0x24] sm:$0xf0] }
 0x792   : > { %1885 = vrot.lane.b32.xlu0 %v4984_v57, %s4302_s13 }
 0x793   : > { %2366 = vmatpush.bf16.msrb.mxu2 %v3532_v0  ;;  %v3543_v0 = vld [vmem:[%s4754_s26 + $0x24] sm:$0xf] }
 0x797   : > { %2367 = vmatpush.bf16.msrb.mxu2 %v3531_v1  ;;  %v3386_v1 = vld [vmem:[%s4754_s26 + $0x28] sm:$0xf0] }
 0x79a   : > { %1887 = vrot.lane.b32.xlu0 %v4986_v58, %s4302_s13 }
 0x7a2   : > { %1966 = vrot.lane.b32.xlu0 %v4982_v31, %s4301_s29 }
 0x7aa   : > { %2045 = vrot.lane.b32.xlu0 %v5029_v32, %s4300_s8  ;;  %v1658_v32 = vadd.f32 %v4863_v41, %v1473_v28  ;;  %v3424_v28 = vld [vmem:[%s4754_s26 + $0x70] sm:$0xf] }
 0x7b2   : > { %2122 = vrot.lane.b32.xlu0 %v5027_v30, %s4297_s10 }
 0x7d1   : > { %v2170_v56 = vpop.xlane.xlu0 %2169 }
 0x7d2   : > { %3818 = vrcp.f32 %v2170_v56 }
 0x7d4   : > { %v2249_v31 = vpop.xlane.xlu1 %2248 }
 0x7d8   : > { %v3819_v26 = vpop.eup %3818 }
 0x7d9   : > { %v2173_v55 = vpop.xlane.xlu0 %2172  ;;  %v2176_v57 = vmul.f32 %v3819_v26, %v3811_v44 }
 0x7da   : > { %3820 = vrcp.f32 %v2173_v55 }
 0x7dc   : > { %v2252_v58 = vpop.xlane.xlu2 %2251 }
 0x7dd   : > { %3822 = vrcp.f32 %v2252_v58 }
 0x7de   : > { %3824 = vrcp.f32 %v2249_v31  ;;  %v3416_v31 = vld [vmem:[%s4754_s26 + $0x60] sm:$0xf] }
 0x7e0   : > { %v3821_v6 = vpop.eup %3820 }
 0x7e1   : > { %v2177_v23 = vmul.f32 %v3821_v6, %v3815_v17  ;;  %v3834_v17 = vld [vmem:[#allocation2] sm:$0xff]  ;;  %v3554_v6 = vld [vmem:[%s4754_s26 + $0x74] sm:$0xf0] }
 0x7e3   : > { %v2178_v21 = vpack.c.bf16 %v2177_v23, %v2176_v57  ;;  %v3823_v18 = vpop.eup %3822  ;;  %v3553_v57 = vld [vmem:[%s4754_s26 + $0x74] sm:$0xf]  ;;  %v3425_v23 = vor.u32 %v3554_v6, %v3424_v28 }
 0x7e4   : > { %v3825_v20 = vpop.eup %3824  ;;  %v2256_v34 = vmul.f32 %v3823_v18, %v3817_v49  ;;  %v2044_v13 = vpop.permute.xlu2 %2043 }
 0x7e5   : > { %3331 = vmatmul.msk.bf16.vlgmr.msra.gmra.mxu2 %vm1665_vm13, %v2178_v21  ;;  %v2255_v36 = vmul.f32 %v3825_v20, %v3813_v7  ;;  %v3426_v21 = vld [vmem:[%s4754_s26 + $0x78] sm:$0xf0]  ;;  %2563 = vmatpush.bf16.msra.mxu3 %v3425_v23 }
 0x7e6   : > { %v3429_v58 = vor.u32 %v3553_v57, %v3426_v21 }
 0x7e7   : > { %v2257_v37 = vpack.c.bf16 %v2256_v34, %v2255_v36  ;;  %v3408_v34 = vld [vmem:[%s4754_s26 + $0x50] sm:$0xf]  ;;  %v3549_v36 = vld [vmem:[%s4754_s26 + $0x54] sm:$0xf] }
 0x7ec   : > { %v1468_v61 = vpop.permute.xlu0 %1467 }
 0x7ed   : > { %v1656_v30 = vadd.f32 %v4859_v39, %v1468_v61  ;;  %v1965_v39 = vpop.permute.xlu1 %1964  ;;  %v3552_v61 = vld [vmem:[%s4754_s26 + $0x64] sm:$0xf0] }
 0x7ef   : > { %v2211_v33 = vpack.c.bf16 %v1658_v32, %v1656_v30  ;;  %v3551_v32 = vld [vmem:[%s4754_s26 + $0x64] sm:$0xf]  ;;  %v3417_v30 = vor.u32 %v3552_v61, %v3416_v31 }
 0x7f1   : > { %v2262_v5 = vsel %vm1665_vm13, %v2211_v33, 0  ;;  %v3418_v33 = vld [vmem:[%s4754_s26 + $0x68] sm:$0xf0]  ;;  %2564 = vmatpush.bf16.msra.mxu3 %v3417_v30 }
 0x7f2   : > { %2271 = vmatpush.bf16.xpose.msrb.mxu0 %v2262_v5  ;;  %v3421_v5 = vor.u32 %v3551_v32, %v3418_v33  ;;  %v3570_v33 = vld [vmem:[%s4721_s18 + $0x78] sm:$0xff] }
 0x7f4   : > { %v1807_v9 = vpop.permute.xlu0 %1806 }
 0x7f5   : > { %1813 = vst.msk [vmem:[#allocation3] sm:$0xff] %vm1812_vm0, %v1807_v9  ;;  %v2125_v46 = vpop.permute.xlu1 %2124  ;;  %v3550_v9 = vld [vmem:[%s4754_s26 + $0x54] sm:$0xf0] }
 0x7f9   : > { %3333 = vmatmul.msk.bf16.vlgmr.msrb.gmra.mxu0 %vm1665_vm13, %v2257_v37  ;;  %v3410_v37 = vld [vmem:[%s4754_s26 + $0x58] sm:$0xf0] }
 0x7fa   : > { %2577 = vmatpush.bf16.msra.mxu0 %v3429_v58 }
 0x7fc   : > { %v1809_v38 = vpop.permute.xlu0 %1808 }
 0x7fd   : > { %1814 = vst.msk [vmem:[#allocation3 + $0x8] sm:$0xff] %vm1812_vm0, %v1809_v38  ;;  %v3409_v38 = vor.u32 %v3550_v9, %v3408_v34  ;;  %v3569_v34 = vld [vmem:[%s4721_s18 + $0x70] sm:$0xff] }
 0x7fe   : > { %2578 = vmatpush.bf16.msra.mxu0 %v3421_v5  ;;  %v3561_v9 = vld [vmem:[%s4721_s18 + $0x30] sm:$0xff] }
 0x7ff   : > { %2565 = vmatpush.bf16.msra.mxu3 %v3409_v38 }
 0x804   : > { %v1886_v41 = vpop.permute.xlu0 %1885 }
 0x805   : > { %1892 = vst.msk [vmem:[#allocation3] sm:$0xff] %vm1891_vm1, %v1886_v41  ;;  %v3413_v41 = vor.u32 %v3549_v36, %v3410_v37 }
 0x806   : > { %1971 = vst.msk [vmem:[#allocation3] sm:$0xff] %vm1970_vm2, %v1965_v39  ;;  %v3400_v39 = vld [vmem:[%s4754_s26 + $0x40] sm:$0xf] }
 0x807   : > { %2050 = vst.msk [vmem:[#allocation3] sm:$0xff] %vm2049_vm3, %v2044_v13  ;;  %v3548_v13 = vld [vmem:[%s4754_s26 + $0x44] sm:$0xf0]  ;;  %2579 = vmatpush.bf16.msra.mxu0 %v3413_v41 }
 0x80c   : > { %v1888_v42 = vpop.permute.xlu0 %1887 }
 0x80d   : > { %1893 = vst.msk [vmem:[#allocation3 + $0x8] sm:$0xff] %vm1891_vm1, %v1888_v42  ;;  %v3547_v42 = vld [vmem:[%s4754_s26 + $0x44] sm:$0xf] }
 0x814   : > { %v1967_v43 = vpop.permute.xlu0 %1966 }
 0x815   : > { %1972 = vst.msk [vmem:[#allocation3 + $0x8] sm:$0xff] %vm1970_vm2, %v1967_v43  ;;  %v3402_v43 = vld [vmem:[%s4754_s26 + $0x48] sm:$0xf0] }
 0x81c   : > { %v2046_v45 = vpop.permute.xlu0 %2045 }
 0x81d   : > { %2051 = vst.msk [vmem:[#allocation3 + $0x8] sm:$0xff] %vm2049_vm3, %v2046_v45  ;;  %v3401_v45 = vor.u32 %v3548_v13, %v3400_v39  ;;  %v3568_v13 = vld [vmem:[%s4721_s18 + $0x68] sm:$0xff] }
 0x81e   : > { %2130 = vst.msk [vmem:[#allocation3 + $0x8] sm:$0xff] %vm2128_vm4, %v2125_v46  ;;  %v3405_v46 = vor.u32 %v3547_v42, %v3402_v43  ;;  %v3560_v42 = vld [vmem:[%s4721_s18 + $0x28] sm:$0xff] }
 0x81f   : > { %2566 = vmatpush.bf16.msra.mxu3 %v3401_v45 }
 0x820   : > { %2580 = vmatpush.bf16.msra.mxu0 %v3405_v46  ;;  %v3567_v46 = vld [vmem:[%s4721_s18 + $0x60] sm:$0xff] }
 0x824   : > { %v2123_v47 = vpop.permute.xlu0 %2122 }
 0x825   : > { %2129 = vst.msk [vmem:[#allocation3] sm:$0xff] %vm2128_vm4, %v2123_v47  ;;  %v3392_v47 = vld [vmem:[%s4754_s26 + $0x30] sm:$0xf] }
 0x868   : > { %v2194_v48 = vpop.f32.mrf.mxu2 }
 0x869   : > { %2201 = vrot.lane.b32.xlu0 %v2194_v48, %s4299_s16  ;;  %v3546_v48 = vld [vmem:[%s4754_s26 + $0x34] sm:$0xf0] }
 0x86a   : > { %v3393_v59 = vor.u32 %v3546_v48, %v3392_v47 }
 0x86c   : > { %2567 = vmatpush.bf16.msra.mxu3 %v3393_v59 }
 0x870   : > { %v2196_v53 = vpop.f32.mrf.mxu2 }
 0x871   : > { %2203 = vrot.lane.b32.xlu2 %v2196_v53, %s4299_s16  ;;  %v3545_v53 = vld [vmem:[%s4754_s26 + $0x34] sm:$0xf] }
 0x876   : > { %v2273_v29 = vpop.f32.mrf.mxu0 }
 0x877   : > { %2280 = vrot.lane.b32.xlu1 %v2273_v29, %s4298_s5  ;;  %v3394_v29 = vld [vmem:[%s4754_s26 + $0x38] sm:$0xf0] }
 0x878   : > { %v3397_v60 = vor.u32 %v3545_v53, %v3394_v29 }
 0x87a   : > { %2581 = vmatpush.bf16.msra.mxu0 %v3397_v60 }
 0x87e   : > { %v2275_v50 = vpop.f32.mrf.mxu0 }
 0x87f   : > { %2282 = vrot.lane.b32.xlu0 %v2275_v50, %s4298_s5 }
 0x8cb   : > { %v2204_v62 = vpop.permute.xlu2 %2203 }
 0x8cc   : > { %2209 = vst.msk [vmem:[#allocation3 + $0x8] sm:$0xff] %vm2207_vm5, %v2204_v62  ;;  %v3384_v62 = vld [vmem:[%s4754_s26 + $0x20] sm:$0xf] }
 0x8db   : > { %v2202_v44 = vpop.permute.xlu0 %2201 }
 0x8dc   : > { %2208 = vst.msk [vmem:[#allocation3] sm:$0xff] %vm2207_vm5, %v2202_v44 }
 0x8e9   : > { %v2281_v2 = vpop.permute.xlu1 %2280 }
 0x8ea   : > { %2287 = vst.msk [vmem:[#allocation3] sm:$0xff] %vm2286_vm6, %v2281_v2 }
 0x8f1   : > { %v2283_v3 = vpop.permute.xlu0 %2282  ;;  %v2289_v4 = vld [vmem:[#allocation3] sm:$0xff] }
 0x8f2   : > { %2288 = vst.msk [vmem:[#allocation3 + $0x8] sm:$0xff] %vm2286_vm6, %v2283_v3  ;;  %v3385_v3 = vor.u32 %v3544_v63, %v3384_v62 }
 0x8f4   : > { %2568 = vmatpush.bf16.msra.mxu3 %v3385_v3 }
 0x8f9   : > { %v2290_v35 = vld [vmem:[#allocation3 + $0x8] sm:$0xff] }
 0x8fa   : > { %v2291_v7 = vpack.c.bf16 %v2290_v35, %v2289_v4  ;;  %v3389_v4 = vor.u32 %v3543_v0, %v3386_v1  ;;  %v3376_v35 = vld [vmem:[%s4754_s26 + $0x10] sm:$0xf] }
 0x8fc   : > { %2368 = vmatmul.bf16.vlgmr.msrb.gmra.mxu2 %v2291_v7  ;;  %v3542_v7 = vld [vmem:[%s4754_s26 + $0x14] sm:$0xf0]  ;;  %2582 = vmatpush.bf16.msra.mxu0 %v3389_v4 }
 0x97f   : > { %v2369_v10 = vpop.f32.mrf.mxu2 }
 0x980   : > { %v2370_v11 = vadd.f32 %v3748_v8, %v2369_v10  ;;  %v3378_v10 = vld [vmem:[%s4754_s26 + $0x18] sm:$0xf0] }
 0x982   : > { %v5092_v12 = vadd.f32 %v3834_v17, %v2370_v11 }
 0x984   : > { %2378 = vadd.xlane.f32.xlu2 %v5092_v12 }
 0x987   : > { %v2371_v49 = vpop.f32.mrf.mxu2 }
 0x988   : > { %v2372_v14 = vadd.f32 %v3748_v8, %v2371_v49  ;;  %v3541_v8 = vld [vmem:[%s4754_s26 + $0x14] sm:$0xf]  ;;  %v3377_v49 = vor.u32 %v3542_v7, %v3376_v35 }
 0x98a   : > { %v5095_v15 = vadd.f32 %v3835_v22, %v2372_v14  ;;  %2569 = vmatpush.bf16.msra.mxu3 %v3377_v49  ;;  %v3566_v49 = vld [vmem:[%s4721_s18 + $0x58] sm:$0xff] }
 0x98c   : > { %2380 = vadd.xlane.f32.xlu1 %v5095_v15 }
 0x9f7   : > { %v2379_v27 = vpop.xlane.xlu2 %2378 }
 0x9f8   : > { %v2382_v24 = vmul.f32 %v2379_v27, %v4773_v16  ;;  %v3381_v27 = vor.u32 %v3541_v8, %v3378_v10 }
 0x9fa   : > { %v5100_v40 = vsub.f32 %v5092_v12, %v2382_v24  ;;  %v3368_v24 = vld [vmem:[%s4754_s26] sm:$0xf]  ;;  %2583 = vmatpush.bf16.msra.mxu0 %v3381_v27 }
 0x9fb   : > { %v3564_v27 = vld [vmem:[%s4721_s18 + $0x48] sm:$0xff] }
 0x9fc   : > { %v2386_v19 = vmul.f32 %v5100_v40, %v5100_v40 }
 0x9fe   : > { %2388 = vadd.xlane.f32.xlu0 %v2386_v19  ;;  %v3540_v19 = vld [vmem:[%s4754_s26 + $0x4] sm:$0xf0] }
 0x9ff   : > { %v2381_v25 = vpop.xlane.xlu1 %2380  ;;  %v3369_v21 = vor.u32 %v3540_v19, %v3368_v24  ;;  %v3557_v24 = vld [vmem:[%s4721_s18 + $0x10] sm:$0xff]  ;;  %v3563_v19 = vld [vmem:[%s4721_s18 + $0x40] sm:$0xff] }
 0xa00   : > { %v2383_v56 = vmul.f32 %v2381_v25, %v4773_v16  ;;  %v3539_v25 = vld [vmem:[%s4754_s26 + $0x4] sm:$0xf] }
 0xa01   : > { %2570 = vmatpush.bf16.msra.mxu3 %v3369_v21 }
 0xa02   : > { %v5106_v55 = vsub.f32 %v5095_v15, %v2383_v56  ;;  %v3370_v56 = vld [vmem:[%s4754_s26 + $0x8] sm:$0xf0] }
 0xa03   : > { %v3373_v58 = vor.u32 %v3539_v25, %v3370_v56  ;;  %v3556_v25 = vld [vmem:[%s4721_s18 + $0x8] sm:$0xff]  ;;  %v3555_v56 = vld [vmem:[%s4721_s18] sm:$0xff] }
 0xa04   : > { %v2387_v26 = vmul.f32 %v5106_v55, %v5106_v55 }
 0xa05   : > { %2584 = vmatpush.bf16.msra.mxu0 %v3373_v58  ;;  %2743 = vmatpush.bf16.msrb.mxu3 %v3570_v33 }
 0xa06   : > { %2390 = vadd.xlane.f32.xlu2 %v2387_v26 }
 0xa09   : > { %2744 = vmatpush.bf16.msrb.mxu3 %v3569_v34 }
 0xa0d   : > { %2745 = vmatpush.bf16.msrb.mxu3 %v3568_v13 }
 0xa11   : > { %2746 = vmatpush.bf16.msrb.mxu3 %v3567_v46 }
 0xa15   : > { %2747 = vmatpush.bf16.msrb.mxu3 %v3566_v49 }
 0xa71   : > { %v2389_v18 = vpop.xlane.xlu0 %2388 }
 0xa72   : > { %v5118_v20 = vmul.f32 0.007874016, %v2389_v18  ;;  %v3562_v18 = vld [vmem:[%s4721_s18 + $0x38] sm:$0xff] }
 0xa73   : > { %2729 = vmatpush.bf16.msra.mxu2 %v3562_v18 }
 0xa74   : > { %3826 = vrsqrt.f32 %v5118_v20  ;;  %vm2401_vm7 = vcmp.eq.f32.partialorder %v5118_v20, inf  ;;  %vm2403_vm8 = vcmp.eq.f32.partialorder %v5118_v20, 0.0  ;;  %v2404_v6 = vand.u32 2147483648, %v5118_v20 }
 0xa77   : > { %2730 = vmatpush.bf16.msra.mxu2 %v3561_v9 }
 0xa79   : > { %v2391_v50 = vpop.xlane.xlu2 %2390 }
 0xa7a   : > { %v3827_v51 = vpop.eup %3826  ;;  %v5133_v52 = vmul.f32 0.007874016, %v2391_v50 }
 0xa7b   : > { %v2395_v54 = vmul.f32 %v3827_v51, %v5118_v20  ;;  %2731 = vmatpush.bf16.msra.mxu2 %v3560_v42 }
 0xa7c   : > { %3828 = vrsqrt.f32 %v5133_v52  ;;  %vm2413_vm9 = vcmp.eq.f32.partialorder %v5133_v52, inf  ;;  %vm2415_vm10 = vcmp.eq.f32.partialorder %v5133_v52, 0.0 }
 0xa7d   : > { %v2396_v44 = vmul.f32 %v3827_v51, %v2395_v54 }
 0xa7f   : > { %v2397_v2 = vmul.f32 0.5, %v2396_v44  ;;  %v3749_v44 = vld [vmem:[%s5388_s20] ss:$0 sm:$0xff] }
 0xa81   : > { %v2398_v11 = vsub.f32 1.5, %v2397_v2 }
 0xa82   : > { %v3829_v17 = vpop.eup %3828 }
 0xa83   : > { %v2399_v14 = vmul.f32 %v3827_v51, %v2398_v11  ;;  %v2407_v22 = vmul.f32 %v3829_v17, %v5133_v52 }
 0xa85   : > { %v2400_v26 = vmul.f32 %v2399_v14, %v5118_v20  ;;  %v2408_v28 = vmul.f32 %v3829_v17, %v2407_v22  ;;  %v3565_v14 = vld [vmem:[%s4721_s18 + $0x50] sm:$0xff]  ;;  %v3558_v22 = vld [vmem:[%s4721_s18 + $0x18] sm:$0xff] }
 0xa86   : > { %2748 = vmatpush.bf16.msrb.mxu3 %v3565_v14 }
 0xa87   : > { %v2402_v57 = vsel %vm2401_vm7, %v5118_v20, %v2400_v26  ;;  %v2409_v23 = vmul.f32 0.5, %v2408_v28  ;;  %v2416_v20 = vand.u32 2147483648, %v5133_v52  ;;  %v2477_v26 = vld [vmem:[%s4760_s12] sm:$0x3] }
 0xa88   : > { %v2405_v31 = vsel %vm2403_vm8, %v2404_v6, %v2402_v57  ;;  %v2480_v6 = vperm.slane %v2477_v26, 1  ;;  %v2479_v58 = vperm.slane %v2477_v26, 0 }
 0xa89   : > { %v2418_v61 = vadd.f32 1e-06, %v2405_v31  ;;  %v2410_v32 = vsub.f32 1.5, %v2409_v23 }
 0xa8a   : > { %2749 = vmatpush.bf16.msrb.mxu3 %v3564_v27 }
 0xa8b   : > { %3830 = vrcp.f32 %v2418_v61  ;;  %v2411_v30 = vmul.f32 %v3829_v17, %v2410_v32  ;;  %v2431_v47 = vand.u32 2147483648, %v2418_v61  ;;  %vm2425_vm12 = vweird.f32 %v2418_v61 }
 0xa8c   : > { %v2429_v53 = vand.u32 2147483647, %v2418_v61 }
 0xa8d   : > { %v2412_v5 = vmul.f32 %v2411_v30, %v5133_v52 }
 0xa8e   : > { %vm2430_vm14 = vcmp.eq.f32.partialorder %v2429_v53, 8.507059e+37  ;;  %2750 = vmatpush.bf16.msrb.mxu3 %v3563_v19 }
 0xa8f   : > { %v2414_v36 = vsel %vm2413_vm9, %v5133_v52, %v2412_v5  ;;  %v2432_v52 = vor.u32 1.1754944e-38, %v2431_v47 }
 0xa90   : > { %v2417_v37 = vsel %vm2415_vm10, %v2416_v20, %v2414_v36  ;;  %v3751_v36 = vld [vmem:[%s1059_s0] ss:$0 sm:$0xff] }
 0xa91   : > { %v3831_v38 = vpop.eup %3830  ;;  %v2419_v41 = vadd.f32 1e-06, %v2417_v37 }
 0xa92   : > { %v2421_v39 = vmul.f32 %v3831_v38, %v2418_v61  ;;  %vm2426_vm11 = vweird.f32 %v3831_v38 }
 0xa93   : > { %3832 = vrcp.f32 %v2419_v41  ;;  %vm2427_vm13 = vmor %vm2425_vm12, %vm2426_vm11  ;;  %v2446_v60 = vand.u32 2147483648, %v2419_v41  ;;  %v2444_v63 = vand.u32 2147483647, %v2419_v41  ;;  %vm2440_vm0 = vweird.f32 %v2419_v41 }
 0xa94   : > { %v2422_v43 = vsub.f32 1.0, %v2421_v39 }
 0xa95   : > { %v2447_v2 = vor.u32 1.1754944e-38, %v2446_v60  ;;  %vm2445_vm2 = vcmp.eq.f32.partialorder %v2444_v63, 8.507059e+37 }
 0xa96   : > { %v2423_v45 = vmul.f32 %v3831_v38, %v2422_v43 }
 0xa98   : > { %v2424_v48 = vadd.f32 %v3831_v38, %v2423_v45 }
 0xa99   : > { %v3833_v29 = vpop.eup %3832 }
 0xa9a   : > { %v2428_v50 = vsel %vm2427_vm13, %v3831_v38, %v2424_v48  ;;  %v2436_v51 = vmul.f32 %v3833_v29, %v2419_v41  ;;  %vm2441_vm15 = vweird.f32 %v3833_v29 }
 0xa9b   : > { %v2433_v59 = vsel %vm2430_vm14, %v2432_v52, %v2428_v50  ;;  %vm2442_vm1 = vmor %vm2440_vm0, %vm2441_vm15 }
 0xa9c   : > { %v2437_v54 = vsub.f32 1.0, %v2436_v51  ;;  %v2434_v0 = vmul.f32 %v2433_v59, %v5100_v40  ;;  %v3750_v40 = vld [vmem:[%s1047_s17] ss:$0 sm:$0xff] }
 0xa9e   : > { %v2438_v62 = vmul.f32 %v3833_v29, %v2437_v54  ;;  %v2453_v7 = vmul.f32 %v3749_v44, %v2434_v0 }
 0xaa0   : > { %v2439_v1 = vadd.f32 %v3833_v29, %v2438_v62  ;;  %v2458_v10 = vadd.f32 %v3750_v40, %v2453_v7 }
 0xaa2   : > { %v2443_v3 = vsel %vm2442_vm1, %v3833_v29, %v2439_v1 }
 0xaa3   : > { %v2448_v4 = vsel %vm2445_vm2, %v2447_v2, %v2443_v3 }
 0xaa4   : > { %v2449_v35 = vmul.f32 %v2448_v4, %v5106_v55  ;;  %v3559_v55 = vld [vmem:[%s4721_s18 + $0x20] sm:$0xff] }
 0xaa5   : > { %2732 = vmatpush.bf16.msra.mxu2 %v3559_v55 }
 0xaa6   : > { %v2454_v8 = vmul.f32 %v3749_v44, %v2449_v35 }
 0xaa8   : > { %v2459_v11 = vadd.f32 %v3750_v40, %v2454_v8 }
 0xaa9   : > { %2733 = vmatpush.bf16.msra.mxu2 %v3558_v22 }
 0xaaa   : > { %v2460_v17 = vpack.c.bf16 %v2459_v11, %v2458_v10 }
 0xaac   : > { %2571 = vmatmul.bf16.vlgmr.msra.gmra.mxu3 %v2460_v17  ;;  %2585 = vmatmul.bf16.vlgmr.msra.gmra.mxu0 %v2460_v17 }
 0xaad   : > { %2734 = vmatpush.bf16.msra.mxu2 %v3557_v24 }
 0xab1   : > { %2735 = vmatpush.bf16.msra.mxu2 %v3556_v25 }
 0xab5   : > { %2736 = vmatpush.bf16.msra.mxu2 %v3555_v56 }
 0xb29   : > { %v2586_v28 = vpop.f32.mrf.mxu0 }
 0xb2a   : > { %v2587_v23 = vadd.f32 %v2586_v28, %v2480_v6 }
 0xb2c   : > { %v2592_v61 = vmax.f32 %v2587_v23, 0.0 }
 0xb2f   : > { %v2572_v57 = vpop.f32.mrf.mxu3 }
 0xb30   : > { %v2573_v30 = vadd.f32 %v2572_v57, %v2479_v58 }
 0xb31   : > { %v2588_v21 = vpop.f32.mrf.mxu0 }
 0xb32   : > { %v2589_v31 = vadd.f32 %v2588_v21, %v2480_v6  ;;  %v2591_v20 = vmax.f32 %v2573_v30, 0.0 }
 0xb34   : > { %v2594_v32 = vmax.f32 %v2589_v31, 0.0 }
 0xb36   : > { %v2596_v33 = vpack.c.bf16 %v2594_v32, %v2592_v61 }
 0xb37   : > { %v2574_v18 = vpop.f32.mrf.mxu3 }
 0xb38   : > { %v2575_v5 = vadd.f32 %v2574_v18, %v2479_v58  ;;  %2751 = vmatmul.bf16.vlgmr.msrb.gmra.mxu3 %v2596_v33 }
 0xb3a   : > { %v2593_v34 = vmax.f32 %v2575_v5, 0.0 }
 0xb3c   : > { %v2595_v9 = vpack.c.bf16 %v2593_v34, %v2591_v20 }
 0xb3e   : > { %2737 = vmatmul.bf16.vlgmr.msra.gmra.mxu2 %v2595_v9 }
 0xbbb   : > { %v2752_v37 = vpop.f32.mrf.mxu3 }
 0xbc1   : > { %v2738_v38 = vpop.f32.mrf.mxu2 }
 0xbc2   : > { %v2739_v41 = vadd.f32 %v3751_v36, %v2738_v38 }
 0xbc3   : > { %v2754_v45 = vpop.f32.mrf.mxu3 }
 0xbc4   : > { %v2753_v39 = vadd.f32 %v2752_v37, %v2739_v41 }
 0xbc6   : > { %v2757_v13 = vadd.f32 %v2753_v39, %v5092_v12 }
 0xbc8   : > { %2759 = vst [vmem:[#allocation2] sm:$0xff] %v2757_v13 }
 0xbc9   : > { %v2740_v42 = vpop.f32.mrf.mxu2 }
 0xbca   : > { %v2741_v43 = vadd.f32 %v3751_v36, %v2740_v42 }
 0xbcc   : > { %v2755_v46 = vadd.f32 %v2754_v45, %v2741_v43  ;;  %2764 = sbr.rel (%p3494_p2) target bundleno = 3320 (0xcf8), region = 144 }
 0xbce   : > { %v2758_v47 = vadd.f32 %v2755_v46, %v5095_v15 }
 0xbd0   : > { %2760 = vst [vmem:[#allocation2 + $0x8] sm:$0xff] %v2758_v47 }
 0xbd1   : > { %2767 = vadd.xlane.f32.xlu0 %v2757_v13  ;;  %v3836_v61 = vld [vmem:[%s5392_s15] ss:$0 sm:$0xff] }
 0xbd2   : > { %v3837_v18 = vld [vmem:[%s5393_s4] ss:$0 sm:$0xff] }
 0xbd9   : > { %2769 = vadd.xlane.f32.xlu0 %v2758_v47 }
 0xc44   : > { %v2768_v48 = vpop.xlane.xlu0 %2767 }
 0xc45   : > { %v2771_v53 = vmul.f32 %v2768_v48, %v4773_v16 }
 0xc47   : > { %v2773_v29 = vsub.f32 %v2757_v13, %v2771_v53 }
 0xc49   : > { %v2775_v50 = vmul.f32 %v2773_v29, %v2773_v29 }
 0xc4b   : > { %2777 = vadd.xlane.f32.xlu1 %v2775_v50 }
 0xc4c   : > { %v2770_v12 = vpop.xlane.xlu0 %2769 }
 0xc4d   : > { %v2772_v51 = vmul.f32 %v2770_v12, %v4773_v16 }
 0xc4f   : > { %v5196_v52 = vsub.f32 %v2758_v47, %v2772_v51 }
 0xc51   : > { %v2776_v15 = vmul.f32 %v5196_v52, %v5196_v52 }
 0xc53   : > { %2779 = vadd.xlane.f32.xlu1 %v2776_v15 }
 0xcbe   : > { %v2778_v54 = vpop.xlane.xlu1 %2777 }
 0xcbf   : > { %v2781_v59 = vmul.f32 0.007874016, %v2778_v54 }
 0xcc1   : > { %3838 = vrsqrt.f32 %v2781_v59  ;;  %vm2790_vm3 = vcmp.eq.f32.partialorder %v2781_v59, inf  ;;  %v2793_v40 = vand.u32 2147483648, %v2781_v59  ;;  %vm2792_vm4 = vcmp.eq.f32.partialorder %v2781_v59, 0.0 }
 0xcc6   : > { %v2780_v60 = vpop.xlane.xlu1 %2779 }
 0xcc7   : > { %v3839_v62 = vpop.eup %3838  ;;  %v2782_v63 = vmul.f32 0.007874016, %v2780_v60 }
 0xcc8   : > { %v2784_v0 = vmul.f32 %v3839_v62, %v2781_v59 }
 0xcc9   : > { %3840 = vrsqrt.f32 %v2782_v63  ;;  %vm2802_vm5 = vcmp.eq.f32.partialorder %v2782_v63, inf  ;;  %v2805_v22 = vand.u32 2147483648, %v2782_v63  ;;  %vm2804_vm6 = vcmp.eq.f32.partialorder %v2782_v63, 0.0 }
 0xcca   : > { %v2785_v1 = vmul.f32 %v3839_v62, %v2784_v0 }
 0xccc   : > { %v2786_v44 = vmul.f32 0.5, %v2785_v1 }
 0xcce   : > { %v2787_v2 = vsub.f32 1.5, %v2786_v44 }
 0xccf   : > { %v3841_v3 = vpop.eup %3840 }
 0xcd0   : > { %v2788_v4 = vmul.f32 %v3839_v62, %v2787_v2  ;;  %v2796_v16 = vmul.f32 %v3841_v3, %v2782_v63 }
 0xcd2   : > { %v2789_v35 = vmul.f32 %v2788_v4, %v2781_v59  ;;  %v2797_v7 = vmul.f32 %v3841_v3, %v2796_v16 }
 0xcd4   : > { %v2791_v8 = vsel %vm2790_vm3, %v2781_v59, %v2789_v35  ;;  %v2798_v10 = vmul.f32 0.5, %v2797_v7 }
 0xcd5   : > { %v2794_v11 = vsel %vm2792_vm4, %v2793_v40, %v2791_v8 }
 0xcd6   : > { %v2807_v17 = vadd.f32 1e-06, %v2794_v11  ;;  %v2799_v49 = vsub.f32 1.5, %v2798_v10 }
 0xcd8   : > { %3842 = vrcp.f32 %v2807_v17  ;;  %v2800_v55 = vmul.f32 %v3841_v3, %v2799_v49  ;;  %v2820_v28 = vand.u32 2147483648, %v2807_v17  ;;  %v2818_v57 = vand.u32 2147483647, %v2807_v17 }
 0xcd9   : > { %vm2814_vm8 = vweird.f32 %v2807_v17 }
 0xcda   : > { %v2801_v14 = vmul.f32 %v2800_v55, %v2782_v63  ;;  %v2821_v21 = vor.u32 1.1754944e-38, %v2820_v28  ;;  %vm2819_vm10 = vcmp.eq.f32.partialorder %v2818_v57, 8.507059e+37 }
 0xcdc   : > { %v2803_v27 = vsel %vm2802_vm5, %v2782_v63, %v2801_v14 }
 0xcdd   : > { %v2806_v19 = vsel %vm2804_vm6, %v2805_v22, %v2803_v27 }
 0xcde   : > { %v3843_v24 = vpop.eup %3842  ;;  %v2808_v56 = vadd.f32 1e-06, %v2806_v19 }
 0xcdf   : > { %v2810_v25 = vmul.f32 %v3843_v24, %v2807_v17  ;;  %vm2815_vm7 = vweird.f32 %v3843_v24 }
 0xce0   : > { %3844 = vrcp.f32 %v2808_v56  ;;  %vm2816_vm9 = vmor %vm2814_vm8, %vm2815_vm7  ;;  %v2835_v34 = vand.u32 2147483648, %v2808_v56  ;;  %v2833_v36 = vand.u32 2147483647, %v2808_v56  ;;  %vm2829_vm12 = vweird.f32 %v2808_v56 }
 0xce1   : > { %v2811_v26 = vsub.f32 1.0, %v2810_v25 }
 0xce2   : > { %v2836_v41 = vor.u32 1.1754944e-38, %v2835_v34  ;;  %vm2834_vm14 = vcmp.eq.f32.partialorder %v2833_v36, 8.507059e+37 }
 0xce3   : > { %v2812_v6 = vmul.f32 %v3843_v24, %v2811_v26 }
 0xce5   : > { %v2813_v23 = vadd.f32 %v3843_v24, %v2812_v6 }
 0xce6   : > { %v3845_v58 = vpop.eup %3844 }
 0xce7   : > { %v2817_v31 = vsel %vm2816_vm9, %v3843_v24, %v2813_v23  ;;  %v2825_v30 = vmul.f32 %v3845_v58, %v2808_v56  ;;  %vm2830_vm11 = vweird.f32 %v3845_v58 }
 0xce8   : > { %v2822_v32 = vsel %vm2819_vm10, %v2821_v21, %v2817_v31  ;;  %vm2831_vm13 = vmor %vm2829_vm12, %vm2830_vm11 }
 0xce9   : > { %v2823_v33 = vmul.f32 %v2822_v32, %v2773_v29  ;;  %v2826_v5 = vsub.f32 1.0, %v2825_v30 }
 0xceb   : > { %v2842_v20 = vmul.f32 %v3836_v61, %v2823_v33  ;;  %v2827_v9 = vmul.f32 %v3845_v58, %v2826_v5 }
 0xced   : > { %v2847_v37 = vadd.f32 %v3837_v18, %v2842_v20  ;;  %v2828_v38 = vadd.f32 %v3845_v58, %v2827_v9 }
 0xcef   : > { %2849 = vst [vmem:[%s4768_s28] sm:$0xff] %v2847_v37  ;;  %v2832_v39 = vsel %vm2831_vm13, %v3845_v58, %v2828_v38 }
 0xcf0   : > { %v2837_v13 = vsel %vm2834_vm14, %v2836_v41, %v2832_v39 }
 0xcf1   : > { %v2838_v42 = vmul.f32 %v2837_v13, %v5196_v52 }
 0xcf3   : > { %v2843_v43 = vmul.f32 %v3836_v61, %v2838_v42 }
 0xcf5   : > { %v2848_v45 = vadd.f32 %v3837_v18, %v2843_v43 }
 0xcf7   : > { %2850 = vst [vmem:[%s4768_s28 + $0x8] sm:$0xff] %v2848_v45 }
 0xcf8 PF: > { %s5394_s11 = sld [smem:[#allocation34_spill]]  ;;  %s2864_s16 = sshll.u32 %s4768_s28, 4  ;;  %s2865_s16 = int_to_ptr.vmem [resolvable:$true] %s2864_s16 }
 0xcf9   : > { %s5396_s10 = sld [smem:[#allocation63_spill]]  ;;  %s2852_s8 = scalar_lea.sflag [#allocation6], %s4683_s3 }
 0xcfe   : > { %s3571_s22 = sshll.u32 %s5394_s11, 4 }
 0xcff   : > { %s2863_s5 = scalar_lea.hbm %s5396_s10, %s3571_s22  ;;  %s4166_s20 = scalar_lea.hbm %s5396_s10, 32 }
 0xd00   : > { %s2866_s7 = sshll.u32 %s2863_s5, 4  ;;  %s2867_s7 = int_to_ptr.hbm [resolvable:$true] %s2866_s7 }
 0xd01   : > { %s4160_s29 = sshra.s32 %s2867_s7, 4  ;;  %s4161_s29 = int_to_ptr.hbm [resolvable:$true] %s4160_s29 }
 0xd02   : > { %s4162_s13 = scalar_lea.hbm %s4161_s29, 16  ;;  %p4167_p8 = scmp.lt.s32.totalorder %s4161_s29, %s5396_s10 }
 0xd03   : > { %p4163_p4 = scmp.ne.s32.totalorder %s4161_s29, %s4162_s13  ;;  %p4168_p9 = scmp.lt.s32.totalorder %s4166_s20, %s4162_s13 }
 0xd05   : > { %p4164_p5 = pnand %p4163_p4, %p4609_p12  ;;  %p4169_p11 = por %p4168_p9, %p4167_p8 }
 0xd07   : > { %p4165_p6 = pneg %p4164_p5 }
 0xd09   : > { %p4170_p13 = pnand %p4169_p11, %p4165_p6 }
 0xd0b   : > { %4173 = shalt.err (!%p4170_p13)
}
 0xd0c   : > { %s4304_s3 = smov 128   ;;  %s4305_s28 = smov 8  }
 0xd0d   : > { %3596 = dma.vmem_to_hbm [thread:$0]  (%p4609_p12), %s2865_s16, 256, %s2867_s7, %s2852_s8, %s4304_s3, %s4304_s3, %s4305_s28  }
 0xd0e PF: > { %s5397_s27 = sld [smem:[#allocation37_spill]] }
 0xd0f   : > { %s5398_s2 = sld [smem:[#allocation30_spill]] }
 0xd14   : > { %p3637_p3 = scmp.ge.s32.totalorder %s5397_s27, 2 }
 0xd15   : > { %s2881_s18 = sand.u32 1, %s5398_s2  }
 0xd16   : > { %p3631_p1 = pnand %p3637_p3, %p4487_p7  ;;  %s2882_s23 = scalar_lea.sflag [#allocation6], %s2881_s18 }
 0xd18   : > { %p3632_p10 = pneg %p3631_p1 }
 0xd1a   : > { %4243 = dma.done.wait (%p3632_p10), %s2882_s23, 256  }
 0xd1b   : > { %4245 = vsyncadd (%p3632_p10), %s2882_s23, 4294967040  ;;  %s48_s3 = sadd.s32 1, %s5397_s27   ;;  %s5400_s9 = sld [smem:[#allocation29_spill]] }
 0xd1c   : > { %p45_p0 = scmp.ge.s32.totalorder %s48_s3, 6   ;;  %s5401_s20 = sld [smem:[#allocation42_spill]] }
 0xd1d   : > { %s5402_s21 = sld [smem:[#allocation31_spill]]  ;;  %s5409_s0 = smov %s4252_s30 }
 0xd1e   : > { %s5403_s1 = sld [smem:[#allocation32_spill]] }
 0xd1f   : > { %s5404_s22 = sld [smem:[#allocation41_spill]]  ;;  %47 = sbr.rel (!%p45_p0) target bundleno = 39 (0x27), region = 271 }
 0xd20   : > { %s5405_s2 = sld [smem:[#allocation35_spill]] }
 0xd21   : > { %s5406_s23 = sld [smem:[#allocation36_spill]]  ;;  %s5410_s30 = smov %s5400_s9 }
 0xd22   : > { %s5407_s24 = sld [smem:[#allocation38_spill]] }
 0xd23   : > { %s5408_s25 = sld [smem:[#allocation39_spill]] }
 0xd24   :  { %2888 = vsyncpa [#allocation5], 1 }
 0xd25   :  { %2890 = vsyncpa [#allocation5 + $0x1], 1 }
 0xd26   :  { %2891 = vsyncpa [#allocation8], 1 }
 0xd27   :  { %2893 = vsyncpa [#allocation8 + $0x1], 1 }
 0xd28   :  { %2894 = vsyncpa [#allocation11], 1 }
 0xd29   :  { %2896 = vsyncpa [#allocation11 + $0x1], 1 }
 0xd2a   :  { %2897 = vsyncpa [#allocation14], 1 }
 0xd2b   :  { %2899 = vsyncpa [#allocation14 + $0x1], 1 }
 0xd2c   :  { %2900 = vsyncpa [#allocation17], 1 }
 0xd2d   :  { %2902 = vsyncpa [#allocation17 + $0x1], 1 }
 0xd2e   :  { %2903 = vsyncpa [#allocation20], 1 }
 0xd2f   :  { %2905 = vsyncpa [#allocation20 + $0x1], 1 }
 0xd30   :  { %2906 = vsyncpa [#allocation6], 1 }
 0xd31   :  { %2908 = vsyncpa [#allocation6 + $0x1], 1 }

</bundles_post_ra>
